<compile_context>
chip_gen: v5e
topology: v5e:2x2
jax: 0.10.0
libtpu: 0.0.40
codegen_flags: <defaults>
</compile_context>

<pallas_src>
from math import ceil

import numpy as np
import jax
import jax.numpy as jnp
from jax import lax
from jax.experimental import pallas as pl
from jax.experimental.pallas import tpu as pltpu

BN_EPS = 1e-5
LRELU_SLOPE = 0.1
LANE = 128


def _round_up(x, m):
    return ((x + m - 1) // m) * m


def _tpu_vmem_limit_bytes():
    """Per-generation scoped-VMEM limit.
    v5e/v6e (128 MiB physical) -> 96 MiB; v7x (64 MiB physical) -> 48 MiB."""
    cap = 64 * 1024 * 1024
    try:
        cap = int(pltpu.get_tpu_info().vmem_capacity_bytes)
    except Exception:
        pass
    return int(max(32 * 1024 * 1024, min(cap * 3 // 4, 96 * 1024 * 1024)))


VMEM_LIMIT = _tpu_vmem_limit_bytes()
_COMPILER_PARAMS = pltpu.CompilerParams(
    dimension_semantics=("parallel",), vmem_limit_bytes=VMEM_LIMIT)


def _pick_conv_tm(m, row_bytes, resident_bytes):
    """Largest M-tile that (a) keeps double-buffered tiles + resident weights
    inside the scoped VMEM limit and (b) leaves >= 2 grid steps so both v7x
    TensorCores / megacore halves get work."""
    cap = 1024 if VMEM_LIMIT >= 64 * 1024 * 1024 else 512
    tm = min(cap, max(8, _round_up(m, 8)))
    budget = max(VMEM_LIMIT - 2 * resident_bytes - (4 << 20), 1 << 20)
    while tm > 64 and 2 * row_bytes * tm > budget:
        tm //= 2
    tm = max(8, (tm // 8) * 8)
    if m > 8 and -(-m // tm) < 2:            # guarantee >= 2 M-tiles
        tm = _round_up(-(-m // 2), 8)
    return tm


def _pick_act_tm(m_pad, tm, row_bytes):
    """Pass-2 (BN+act) kernels are HBM-bound VPU work: grow the tile while it
    still fits VMEM, divides m_pad and keeps >= 2 tiles."""
    budget = max(VMEM_LIMIT - (4 << 20), 1 << 20)
    tm2 = tm
    while (tm2 * 2 <= 2048 and m_pad % (tm2 * 2) == 0
           and m_pad // (tm2 * 2) >= 2
           and 2 * row_bytes * (tm2 * 2) <= budget):
        tm2 *= 2
    return tm2


# ----------------------------------------------------------------------------
# Pallas kernels
# ----------------------------------------------------------------------------
def _store_stats(acc_f32, s_ref, ss_ref):
    s = jnp.sum(acc_f32, axis=0, keepdims=True)
    ss = jnp.sum(acc_f32 * acc_f32, axis=0, keepdims=True)
    s_ref[...] = s.reshape(s_ref.shape)
    ss_ref[...] = ss.reshape(ss_ref.shape)


def _conv_stats_kernel(p_ref, w_ref, y_ref, s_ref, ss_ref):
    """Single-branch conv tile (one MXU matmul, bf16 in / f32 acc) + per-tile
    per-channel partial BN stats; conv output stored in bf16."""
    acc = jnp.dot(p_ref[...], w_ref[...], preferred_element_type=jnp.float32)
    y_ref[...] = acc.astype(y_ref.dtype)
    _store_stats(acc, s_ref, ss_ref)


def _convA_split_kernel(p_ref, w_ref, xc_ref, wr_ref,
                        y_ref, r_ref, s_ref, ss_ref, sr_ref, ssr_ref):
    """Stage A for stride==1: 3x3 main conv + separate small 1x1 residual dot
    on x's centre tap (no zero-padded 9*inc residual contraction)."""
    acc = jnp.dot(p_ref[...], w_ref[...], preferred_element_type=jnp.float32)
    accr = jnp.dot(xc_ref[...], wr_ref[...], preferred_element_type=jnp.float32)
    y_ref[...] = acc.astype(y_ref.dtype)
    r_ref[...] = accr.astype(r_ref.dtype)
    _store_stats(acc, s_ref, ss_ref)
    _store_stats(accr, sr_ref, ssr_ref)


def _convA_fused_kernel(p_ref, w_ref,
                        y_ref, r_ref, s_ref, ss_ref, sr_ref, ssr_ref):
    """Stage A for stride!=1: one matmul with [conv1 | conv_res] weights (both
    branches share the same 3x3 windows of x)."""
    c = y_ref.shape[-1]
    acc = jnp.dot(p_ref[...], w_ref[...], preferred_element_type=jnp.float32)
    acc1 = acc[:, :c]
    accr = acc[:, c:]
    y_ref[...] = acc1.astype(y_ref.dtype)
    r_ref[...] = accr.astype(r_ref.dtype)
    _store_stats(acc1, s_ref, ss_ref)
    _store_stats(accr, sr_ref, ssr_ref)


def _bnA_act_kernel(y_ref, r_ref, sc_ref, sh_ref, scr_ref, shr_ref,
                    h_ref, res_ref):
    """Stage A pass 2: folded BN + LeakyReLU for both branches; two separate
    lane-aligned bf16 outputs (h feeds stage B, res feeds the final add)."""
    y = y_ref[...].astype(jnp.float32) * sc_ref[...] + sh_ref[...]
    h_ref[...] = jnp.where(y > 0.0, y, LRELU_SLOPE * y).astype(h_ref.dtype)
    r = r_ref[...].astype(jnp.float32) * scr_ref[...] + shr_ref[...]
    res_ref[...] = jnp.where(r > 0.0, r, LRELU_SLOPE * r).astype(res_ref.dtype)


def _bnB_act_res_kernel(y_ref, sc_ref, sh_ref, res_ref, o_ref):
    """Stage B pass 2: folded BN + LeakyReLU + residual add, f32 output."""
    y = y_ref[...].astype(jnp.float32) * sc_ref[...] + sh_ref[...]
    y = jnp.where(y > 0.0, y, LRELU_SLOPE * y)
    o_ref[...] = y + res_ref[...].astype(jnp.float32)


# ----------------------------------------------------------------------------
# pallas_call wrappers
# ----------------------------------------------------------------------------
def _stats_spec_shape(n_tiles, c):
    spec = pl.BlockSpec((1, 1, c), lambda i: (i, 0, 0))
    shape = jax.ShapeDtypeStruct((n_tiles, 1, c), jnp.float32)
    return spec, shape


def _stageA_conv_split(patches, w1, xc, wr, *, tm):
    m_pad, k = patches.shape
    c = w1.shape[1]
    cin = xc.shape[1]
    n_tiles = m_pad // tm
    st_spec, st_shape = _stats_spec_shape(n_tiles, c)
    return pl.pallas_call(
        _convA_split_kernel,
        grid=(n_tiles,),
        in_specs=[
            pl.BlockSpec((tm, k), lambda i: (i, 0)),
            pl.BlockSpec((k, c), lambda i: (0, 0)),
            pl.BlockSpec((tm, cin), lambda i: (i, 0)),
            pl.BlockSpec((cin, c), lambda i: (0, 0)),
        ],
        out_specs=[
            pl.BlockSpec((tm, c), lambda i: (i, 0)),
            pl.BlockSpec((tm, c), lambda i: (i, 0)),
            st_spec, st_spec, st_spec, st_spec,
        ],
        out_shape=[
            jax.ShapeDtypeStruct((m_pad, c), jnp.bfloat16),
            jax.ShapeDtypeStruct((m_pad, c), jnp.bfloat16),
            st_shape, st_shape, st_shape, st_shape,
        ],
        compiler_params=_COMPILER_PARAMS,
    )(patches, w1, xc, wr)


def _stageA_conv_fused(patches, w_fused, *, tm):
    m_pad, k = patches.shape
    c = w_fused.shape[1] // 2
    n_tiles = m_pad // tm
    st_spec, st_shape = _stats_spec_shape(n_tiles, c)
    return pl.pallas_call(
        _convA_fused_kernel,
        grid=(n_tiles,),
        in_specs=[
            pl.BlockSpec((tm, k), lambda i: (i, 0)),
            pl.BlockSpec((k, 2 * c), lambda i: (0, 0)),
        ],
        out_specs=[
            pl.BlockSpec((tm, c), lambda i: (i, 0)),
            pl.BlockSpec((tm, c), lambda i: (i, 0)),
            st_spec, st_spec, st_spec, st_spec,
        ],
        out_shape=[
            jax.ShapeDtypeStruct((m_pad, c), jnp.bfloat16),
            jax.ShapeDtypeStruct((m_pad, c), jnp.bfloat16),
            st_shape, st_shape, st_shape, st_shape,
        ],
        compiler_params=_COMPILER_PARAMS,
    )(patches, w_fused)


def _stageB_conv(patches, w, *, tm):
    m_pad, k = patches.shape
    c = w.shape[1]
    n_tiles = m_pad // tm
    st_spec, st_shape = _stats_spec_shape(n_tiles, c)
    return pl.pallas_call(
        _conv_stats_kernel,
        grid=(n_tiles,),
        in_specs=[
            pl.BlockSpec((tm, k), lambda i: (i, 0)),
            pl.BlockSpec((k, c), lambda i: (0, 0)),
        ],
        out_specs=[
            pl.BlockSpec((tm, c), lambda i: (i, 0)),
            st_spec, st_spec,
        ],
        out_shape=[
            jax.ShapeDtypeStruct((m_pad, c), jnp.bfloat16),
            st_shape, st_shape,
        ],
        compiler_params=_COMPILER_PARAMS,
    )(patches, w)


def _stageA_bn_act(y, r, sc, sh, scr, shr, *, tm):
    m_pad, c = y.shape
    n_tiles = m_pad // tm
    tspec = pl.BlockSpec((tm, c), lambda i: (i, 0))
    vspec = pl.BlockSpec((1, c), lambda i: (0, 0))
    return pl.pallas_call(
        _bnA_act_kernel,
        grid=(n_tiles,),
        in_specs=[tspec, tspec, vspec, vspec, vspec, vspec],
        out_specs=[tspec, tspec],
        out_shape=[jax.ShapeDtypeStruct((m_pad, c), jnp.bfloat16),
                   jax.ShapeDtypeStruct((m_pad, c), jnp.bfloat16)],
        compiler_params=_COMPILER_PARAMS,
    )(y, r, sc, sh, scr, shr)


def _stageB_bn_act_res(y, sc, sh, res, *, tm):
    m_pad, c = y.shape
    n_tiles = m_pad // tm
    tspec = pl.BlockSpec((tm, c), lambda i: (i, 0))
    vspec = pl.BlockSpec((1, c), lambda i: (0, 0))
    return pl.pallas_call(
        _bnB_act_res_kernel,
        grid=(n_tiles,),
        in_specs=[tspec, vspec, vspec, tspec],
        out_specs=tspec,
        out_shape=jax.ShapeDtypeStruct((m_pad, c), jnp.float32),
        compiler_params=_COMPILER_PARAMS,
    )(y, sc, sh, res)


# ----------------------------------------------------------------------------
# JAX glue
# ----------------------------------------------------------------------------
def _extract_patches_bf16(x_nhwc, ksize, stride, pad):
    """im2col in bf16: k*k taps concatenated along channels -> (M, k*k*Cin)."""
    n, h, w, cin = x_nhwc.shape
    ho = (h + 2 * pad - ksize) // stride + 1
    wo = (w + 2 * pad - ksize) // stride + 1
    m = n * ho * wo
    xp = jnp.pad(x_nhwc.astype(jnp.bfloat16),
                 ((0, 0), (pad, pad), (pad, pad), (0, 0)))
    taps = []
    for ky in range(ksize):
        for kx in range(ksize):
            win = lax.slice(
                xp, (0, ky, kx, 0),
                (n, ky + stride * (ho - 1) + 1,
                 kx + stride * (wo - 1) + 1, cin),
                (1, stride, stride, 1))
            taps.append(win.reshape(m, cin))
    return jnp.concatenate(taps, axis=-1), ho, wo


def _bn_scale_shift(ch_sum, ch_sumsq, gamma, beta, m):
    """Fold batch mean/var (biased, training semantics) + gamma/beta into a
    per-channel scale & shift (tiny (C,) vector math in plain JAX)."""
    mean = ch_sum / m
    var = jnp.maximum(ch_sumsq / m - mean * mean, 0.0)
    scale = gamma * lax.rsqrt(var + BN_EPS)
    shift = beta - mean * scale
    return scale.reshape(1, -1), shift.reshape(1, -1)


def _pad_cols(a, cpad):
    return jnp.pad(a, ((0, 0), (0, cpad - a.shape[1])))


def _pad_vec(v, cpad):
    return jnp.pad(v.astype(jnp.float32), (0, cpad - v.shape[0]))


# ----------------------------------------------------------------------------
# ConvResidual module (deterministically initialized parameters)
# ----------------------------------------------------------------------------
class ConvResidualPallas:
    def __init__(self, inc, ouc, stride, key):
        self._pad = ceil((3 - stride) / 2)
        self.stride = stride
        self.inc, self.ouc = inc, ouc
        self.cpad = _round_up(ouc, LANE)
        keys = jax.random.split(key, 9)

        def conv_w(k, kh, kw, ci, co):
            scale = 1.0 / np.sqrt(kh * kw * ci)
            return scale * jax.random.normal(k, (kh, kw, ci, co), jnp.float32)

        def bn_params(kg, kb, c):
            g = 1.0 + 0.1 * jax.random.normal(kg, (c,), jnp.float32)
            b = 0.1 * jax.random.normal(kb, (c,), jnp.float32)
            return g, b

        # main branch: conv3x3(stride)->BN->LReLU -> conv3x3(1)->BN->LReLU
        self.w1 = conv_w(keys[0], 3, 3, inc, ouc)
        self.g1, self.b1 = bn_params(keys[1], keys[2], ouc)
        self.w2 = conv_w(keys[3], 3, 3, ouc, ouc)
        self.g2, self.b2 = bn_params(keys[4], keys[5], ouc)
        # residual branch: conv3x3(stride) if stride != 1 else conv1x1
        rk = 3 if stride != 1 else 1
        self.res_pad = self._pad if stride != 1 else 0
        self.wr = conv_w(keys[6], rk, rk, inc, ouc)
        self.gr, self.br = bn_params(keys[7], keys[8], ouc)

        cpad = self.cpad
        w1f = _pad_cols(self.w1.reshape(9 * inc, ouc), cpad)
        if stride != 1:
            # Fused [conv1 | conv_res] weight: x's 3x3 windows read once for
            # both branches in a single MXU pass.
            wrf = _pad_cols(self.wr.reshape(9 * inc, ouc), cpad)
            self.wA = jnp.concatenate([w1f, wrf], axis=1).astype(jnp.bfloat16)
            self.wr1 = None
        else:
            # stride==1 residual is 1x1: small separate dot on x itself.
            self.wA = w1f.astype(jnp.bfloat16)
            self.wr1 = _pad_cols(self.wr.reshape(inc, ouc),
                                 cpad).astype(jnp.bfloat16)
        self.g1p = _pad_vec(self.g1, cpad)
        self.b1p = _pad_vec(self.b1, cpad)
        self.grp = _pad_vec(self.gr, cpad)
        self.brp = _pad_vec(self.br, cpad)

        # Stage B consumes the stage-A activation at its padded width (cpad):
        # conv2's K rows are zero-padded for the dead input channels so no
        # narrow channel slice / extra HBM copy is needed between stages.
        w2f = jnp.zeros((3, 3, cpad, cpad), jnp.float32)
        w2f = w2f.at[:, :, :ouc, :ouc].set(self.w2)
        self.wB = w2f.reshape(9 * cpad, cpad).astype(jnp.bfloat16)
        self.g2p = _pad_vec(self.g2, cpad)
        self.b2p = _pad_vec(self.b2, cpad)

    # ---------------- Pallas forward ----------------
    def __call__(self, x_nchw):
        n = x_nchw.shape[0]
        inc, ouc, cpad, stride = self.inc, self.ouc, self.cpad, self.stride
        x = jnp.transpose(x_nchw, (0, 2, 3, 1)).astype(jnp.float32)  # NHWC

        # ---- Stage A: conv1 (+ residual conv) with partial BN stats ----
        patches1, ho, wo = _extract_patches_bf16(x, 3, stride, self._pad)
        m, kA = patches1.shape

        # One M-tile size for both conv stages (sized for the heavier stage).
        row_a = 2 * (kA + (inc if stride == 1 else 0) + 2 * cpad)
        row_b = 2 * (9 * cpad + cpad)
        res_a = int(self.wA.size) * 2 + (int(self.wr1.size) * 2
                                         if self.wr1 is not None else 0)
        res_b = int(self.wB.size) * 2
        tm = _pick_conv_tm(m, max(row_a, row_b), max(res_a, res_b))
        m_pad = _round_up(m, tm)
        patches1 = jnp.pad(patches1, ((0, m_pad - m), (0, 0)))

        if stride == 1:
            xc = jnp.pad(x.reshape(m, inc).astype(jnp.bfloat16),
                         ((0, m_pad - m), (0, 0)))
            convA, convR, s1, ss1, sr, ssr = _stageA_conv_split(
                patches1, self.wA, xc, self.wr1, tm=tm)
        else:
            convA, convR, s1, ss1, sr, ssr = _stageA_conv_fused(
                patches1, self.wA, tm=tm)

        sc1, sh1 = _bn_scale_shift(s1.sum((0, 1)), ss1.sum((0, 1)),
                                   self.g1p, self.b1p, m)
        scr, shr = _bn_scale_shift(sr.sum((0, 1)), ssr.sum((0, 1)),
                                   self.grp, self.brp, m)
        tma = _pick_act_tm(m_pad, tm, 8 * cpad)
        h, res = _stageA_bn_act(convA, convR, sc1, sh1, scr, shr, tm=tma)

        # ---- Stage B: conv2 on h (channels kept at cpad, lane-aligned) ----
        h_sp = h[:m].reshape(n, ho, wo, cpad)
        patches2, _, _ = _extract_patches_bf16(h_sp, 3, 1, self._pad)
        patches2 = jnp.pad(patches2, ((0, m_pad - m), (0, 0)))

        convB, s2, ss2 = _stageB_conv(patches2, self.wB, tm=tm)
        sc2, sh2 = _bn_scale_shift(s2.sum((0, 1)), ss2.sum((0, 1)),
                                   self.g2p, self.b2p, m)
        tmb = _pick_act_tm(m_pad, tm, 8 * cpad)
        out = _stageB_bn_act_res(convB, sc2, sh2, res, tm=tmb)

        out = out[:m, :ouc].reshape(n, ho, wo, ouc)
        return jnp.transpose(out, (0, 3, 1, 2))          # NHWC -> NCHW

    # ---------------- pure-JAX reference ----------------
    # Models the kernel's bf16 MXU operand rounding (standard TPU practice);
    # conv accumulation, BN batch stats, LeakyReLU and the residual add are in
    # f32, matching the PyTorch module's training-mode forward.
    def reference(self, x_nchw):
        def q(a):  # bf16 operand rounding
            return a.astype(jnp.bfloat16).astype(jnp.float32)

        def conv_bn_lrelu(x, w_hwio, gamma, beta, stride, pad):
            y = lax.conv_general_dilated(
                q(x), q(w_hwio), window_strides=(stride, stride),
                padding=((pad, pad), (pad, pad)),
                dimension_numbers=("NHWC", "HWIO", "NHWC"))
            mean = jnp.mean(y, axis=(0, 1, 2), keepdims=True)
            var = jnp.mean((y - mean) ** 2, axis=(0, 1, 2), keepdims=True)
            y = (y - mean) * lax.rsqrt(var + BN_EPS) * gamma + beta
            return jnp.where(y > 0.0, y, LRELU_SLOPE * y)

        x = jnp.transpose(x_nchw, (0, 2, 3, 1))
        res = conv_bn_lrelu(x, self.wr, self.gr, self.br,
                            self.stride, self.res_pad)
        h = conv_bn_lrelu(x, self.w1, self.g1, self.b1,
                          self.stride, self._pad)
        h = conv_bn_lrelu(h, self.w2, self.g2, self.b2, 1, self._pad)
        return jnp.transpose(h + res, (0, 3, 1, 2))


if __name__ == "__main__":
    key = jax.random.PRNGKey(0)
    kx, kp = jax.random.split(key)

    N, INC, OUC, H, W, STRIDE = 2, 4, 8, 16, 16, 1
    x = jax.random.normal(kx, (N, INC, H, W), jnp.float32)

    mod = ConvResidualPallas(INC, OUC, STRIDE, kp)
    fwd = jax.jit(mod.__call__)
    out = jax.block_until_ready(fwd(x))

    assert out.shape == (N, OUC, H, W), out.shape
    ref = jax.block_until_ready(mod.reference(x))
    # Tolerance accounts for bf16 intermediate storage (reference only models
    # bf16 MXU-operand rounding, per the review's re-validation note).
    np.testing.assert_allclose(np.asarray(out), np.asarray(ref),
                               rtol=2e-2, atol=2e-2)
    print("KERNEL_OK")
</pallas_src>

<mosaic_0001>
module attributes {stable_mosaic.version = 11 : i64} {
  func.func @_convA_split_kernel(%arg0: i32, %arg1: memref<256x36xbf16, #tpu.memory_space<vmem>>, %arg2: memref<36x128xbf16, #tpu.memory_space<vmem>>, %arg3: memref<256x4xbf16, #tpu.memory_space<vmem>>, %arg4: memref<4x128xbf16, #tpu.memory_space<vmem>>, %arg5: memref<256x128xbf16, #tpu.memory_space<vmem>>, %arg6: memref<256x128xbf16, #tpu.memory_space<vmem>>, %arg7: memref<1x1x128xf32, #tpu.memory_space<vmem>>, %arg8: memref<1x1x128xf32, #tpu.memory_space<vmem>>, %arg9: memref<1x1x128xf32, #tpu.memory_space<vmem>>, %arg10: memref<1x1x128xf32, #tpu.memory_space<vmem>>) attributes {dimension_semantics = [#tpu.dimension_semantics<parallel>], iteration_bounds = array<i64: 2>, scalar_prefetch = 0 : i64, scratch_operands = 0 : i64, tpu.core_type = #tpu.core_type<tc>, window_params = [{transform_indices = @transform_0, window_bounds = array<i64: 256, 36>}, {pipeline_mode = #tpu.pipeline_mode<synchronous>, transform_indices = @transform_1, window_bounds = array<i64: 36, 128>}, {transform_indices = @transform_2, window_bounds = array<i64: 256, 4>}, {pipeline_mode = #tpu.pipeline_mode<synchronous>, transform_indices = @transform_3, window_bounds = array<i64: 4, 128>}, {transform_indices = @transform_4, window_bounds = array<i64: 256, 128>}, {transform_indices = @transform_5, window_bounds = array<i64: 256, 128>}, {transform_indices = @transform_6, window_bounds = array<i64: 1, 1, 128>}, {transform_indices = @transform_7, window_bounds = array<i64: 1, 1, 128>}, {transform_indices = @transform_8, window_bounds = array<i64: 1, 1, 128>}, {transform_indices = @transform_9, window_bounds = array<i64: 1, 1, 128>}]} {
    %c0 = arith.constant 0 : index
    %c0_0 = arith.constant 0 : index
    %0 = vector.load %arg1[%c0, %c0_0] : memref<256x36xbf16, #tpu.memory_space<vmem>>, vector<256x36xbf16>
    %c0_1 = arith.constant 0 : index
    %c0_2 = arith.constant 0 : index
    %1 = vector.load %arg2[%c0_1, %c0_2] : memref<36x128xbf16, #tpu.memory_space<vmem>>, vector<36x128xbf16>
    %cst = arith.constant dense<0.000000e+00> : vector<256x128xf32>
    %2 = tpu.matmul %0, %1, %cst {dimension_numbers = #tpu.dot_dimension_numbers<[1], [0], [0], [1], [0, 0, 1, 1], [], []>} : vector<256x36xbf16>, vector<36x128xbf16>, vector<256x128xf32> -> vector<256x128xf32>
    %c0_3 = arith.constant 0 : index
    %c0_4 = arith.constant 0 : index
    %3 = vector.load %arg3[%c0_3, %c0_4] : memref<256x4xbf16, #tpu.memory_space<vmem>>, vector<256x4xbf16>
    %c0_5 = arith.constant 0 : index
    %c0_6 = arith.constant 0 : index
    %4 = vector.load %arg4[%c0_5, %c0_6] : memref<4x128xbf16, #tpu.memory_space<vmem>>, vector<4x128xbf16>
    %cst_7 = arith.constant dense<0.000000e+00> : vector<256x128xf32>
    %5 = tpu.matmul %3, %4, %cst_7 {dimension_numbers = #tpu.dot_dimension_numbers<[1], [0], [0], [1], [0, 0, 1, 1], [], []>} : vector<256x4xbf16>, vector<4x128xbf16>, vector<256x128xf32> -> vector<256x128xf32>
    %6 = arith.truncf %2 : vector<256x128xf32> to vector<256x128xbf16>
    %c0_8 = arith.constant 0 : index
    %c0_9 = arith.constant 0 : index
    %7 = vector.load %arg5[%c0_8, %c0_9] : memref<256x128xbf16, #tpu.memory_space<vmem>>, vector<256x128xbf16>
    tpu.vector_store %arg5[%c0_8, %c0_9], %6 {strides = array<i32>} : memref<256x128xbf16, #tpu.memory_space<vmem>>, vector<256x128xbf16>,
    %8 = arith.truncf %5 : vector<256x128xf32> to vector<256x128xbf16>
    %c0_10 = arith.constant 0 : index
    %c0_11 = arith.constant 0 : index
    %9 = vector.load %arg6[%c0_10, %c0_11] : memref<256x128xbf16, #tpu.memory_space<vmem>>, vector<256x128xbf16>
    tpu.vector_store %arg6[%c0_10, %c0_11], %8 {strides = array<i32>} : memref<256x128xbf16, #tpu.memory_space<vmem>>, vector<256x128xbf16>,
    %cst_12 = arith.constant dense<0.000000e+00> : vector<128xf32>
    %10 = vector.multi_reduction <add>, %2, %cst_12 [0] : vector<256x128xf32> to vector<128xf32>
    %11 = vector.shape_cast %10 : vector<128xf32> to vector<1x128xf32>
    %12 = arith.mulf %2, %2 : vector<256x128xf32>
    %cst_13 = arith.constant dense<0.000000e+00> : vector<128xf32>
    %13 = vector.multi_reduction <add>, %12, %cst_13 [0] : vector<256x128xf32> to vector<128xf32>
    %14 = vector.shape_cast %13 : vector<128xf32> to vector<1x128xf32>
    %15 = vector.shape_cast %11 : vector<1x128xf32> to vector<1x1x128xf32>
    %c0_14 = arith.constant 0 : index
    %c0_15 = arith.constant 0 : index
    %c0_16 = arith.constant 0 : index
    %16 = vector.load %arg7[%c0_14, %c0_15, %c0_16] : memref<1x1x128xf32, #tpu.memory_space<vmem>>, vector<1x1x128xf32>
    tpu.vector_store %arg7[%c0_14, %c0_15, %c0_16], %15 {strides = array<i32>} : memref<1x1x128xf32, #tpu.memory_space<vmem>>, vector<1x1x128xf32>,
    %17 = vector.shape_cast %14 : vector<1x128xf32> to vector<1x1x128xf32>
    %c0_17 = arith.constant 0 : index
    %c0_18 = arith.constant 0 : index
    %c0_19 = arith.constant 0 : index
    %18 = vector.load %arg8[%c0_17, %c0_18, %c0_19] : memref<1x1x128xf32, #tpu.memory_space<vmem>>, vector<1x1x128xf32>
    tpu.vector_store %arg8[%c0_17, %c0_18, %c0_19], %17 {strides = array<i32>} : memref<1x1x128xf32, #tpu.memory_space<vmem>>, vector<1x1x128xf32>,
    %cst_20 = arith.constant dense<0.000000e+00> : vector<128xf32>
    %19 = vector.multi_reduction <add>, %5, %cst_20 [0] : vector<256x128xf32> to vector<128xf32>
    %20 = vector.shape_cast %19 : vector<128xf32> to vector<1x128xf32>
    %21 = arith.mulf %5, %5 : vector<256x128xf32>
    %cst_21 = arith.constant dense<0.000000e+00> : vector<128xf32>
    %22 = vector.multi_reduction <add>, %21, %cst_21 [0] : vector<256x128xf32> to vector<128xf32>
    %23 = vector.shape_cast %22 : vector<128xf32> to vector<1x128xf32>
    %24 = vector.shape_cast %20 : vector<1x128xf32> to vector<1x1x128xf32>
    %c0_22 = arith.constant 0 : index
    %c0_23 = arith.constant 0 : index
    %c0_24 = arith.constant 0 : index
    %25 = vector.load %arg9[%c0_22, %c0_23, %c0_24] : memref<1x1x128xf32, #tpu.memory_space<vmem>>, vector<1x1x128xf32>
    tpu.vector_store %arg9[%c0_22, %c0_23, %c0_24], %24 {strides = array<i32>} : memref<1x1x128xf32, #tpu.memory_space<vmem>>, vector<1x1x128xf32>,
    %26 = vector.shape_cast %23 : vector<1x128xf32> to vector<1x1x128xf32>
    %c0_25 = arith.constant 0 : index
    %c0_26 = arith.constant 0 : index
    %c0_27 = arith.constant 0 : index
    %27 = vector.load %arg10[%c0_25, %c0_26, %c0_27] : memref<1x1x128xf32, #tpu.memory_space<vmem>>, vector<1x1x128xf32>
    tpu.vector_store %arg10[%c0_25, %c0_26, %c0_27], %26 {strides = array<i32>} : memref<1x1x128xf32, #tpu.memory_space<vmem>>, vector<1x1x128xf32>,
    return
  }
  func.func @transform_0(%arg0: i32) -> (i32, i32) {
    %c0_i32 = arith.constant 0 : i32
    %c0_i32_0 = arith.constant 0 : i32
    return %arg0, %c0_i32 : i32, i32
  }
  func.func @transform_1(%arg0: i32) -> (i32, i32) {
    %c0_i32 = arith.constant 0 : i32
    %c0_i32_0 = arith.constant 0 : i32
    %c0_i32_1 = arith.constant 0 : i32
    return %c0_i32, %c0_i32_0 : i32, i32
  }
  func.func @transform_2(%arg0: i32) -> (i32, i32) {
    %c0_i32 = arith.constant 0 : i32
    %c0_i32_0 = arith.constant 0 : i32
    return %arg0, %c0_i32 : i32, i32
  }
  func.func @transform_3(%arg0: i32) -> (i32, i32) {
    %c0_i32 = arith.constant 0 : i32
    %c0_i32_0 = arith.constant 0 : i32
    %c0_i32_1 = arith.constant 0 : i32
    return %c0_i32, %c0_i32_0 : i32, i32
  }
  func.func @transform_4(%arg0: i32) -> (i32, i32) {
    %c0_i32 = arith.constant 0 : i32
    %c0_i32_0 = arith.constant 0 : i32
    return %arg0, %c0_i32 : i32, i32
  }
  func.func @transform_5(%arg0: i32) -> (i32, i32) {
    %c0_i32 = arith.constant 0 : i32
    %c0_i32_0 = arith.constant 0 : i32
    return %arg0, %c0_i32 : i32, i32
  }
  func.func @transform_6(%arg0: i32) -> (i32, i32, i32) {
    %c0_i32 = arith.constant 0 : i32
    %c0_i32_0 = arith.constant 0 : i32
    %c0_i32_1 = arith.constant 0 : i32
    return %arg0, %c0_i32, %c0_i32_0 : i32, i32, i32
  }
  func.func @transform_7(%arg0: i32) -> (i32, i32, i32) {
    %c0_i32 = arith.constant 0 : i32
    %c0_i32_0 = arith.constant 0 : i32
    %c0_i32_1 = arith.constant 0 : i32
    return %arg0, %c0_i32, %c0_i32_0 : i32, i32, i32
  }
  func.func @transform_8(%arg0: i32) -> (i32, i32, i32) {
    %c0_i32 = arith.constant 0 : i32
    %c0_i32_0 = arith.constant 0 : i32
    %c0_i32_1 = arith.constant 0 : i32
    return %arg0, %c0_i32, %c0_i32_0 : i32, i32, i32
  }
  func.func @transform_9(%arg0: i32) -> (i32, i32, i32) {
    %c0_i32 = arith.constant 0 : i32
    %c0_i32_0 = arith.constant 0 : i32
    %c0_i32_1 = arith.constant 0 : i32
    return %arg0, %c0_i32, %c0_i32_0 : i32, i32, i32
  }
}

module attributes {stable_mosaic.version = 11 : i64} {
  func.func @_bnA_act_kernel(%arg0: i32, %arg1: memref<256x128xbf16, #tpu.memory_space<vmem>>, %arg2: memref<256x128xbf16, #tpu.memory_space<vmem>>, %arg3: memref<1x128xf32, #tpu.memory_space<vmem>>, %arg4: memref<1x128xf32, #tpu.memory_space<vmem>>, %arg5: memref<1x128xf32, #tpu.memory_space<vmem>>, %arg6: memref<1x128xf32, #tpu.memory_space<vmem>>, %arg7: memref<256x128xbf16, #tpu.memory_space<vmem>>, %arg8: memref<256x128xbf16, #tpu.memory_space<vmem>>) attributes {dimension_semantics = [#tpu.dimension_semantics<parallel>], iteration_bounds = array<i64: 2>, scalar_prefetch = 0 : i64, scratch_operands = 0 : i64, tpu.core_type = #tpu.core_type<tc>, window_params = [{transform_indices = @transform_0, window_bounds = array<i64: 256, 128>}, {transform_indices = @transform_1, window_bounds = array<i64: 256, 128>}, {pipeline_mode = #tpu.pipeline_mode<synchronous>, transform_indices = @transform_2, window_bounds = array<i64: 1, 128>}, {pipeline_mode = #tpu.pipeline_mode<synchronous>, transform_indices = @transform_3, window_bounds = array<i64: 1, 128>}, {pipeline_mode = #tpu.pipeline_mode<synchronous>, transform_indices = @transform_4, window_bounds = array<i64: 1, 128>}, {pipeline_mode = #tpu.pipeline_mode<synchronous>, transform_indices = @transform_5, window_bounds = array<i64: 1, 128>}, {transform_indices = @transform_6, window_bounds = array<i64: 256, 128>}, {transform_indices = @transform_7, window_bounds = array<i64: 256, 128>}]} {
    %c0 = arith.constant 0 : index
    %c0_0 = arith.constant 0 : index
    %0 = vector.load %arg1[%c0, %c0_0] : memref<256x128xbf16, #tpu.memory_space<vmem>>, vector<256x128xbf16>
    %1 = arith.extf %0 : vector<256x128xbf16> to vector<256x128xf32>
    %c0_1 = arith.constant 0 : index
    %c0_2 = arith.constant 0 : index
    %2 = vector.load %arg3[%c0_1, %c0_2] : memref<1x128xf32, #tpu.memory_space<vmem>>, vector<1x128xf32>
    %3 = vector.broadcast %2 : vector<1x128xf32> to vector<256x128xf32>
    %4 = arith.mulf %1, %3 : vector<256x128xf32>
    %c0_3 = arith.constant 0 : index
    %c0_4 = arith.constant 0 : index
    %5 = vector.load %arg4[%c0_3, %c0_4] : memref<1x128xf32, #tpu.memory_space<vmem>>, vector<1x128xf32>
    %6 = vector.broadcast %5 : vector<1x128xf32> to vector<256x128xf32>
    %7 = arith.addf %4, %6 : vector<256x128xf32>
    %cst = arith.constant 0.000000e+00 : f32
    %8 = vector.broadcast %cst : f32 to vector<256x128xf32>
    %9 = arith.cmpf ogt, %7, %8 : vector<256x128xf32>
    %cst_5 = arith.constant 1.000000e-01 : f32
    %10 = vector.broadcast %cst_5 : f32 to vector<256x128xf32>
    %11 = arith.mulf %10, %7 : vector<256x128xf32>
    %12 = arith.select %9, %7, %11 : vector<256x128xi1>, vector<256x128xf32>
    %13 = arith.truncf %12 : vector<256x128xf32> to vector<256x128xbf16>
    %c0_6 = arith.constant 0 : index
    %c0_7 = arith.constant 0 : index
    %14 = vector.load %arg7[%c0_6, %c0_7] : memref<256x128xbf16, #tpu.memory_space<vmem>>, vector<256x128xbf16>
    tpu.vector_store %arg7[%c0_6, %c0_7], %13 {strides = array<i32>} : memref<256x128xbf16, #tpu.memory_space<vmem>>, vector<256x128xbf16>,
    %c0_8 = arith.constant 0 : index
    %c0_9 = arith.constant 0 : index
    %15 = vector.load %arg2[%c0_8, %c0_9] : memref<256x128xbf16, #tpu.memory_space<vmem>>, vector<256x128xbf16>
    %16 = arith.extf %15 : vector<256x128xbf16> to vector<256x128xf32>
    %c0_10 = arith.constant 0 : index
    %c0_11 = arith.constant 0 : index
    %17 = vector.load %arg5[%c0_10, %c0_11] : memref<1x128xf32, #tpu.memory_space<vmem>>, vector<1x128xf32>
    %18 = vector.broadcast %17 : vector<1x128xf32> to vector<256x128xf32>
    %19 = arith.mulf %16, %18 : vector<256x128xf32>
    %c0_12 = arith.constant 0 : index
    %c0_13 = arith.constant 0 : index
    %20 = vector.load %arg6[%c0_12, %c0_13] : memref<1x128xf32, #tpu.memory_space<vmem>>, vector<1x128xf32>
    %21 = vector.broadcast %20 : vector<1x128xf32> to vector<256x128xf32>
    %22 = arith.addf %19, %21 : vector<256x128xf32>
    %cst_14 = arith.constant 0.000000e+00 : f32
    %23 = vector.broadcast %cst_14 : f32 to vector<256x128xf32>
    %24 = arith.cmpf ogt, %22, %23 : vector<256x128xf32>
    %cst_15 = arith.constant 1.000000e-01 : f32
    %25 = vector.broadcast %cst_15 : f32 to vector<256x128xf32>
    %26 = arith.mulf %25, %22 : vector<256x128xf32>
    %27 = arith.select %24, %22, %26 : vector<256x128xi1>, vector<256x128xf32>
    %28 = arith.truncf %27 : vector<256x128xf32> to vector<256x128xbf16>
    %c0_16 = arith.constant 0 : index
    %c0_17 = arith.constant 0 : index
    %29 = vector.load %arg8[%c0_16, %c0_17] : memref<256x128xbf16, #tpu.memory_space<vmem>>, vector<256x128xbf16>
    tpu.vector_store %arg8[%c0_16, %c0_17], %28 {strides = array<i32>} : memref<256x128xbf16, #tpu.memory_space<vmem>>, vector<256x128xbf16>,
    return
  }
  func.func @transform_0(%arg0: i32) -> (i32, i32) {
    %c0_i32 = arith.constant 0 : i32
    %c0_i32_0 = arith.constant 0 : i32
    return %arg0, %c0_i32 : i32, i32
  }
  func.func @transform_1(%arg0: i32) -> (i32, i32) {
    %c0_i32 = arith.constant 0 : i32
    %c0_i32_0 = arith.constant 0 : i32
    return %arg0, %c0_i32 : i32, i32
  }
  func.func @transform_2(%arg0: i32) -> (i32, i32) {
    %c0_i32 = arith.constant 0 : i32
    %c0_i32_0 = arith.constant 0 : i32
    %c0_i32_1 = arith.constant 0 : i32
    return %c0_i32, %c0_i32_0 : i32, i32
  }
  func.func @transform_3(%arg0: i32) -> (i32, i32) {
    %c0_i32 = arith.constant 0 : i32
    %c0_i32_0 = arith.constant 0 : i32
    %c0_i32_1 = arith.constant 0 : i32
    return %c0_i32, %c0_i32_0 : i32, i32
  }
  func.func @transform_4(%arg0: i32) -> (i32, i32) {
    %c0_i32 = arith.constant 0 : i32
    %c0_i32_0 = arith.constant 0 : i32
    %c0_i32_1 = arith.constant 0 : i32
    return %c0_i32, %c0_i32_0 : i32, i32
  }
  func.func @transform_5(%arg0: i32) -> (i32, i32) {
    %c0_i32 = arith.constant 0 : i32
    %c0_i32_0 = arith.constant 0 : i32
    %c0_i32_1 = arith.constant 0 : i32
    return %c0_i32, %c0_i32_0 : i32, i32
  }
  func.func @transform_6(%arg0: i32) -> (i32, i32) {
    %c0_i32 = arith.constant 0 : i32
    %c0_i32_0 = arith.constant 0 : i32
    return %arg0, %c0_i32 : i32, i32
  }
  func.func @transform_7(%arg0: i32) -> (i32, i32) {
    %c0_i32 = arith.constant 0 : i32
    %c0_i32_0 = arith.constant 0 : i32
    return %arg0, %c0_i32 : i32, i32
  }
}

module attributes {stable_mosaic.version = 11 : i64} {
  func.func @_conv_stats_kernel(%arg0: i32, %arg1: memref<256x1152xbf16, #tpu.memory_space<vmem>>, %arg2: memref<1152x128xbf16, #tpu.memory_space<vmem>>, %arg3: memref<256x128xbf16, #tpu.memory_space<vmem>>, %arg4: memref<1x1x128xf32, #tpu.memory_space<vmem>>, %arg5: memref<1x1x128xf32, #tpu.memory_space<vmem>>) attributes {dimension_semantics = [#tpu.dimension_semantics<parallel>], iteration_bounds = array<i64: 2>, scalar_prefetch = 0 : i64, scratch_operands = 0 : i64, tpu.core_type = #tpu.core_type<tc>, window_params = [{transform_indices = @transform_0, window_bounds = array<i64: 256, 1152>}, {pipeline_mode = #tpu.pipeline_mode<synchronous>, transform_indices = @transform_1, window_bounds = array<i64: 1152, 128>}, {transform_indices = @transform_2, window_bounds = array<i64: 256, 128>}, {transform_indices = @transform_3, window_bounds = array<i64: 1, 1, 128>}, {transform_indices = @transform_4, window_bounds = array<i64: 1, 1, 128>}]} {
    %c0 = arith.constant 0 : index
    %c0_0 = arith.constant 0 : index
    %0 = vector.load %arg1[%c0, %c0_0] : memref<256x1152xbf16, #tpu.memory_space<vmem>>, vector<256x1152xbf16>
    %c0_1 = arith.constant 0 : index
    %c0_2 = arith.constant 0 : index
    %1 = vector.load %arg2[%c0_1, %c0_2] : memref<1152x128xbf16, #tpu.memory_space<vmem>>, vector<1152x128xbf16>
    %cst = arith.constant dense<0.000000e+00> : vector<256x128xf32>
    %2 = tpu.matmul %0, %1, %cst {dimension_numbers = #tpu.dot_dimension_numbers<[1], [0], [0], [1], [0, 0, 1, 1], [], []>} : vector<256x1152xbf16>, vector<1152x128xbf16>, vector<256x128xf32> -> vector<256x128xf32>
    %3 = arith.truncf %2 : vector<256x128xf32> to vector<256x128xbf16>
    %c0_3 = arith.constant 0 : index
    %c0_4 = arith.constant 0 : index
    %4 = vector.load %arg3[%c0_3, %c0_4] : memref<256x128xbf16, #tpu.memory_space<vmem>>, vector<256x128xbf16>
    tpu.vector_store %arg3[%c0_3, %c0_4], %3 {strides = array<i32>} : memref<256x128xbf16, #tpu.memory_space<vmem>>, vector<256x128xbf16>,
    %cst_5 = arith.constant dense<0.000000e+00> : vector<128xf32>
    %5 = vector.multi_reduction <add>, %2, %cst_5 [0] : vector<256x128xf32> to vector<128xf32>
    %6 = vector.shape_cast %5 : vector<128xf32> to vector<1x128xf32>
    %7 = arith.mulf %2, %2 : vector<256x128xf32>
    %cst_6 = arith.constant dense<0.000000e+00> : vector<128xf32>
    %8 = vector.multi_reduction <add>, %7, %cst_6 [0] : vector<256x128xf32> to vector<128xf32>
    %9 = vector.shape_cast %8 : vector<128xf32> to vector<1x128xf32>
    %10 = vector.shape_cast %6 : vector<1x128xf32> to vector<1x1x128xf32>
    %c0_7 = arith.constant 0 : index
    %c0_8 = arith.constant 0 : index
    %c0_9 = arith.constant 0 : index
    %11 = vector.load %arg4[%c0_7, %c0_8, %c0_9] : memref<1x1x128xf32, #tpu.memory_space<vmem>>, vector<1x1x128xf32>
    tpu.vector_store %arg4[%c0_7, %c0_8, %c0_9], %10 {strides = array<i32>} : memref<1x1x128xf32, #tpu.memory_space<vmem>>, vector<1x1x128xf32>,
    %12 = vector.shape_cast %9 : vector<1x128xf32> to vector<1x1x128xf32>
    %c0_10 = arith.constant 0 : index
    %c0_11 = arith.constant 0 : index
    %c0_12 = arith.constant 0 : index
    %13 = vector.load %arg5[%c0_10, %c0_11, %c0_12] : memref<1x1x128xf32, #tpu.memory_space<vmem>>, vector<1x1x128xf32>
    tpu.vector_store %arg5[%c0_10, %c0_11, %c0_12], %12 {strides = array<i32>} : memref<1x1x128xf32, #tpu.memory_space<vmem>>, vector<1x1x128xf32>,
    return
  }
  func.func @transform_0(%arg0: i32) -> (i32, i32) {
    %c0_i32 = arith.constant 0 : i32
    %c0_i32_0 = arith.constant 0 : i32
    return %arg0, %c0_i32 : i32, i32
  }
  func.func @transform_1(%arg0: i32) -> (i32, i32) {
    %c0_i32 = arith.constant 0 : i32
    %c0_i32_0 = arith.constant 0 : i32
    %c0_i32_1 = arith.constant 0 : i32
    return %c0_i32, %c0_i32_0 : i32, i32
  }
  func.func @transform_2(%arg0: i32) -> (i32, i32) {
    %c0_i32 = arith.constant 0 : i32
    %c0_i32_0 = arith.constant 0 : i32
    return %arg0, %c0_i32 : i32, i32
  }
  func.func @transform_3(%arg0: i32) -> (i32, i32, i32) {
    %c0_i32 = arith.constant 0 : i32
    %c0_i32_0 = arith.constant 0 : i32
    %c0_i32_1 = arith.constant 0 : i32
    return %arg0, %c0_i32, %c0_i32_0 : i32, i32, i32
  }
  func.func @transform_4(%arg0: i32) -> (i32, i32, i32) {
    %c0_i32 = arith.constant 0 : i32
    %c0_i32_0 = arith.constant 0 : i32
    %c0_i32_1 = arith.constant 0 : i32
    return %arg0, %c0_i32, %c0_i32_0 : i32, i32, i32
  }
}

module attributes {stable_mosaic.version = 11 : i64} {
  func.func @_bnB_act_res_kernel(%arg0: i32, %arg1: memref<256x128xbf16, #tpu.memory_space<vmem>>, %arg2: memref<1x128xf32, #tpu.memory_space<vmem>>, %arg3: memref<1x128xf32, #tpu.memory_space<vmem>>, %arg4: memref<256x128xbf16, #tpu.memory_space<vmem>>, %arg5: memref<256x128xf32, #tpu.memory_space<vmem>>) attributes {dimension_semantics = [#tpu.dimension_semantics<parallel>], iteration_bounds = array<i64: 2>, scalar_prefetch = 0 : i64, scratch_operands = 0 : i64, tpu.core_type = #tpu.core_type<tc>, window_params = [{transform_indices = @transform_0, window_bounds = array<i64: 256, 128>}, {pipeline_mode = #tpu.pipeline_mode<synchronous>, transform_indices = @transform_1, window_bounds = array<i64: 1, 128>}, {pipeline_mode = #tpu.pipeline_mode<synchronous>, transform_indices = @transform_2, window_bounds = array<i64: 1, 128>}, {transform_indices = @transform_3, window_bounds = array<i64: 256, 128>}, {transform_indices = @transform_4, window_bounds = array<i64: 256, 128>}]} {
    %c0 = arith.constant 0 : index
    %c0_0 = arith.constant 0 : index
    %0 = vector.load %arg1[%c0, %c0_0] : memref<256x128xbf16, #tpu.memory_space<vmem>>, vector<256x128xbf16>
    %1 = arith.extf %0 : vector<256x128xbf16> to vector<256x128xf32>
    %c0_1 = arith.constant 0 : index
    %c0_2 = arith.constant 0 : index
    %2 = vector.load %arg2[%c0_1, %c0_2] : memref<1x128xf32, #tpu.memory_space<vmem>>, vector<1x128xf32>
    %3 = vector.broadcast %2 : vector<1x128xf32> to vector<256x128xf32>
    %4 = arith.mulf %1, %3 : vector<256x128xf32>
    %c0_3 = arith.constant 0 : index
    %c0_4 = arith.constant 0 : index
    %5 = vector.load %arg3[%c0_3, %c0_4] : memref<1x128xf32, #tpu.memory_space<vmem>>, vector<1x128xf32>
    %6 = vector.broadcast %5 : vector<1x128xf32> to vector<256x128xf32>
    %7 = arith.addf %4, %6 : vector<256x128xf32>
    %cst = arith.constant 0.000000e+00 : f32
    %8 = vector.broadcast %cst : f32 to vector<256x128xf32>
    %9 = arith.cmpf ogt, %7, %8 : vector<256x128xf32>
    %cst_5 = arith.constant 1.000000e-01 : f32
    %10 = vector.broadcast %cst_5 : f32 to vector<256x128xf32>
    %11 = arith.mulf %10, %7 : vector<256x128xf32>
    %12 = arith.select %9, %7, %11 : vector<256x128xi1>, vector<256x128xf32>
    %c0_6 = arith.constant 0 : index
    %c0_7 = arith.constant 0 : index
    %13 = vector.load %arg4[%c0_6, %c0_7] : memref<256x128xbf16, #tpu.memory_space<vmem>>, vector<256x128xbf16>
    %14 = arith.extf %13 : vector<256x128xbf16> to vector<256x128xf32>
    %15 = arith.addf %12, %14 : vector<256x128xf32>
    %c0_8 = arith.constant 0 : index
    %c0_9 = arith.constant 0 : index
    %16 = vector.load %arg5[%c0_8, %c0_9] : memref<256x128xf32, #tpu.memory_space<vmem>>, vector<256x128xf32>
    tpu.vector_store %arg5[%c0_8, %c0_9], %15 {strides = array<i32>} : memref<256x128xf32, #tpu.memory_space<vmem>>, vector<256x128xf32>,
    return
  }
  func.func @transform_0(%arg0: i32) -> (i32, i32) {
    %c0_i32 = arith.constant 0 : i32
    %c0_i32_0 = arith.constant 0 : i32
    return %arg0, %c0_i32 : i32, i32
  }
  func.func @transform_1(%arg0: i32) -> (i32, i32) {
    %c0_i32 = arith.constant 0 : i32
    %c0_i32_0 = arith.constant 0 : i32
    %c0_i32_1 = arith.constant 0 : i32
    return %c0_i32, %c0_i32_0 : i32, i32
  }
  func.func @transform_2(%arg0: i32) -> (i32, i32) {
    %c0_i32 = arith.constant 0 : i32
    %c0_i32_0 = arith.constant 0 : i32
    %c0_i32_1 = arith.constant 0 : i32
    return %c0_i32, %c0_i32_0 : i32, i32
  }
  func.func @transform_3(%arg0: i32) -> (i32, i32) {
    %c0_i32 = arith.constant 0 : i32
    %c0_i32_0 = arith.constant 0 : i32
    return %arg0, %c0_i32 : i32, i32
  }
  func.func @transform_4(%arg0: i32) -> (i32, i32) {
    %c0_i32 = arith.constant 0 : i32
    %c0_i32_0 = arith.constant 0 : i32
    return %arg0, %c0_i32 : i32, i32
  }
}

</mosaic_0001>

<bundles_post_ra>
// kernel: a_call__.4
= control target key start
LH: loop header
LB: loop body
LE: loop exit
PB: predicated region body
PF: predicated region fallthrough
CT: control target
= control target key end

     0   :  { %s1956_s30 = smov 0   ;;  %s2364_s0 = inlined_call_operand.vmem [shape: bf16[512,36], index: 0, kind: input, shape index: {}]   ;;  %s2365_s1 = inlined_call_operand.vmem [shape: bf16[36,128], index: 1, kind: input, shape index: {}]   ;;  %s2366_s2 = inlined_call_operand.vmem [shape: bf16[512,4], index: 2, kind: input, shape index: {}]   ;;  %s2367_s3 = inlined_call_operand.vmem [shape: bf16[4,128], index: 3, kind: input, shape index: {}]   ;;  %s2368_s4 = inlined_call_operand.vmem [shape: bf16[512,128], index: 4, kind: output, shape index: {0}]   ;;  %s2369_s5 = inlined_call_operand.vmem [shape: bf16[512,128], index: 5, kind: output, shape index: {1}]   ;;  %s2370_s6 = inlined_call_operand.vmem [shape: f32[2,1,128], index: 6, kind: output, shape index: {2}]   ;;  %s2371_s7 = inlined_call_operand.vmem [shape: f32[2,1,128], index: 7, kind: output, shape index: {3}]   ;;  %s2372_s8 = inlined_call_operand.vmem [shape: f32[2,1,128], index: 8, kind: output, shape index: {4}]   ;;  %s2373_s9 = inlined_call_operand.vmem [shape: f32[2,1,128], index: 9, kind: output, shape index: {5}]  }
   0x1 LB: > { %s1962_s10 = sadd.s32 4294967295, %s1904_s30   ;;  %p1483_p0 = scmp.ge.s32.totalorder %s1904_s30, 1  ;;  %s1904_s30 = sphi %s1956_s30, %s20_s30  }
   0x2   : > { %p310_p1 = scmp.lt.s32.totalorder %s1904_s30, 3 }
   0x4   : > { %p311_p2 = pnand %p1483_p0, %p310_p1 }
   0x5   : > { %s1484_s15 = sshll.u32 (!%p311_p2), %s1962_s10, 5  ;;  %p392_p4 = scmp.lt.s32.totalorder (!%p311_p2), %s1962_s10, 1 }
   0x6   : > { %314 = sbr.rel (%p311_p2) target bundleno = 325 (0x145), region = 36  ;;  %p369_p3 = scmp.lt.s32.totalorder (!%p311_p2), %s1484_s15, 63 }
   0xb   : > { %v441_v0 = vld [vmem:[%s2365_s1 + $0x10] sm:$0x3]  ;;  %vm586_vm0 = vcmask 1041408   ;;  %v711_v1 = vld [vmem:[%s2367_s3] sm:$0x3]  ;;  %s2375_s15 = smov (!%p369_p3, %s1484_s15), 63 }
   0xc   : > { %v531_v2 = vunpack.c.l.b16 %v441_v0  ;;  %v842_v3 = vsel %vm586_vm0, %v711_v1, 0  ;;  %v1679_v6 = vld [vmem:[%s2365_s1 + $0x8] sm:$0xff]  ;;  %s1976_s18 = sshll.u32 %s2375_s15, 2  ;;  %vm792_vm1 = vcmask 31744   ;;  %v1678_v8 = vld [vmem:[%s2365_s1] sm:$0xff]  ;;  %vm537_vm2 = vcmask 293888  }
   0xd   : > { %851 = vmatpush.bf16.msra.mxu1 %v842_v3  ;;  %1889 = vmatpush.bf16.msra.mxu3 %v842_v3  ;;  %s1982_s21 = scalar_lea.vmem %s2366_s2, %s1976_s18  ;;  %s1993_s26 = scalar_lea.vmem %s2364_s0, %s1976_s18 }
   0xe   : > { %v534_v4 = vpack.c.b16 %v531_v2, %v531_v2  ;;  %v1680_v7 = vld [vmem:[%s1982_s21] sm:$0xff]  ;;  %v1689_v11 = vld [vmem:[%s1982_s21 + $0x48] sm:$0xff]  ;;  %v1690_v15 = vld [vmem:[%s1982_s21 + $0x50] sm:$0xff]  ;;  %s2061_s29 = scalar_lea.vmem %s2369_s5, %s1976_s18  ;;  %s2070_s13 = scalar_lea.vmem %s2368_s4, %s1976_s18 }
   0xf   : > { %v1662_v9 = vld [vmem:[%s1993_s26] sm:$0xff]  ;;  %v1681_v12 = vld [vmem:[%s1982_s21 + $0x8] sm:$0xff]  ;;  %v1682_v16 = vld [vmem:[%s1982_s21 + $0x10] sm:$0xff]  ;;  %s2377_s10 = smov (!%p392_p4, %s1962_s10), 1 }
  0x10   : > { %v588_v5 = vsel %vm586_vm0, %v534_v4, 0  ;;  %1644 = vmatmul.msk.bf16.vlgmr.msra.gmra.mxu1 %vm792_vm1, %v1680_v7  ;;  %v1670_v10 = vld [vmem:[%s1993_s26 + $0x40] sm:$0xff]  ;;  %1653 = vmatmul.msk.bf16.vlgmr.msra.gmra.mxu3 %vm792_vm1, %v1689_v11  ;;  %v1663_v13 = vld [vmem:[%s1993_s26 + $0x8] sm:$0xff]  ;;  %v1664_v17 = vld [vmem:[%s1993_s26 + $0x10] sm:$0xff]  ;;  %s394_s16 = scalar_lea.vmem %s2370_s6, %s2377_s10  ;;  %s397_s19 = scalar_lea.vmem %s2371_s7, %s2377_s10 }
  0x11   : > { %595 = vmatpush.bf16.msra.mxu0 %v588_v5  ;;  %1886 = vmatpush.bf16.msra.mxu2 %v588_v5  ;;  %v1671_v14 = vld [vmem:[%s1993_s26 + $0x48] sm:$0xff]  ;;  %v1672_v18 = vld [vmem:[%s1993_s26 + $0x50] sm:$0xff]  ;;  %v1691_v19 = vld [vmem:[%s1982_s21 + $0x58] sm:$0xff]  ;;  %s400_s22 = scalar_lea.vmem %s2372_s8, %s2377_s10  ;;  %s403_s25 = scalar_lea.vmem %s2373_s9, %s2377_s10 }
  0x12   : > { %v1683_v20 = vld [vmem:[%s1982_s21 + $0x18] sm:$0xff]  ;;  %v1692_v23 = vld [vmem:[%s1982_s21 + $0x60] sm:$0xff]  ;;  %v1693_v27 = vld [vmem:[%s1982_s21 + $0x68] sm:$0xff] }
  0x13   : > { %v1665_v21 = vld [vmem:[%s1993_s26 + $0x18] sm:$0xff]  ;;  %v1684_v24 = vld [vmem:[%s1982_s21 + $0x20] sm:$0xff]  ;;  %v1685_v28 = vld [vmem:[%s1982_s21 + $0x28] sm:$0xff] }
  0x14   : > { %v1673_v22 = vld [vmem:[%s1993_s26 + $0x58] sm:$0xff]  ;;  %v1666_v25 = vld [vmem:[%s1993_s26 + $0x20] sm:$0xff]  ;;  %v1667_v29 = vld [vmem:[%s1993_s26 + $0x28] sm:$0xff] }
  0x15   : > { %596 = vmatpush.bf16.msra.mxu0 %v1679_v6  ;;  %1887 = vmatpush.bf16.msra.mxu2 %v1679_v6  ;;  %v1674_v26 = vld [vmem:[%s1993_s26 + $0x60] sm:$0xff]  ;;  %v1675_v30 = vld [vmem:[%s1993_s26 + $0x68] sm:$0xff]  ;;  %v1686_v31 = vld [vmem:[%s1982_s21 + $0x30] sm:$0xff] }
  0x16   : > { %v1694_v32 = vld [vmem:[%s1982_s21 + $0x70] sm:$0xff]  ;;  %v1687_v35 = vld [vmem:[%s1982_s21 + $0x38] sm:$0xff]  ;;  %v1688_v39 = vld [vmem:[%s1982_s21 + $0x40] sm:$0xff] }
  0x17   : > { %v1668_v33 = vld [vmem:[%s1993_s26 + $0x30] sm:$0xff]  ;;  %v1695_v36 = vld [vmem:[%s1982_s21 + $0x78] sm:$0xff] }
  0x18   : > { %v1676_v34 = vld [vmem:[%s1993_s26 + $0x70] sm:$0xff]  ;;  %v1669_v37 = vld [vmem:[%s1993_s26 + $0x38] sm:$0xff] }
  0x19   : > { %597 = vmatpush.bf16.msra.mxu0 %v1678_v8  ;;  %1888 = vmatpush.bf16.msra.mxu2 %v1678_v8  ;;  %v1677_v38 = vld [vmem:[%s1993_s26 + $0x78] sm:$0xff] }
  0x1c   : > { %1564 = vmatmul.msk.bf16.vlgmr.msra.gmra.mxu0 %vm537_vm2, %v1662_v9  ;;  %1572 = vmatmul.msk.bf16.vlgmr.msra.gmra.mxu2 %vm537_vm2, %v1670_v10 }
  0x20   : > { %1645 = vmatmul.msk.bf16.gmra.mxu1 %vm792_vm1, %v1681_v12  ;;  %1654 = vmatmul.msk.bf16.gmra.mxu3 %vm792_vm1, %v1690_v15 }
  0x2c   : > { %1565 = vmatmul.msk.bf16.gmra.mxu0 %vm537_vm2, %v1663_v13  ;;  %1573 = vmatmul.msk.bf16.gmra.mxu2 %vm537_vm2, %v1671_v14 }
  0x30   : > { %1646 = vmatmul.msk.bf16.gmra.mxu1 %vm792_vm1, %v1682_v16  ;;  %1655 = vmatmul.msk.bf16.gmra.mxu3 %vm792_vm1, %v1691_v19 }
  0x3c   : > { %1566 = vmatmul.msk.bf16.gmra.mxu0 %vm537_vm2, %v1664_v17  ;;  %1574 = vmatmul.msk.bf16.gmra.mxu2 %vm537_vm2, %v1672_v18 }
  0x40   : > { %1647 = vmatmul.msk.bf16.gmra.mxu1 %vm792_vm1, %v1683_v20  ;;  %1656 = vmatmul.msk.bf16.gmra.mxu3 %vm792_vm1, %v1692_v23 }
  0x4c   : > { %1567 = vmatmul.msk.bf16.gmra.mxu0 %vm537_vm2, %v1665_v21  ;;  %1575 = vmatmul.msk.bf16.gmra.mxu2 %vm537_vm2, %v1673_v22 }
  0x50   : > { %1648 = vmatmul.msk.bf16.gmra.mxu1 %vm792_vm1, %v1684_v24  ;;  %1657 = vmatmul.msk.bf16.gmra.mxu3 %vm792_vm1, %v1693_v27 }
  0x5c   : > { %1568 = vmatmul.msk.bf16.gmra.mxu0 %vm537_vm2, %v1666_v25  ;;  %1576 = vmatmul.msk.bf16.gmra.mxu2 %vm537_vm2, %v1674_v26 }
  0x60   : > { %1649 = vmatmul.msk.bf16.gmra.mxu1 %vm792_vm1, %v1685_v28  ;;  %1658 = vmatmul.msk.bf16.gmra.mxu3 %vm792_vm1, %v1694_v32 }
  0x6c   : > { %1569 = vmatmul.msk.bf16.gmra.mxu0 %vm537_vm2, %v1667_v29  ;;  %1577 = vmatmul.msk.bf16.gmra.mxu2 %vm537_vm2, %v1675_v30 }
  0x70   : > { %1650 = vmatmul.msk.bf16.gmra.mxu1 %vm792_vm1, %v1686_v31  ;;  %1659 = vmatmul.msk.bf16.gmra.mxu3 %vm792_vm1, %v1695_v36 }
  0x7c   : > { %1570 = vmatmul.msk.bf16.gmra.mxu0 %vm537_vm2, %v1668_v33  ;;  %1578 = vmatmul.msk.bf16.gmra.mxu2 %vm537_vm2, %v1676_v34 }
  0x80   : > { %1651 = vmatmul.msk.bf16.gmra.mxu1 %vm792_vm1, %v1687_v35 }
  0x8c   : > { %1571 = vmatmul.msk.bf16.gmra.mxu0 %vm537_vm2, %v1669_v37  ;;  %1579 = vmatmul.msk.bf16.gmra.mxu2 %vm537_vm2, %v1677_v38 }
  0x8d   : > { %v853_v40 = vpop.f32.mrf.mxu1 }
  0x8e   : > { %v1206_v43 = vmul.f32 %v853_v40, %v853_v40 }
  0x90   : > { %1652 = vmatmul.msk.bf16.gmra.mxu1 %vm792_vm1, %v1688_v39 }
  0x93   : > { %v2073_v59 = vpop.f32.mrf.mxu3 }
  0x95   : > { %v855_v42 = vpop.f32.mrf.mxu1 }
  0x96   : > { %v1779_v44 = vpack.c.bf16 %v855_v42, %v853_v40  ;;  %v1169_v45 = vadd.f32 %v855_v42, %v853_v40  ;;  %v1207_v46 = vmul.f32 %v855_v42, %v855_v42 }
  0x98   : > { %1780 = vst [vmem:[%s2061_s29] sm:$0xff] %v1779_v44   ;;  %v1238_v47 = vadd.f32 %v1207_v46, %v1206_v43 }
  0x99   : > { %v599_v41 = vpop.f32.mrf.mxu0 }
  0x9a   : > { %v1098_v50 = vmul.f32 %v599_v41, %v599_v41 }
  0x9b   : > { %v2081_v7 = vpop.f32.mrf.mxu3 }
  0x9c   : > { %v1824_v8 = vpack.c.bf16 %v2081_v7, %v2073_v59 }
  0x9d   : > { %v858_v54 = vpop.f32.mrf.mxu1 }
  0x9e   : > { %v1170_v55 = vadd.f32 %v1169_v45, %v858_v54  ;;  %v1208_v56 = vmul.f32 %v858_v54, %v858_v54  ;;  %1879 = vst [vmem:[%s2061_s29 + $0x48] sm:$0xff] %v1824_v8  }
  0x9f   : > { %v2064_v48 = vpop.f32.mrf.mxu2 }
  0xa0   : > { %v1239_v58 = vadd.f32 %v1238_v47, %v1208_v56 }
  0xa1   : > { %v601_v49 = vpop.f32.mrf.mxu0 }
  0xa2   : > { %v1699_v51 = vpack.c.bf16 %v601_v49, %v599_v41  ;;  %v1061_v52 = vadd.f32 %v601_v49, %v599_v41  ;;  %v1099_v53 = vmul.f32 %v601_v49, %v601_v49 }
  0xa3   : > { %v2089_v19 = vpop.f32.mrf.mxu3 }
  0xa4   : > { %1700 = vst [vmem:[%s2070_s13] sm:$0xff] %v1699_v51   ;;  %v1130_v57 = vadd.f32 %v1099_v53, %v1098_v50 }
  0xa5   : > { %v860_v1 = vpop.f32.mrf.mxu1 }
  0xa6   : > { %v1784_v2 = vpack.c.bf16 %v860_v1, %v858_v54  ;;  %v1171_v3 = vadd.f32 %v1170_v55, %v860_v1  ;;  %v1209_v4 = vmul.f32 %v860_v1, %v860_v1 }
  0xa7   : > { %v2075_v60 = vpop.f32.mrf.mxu2 }
  0xa8   : > { %v1739_v62 = vpack.c.bf16 %v2075_v60, %v2064_v48  ;;  %1871 = vst [vmem:[%s2061_s29 + $0x8] sm:$0xff] %v1784_v2   ;;  %v1240_v6 = vadd.f32 %v1239_v58, %v1209_v4 }
  0xa9   : > { %v604_v61 = vpop.f32.mrf.mxu0 }
  0xaa   : > { %v1062_v63 = vadd.f32 %v1061_v52, %v604_v61  ;;  %v1100_v0 = vmul.f32 %v604_v61, %v604_v61  ;;  %1863 = vst [vmem:[%s2070_s13 + $0x40] sm:$0xff] %v1739_v62  }
  0xab   : > { %v2101_v31 = vpop.f32.mrf.mxu3 }
  0xac   : > { %v1131_v5 = vadd.f32 %v1130_v57, %v1100_v0  ;;  %v1829_v32 = vpack.c.bf16 %v2101_v31, %v2089_v19 }
  0xad   : > { %v863_v14 = vpop.f32.mrf.mxu1 }
  0xae   : > { %v1172_v15 = vadd.f32 %v1171_v3, %v863_v14  ;;  %v1210_v16 = vmul.f32 %v863_v14, %v863_v14  ;;  %1880 = vst [vmem:[%s2061_s29 + $0x50] sm:$0xff] %v1829_v32  }
  0xaf   : > { %v2085_v9 = vpop.f32.mrf.mxu2 }
  0xb0   : > { %v1241_v18 = vadd.f32 %v1240_v6, %v1210_v16 }
  0xb1   : > { %v606_v10 = vpop.f32.mrf.mxu0 }
  0xb2   : > { %v1704_v11 = vpack.c.bf16 %v606_v10, %v604_v61  ;;  %v1063_v12 = vadd.f32 %v1062_v63, %v606_v10  ;;  %v1101_v13 = vmul.f32 %v606_v10, %v606_v10 }
  0xb3   : > { %v2116_v40 = vpop.f32.mrf.mxu3 }
  0xb4   : > { %1856 = vst [vmem:[%s2070_s13 + $0x8] sm:$0xff] %v1704_v11   ;;  %v1132_v17 = vadd.f32 %v1131_v5, %v1101_v13 }
  0xb5   : > { %v865_v25 = vpop.f32.mrf.mxu1 }
  0xb6   : > { %v1789_v26 = vpack.c.bf16 %v865_v25, %v863_v14  ;;  %v1173_v27 = vadd.f32 %v1172_v15, %v865_v25  ;;  %v1211_v28 = vmul.f32 %v865_v25, %v865_v25 }
  0xb7   : > { %v2091_v20 = vpop.f32.mrf.mxu2 }
  0xb8   : > { %v1744_v22 = vpack.c.bf16 %v2091_v20, %v2085_v9  ;;  %1872 = vst [vmem:[%s2061_s29 + $0x10] sm:$0xff] %v1789_v26   ;;  %v1242_v30 = vadd.f32 %v1241_v18, %v1211_v28 }
  0xb9   : > { %v609_v21 = vpop.f32.mrf.mxu0 }
  0xba   : > { %v2095_v23 = vadd.f32 %v1063_v12, %v609_v21  ;;  %v1102_v24 = vmul.f32 %v609_v21, %v609_v21  ;;  %1864 = vst [vmem:[%s2070_s13 + $0x48] sm:$0xff] %v1744_v22  }
  0xbb   : > { %v2127_v46 = vpop.f32.mrf.mxu3 }
  0xbc   : > { %v2098_v29 = vadd.f32 %v1132_v17, %v1102_v24  ;;  %v1834_v47 = vpack.c.bf16 %v2127_v46, %v2116_v40 }
  0xbd   : > { %v868_v36 = vpop.f32.mrf.mxu1 }
  0xbe   : > { %v2111_v37 = vadd.f32 %v1173_v27, %v868_v36  ;;  %v1212_v38 = vmul.f32 %v868_v36, %v868_v36  ;;  %1881 = vst [vmem:[%s2061_s29 + $0x58] sm:$0xff] %v1834_v47  }
  0xbf   : > { %v2105_v33 = vpop.f32.mrf.mxu2 }
  0xc0   : > { %v2114_v39 = vadd.f32 %v1242_v30, %v1212_v38 }
  0xc1   : > { %v2108_v34 = vpop.f32.mrf.mxu0 }
  0xc2   : > { %v1709_v35 = vpack.c.bf16 %v2108_v34, %v609_v21  ;;  %v1103_v26 = vmul.f32 %v2108_v34, %v2108_v34  ;;  %v1065_v27 = vadd.f32 %v2095_v23, %v2108_v34 }
  0xc3   : > { %v2137_v53 = vpop.f32.mrf.mxu3 }
  0xc4   : > { %1857 = vst [vmem:[%s2070_s13 + $0x10] sm:$0xff] %v1709_v35   ;;  %v1134_v35 = vadd.f32 %v2098_v29, %v1103_v26 }
  0xc5   : > { %v2122_v44 = vpop.f32.mrf.mxu1 }
  0xc6   : > { %v1794_v45 = vpack.c.bf16 %v2122_v44, %v868_v36 }
  0xc7   : > { %v2118_v41 = vpop.f32.mrf.mxu2 }
  0xc8   : > { %v1749_v43 = vpack.c.bf16 %v2118_v41, %v2105_v33  ;;  %1873 = vst [vmem:[%s2061_s29 + $0x18] sm:$0xff] %v1794_v45  }
  0xc9   : > { %v614_v42 = vpop.f32.mrf.mxu0 }
  0xca   : > { %1865 = vst [vmem:[%s2070_s13 + $0x50] sm:$0xff] %v1749_v43   ;;  %v1104_v28 = vmul.f32 %v614_v42, %v614_v42  ;;  %v1066_v36 = vadd.f32 %v1065_v27, %v614_v42 }
  0xcb   : > { %v2149_v61 = vpop.f32.mrf.mxu3 }
  0xcc   : > { %v1839_v62 = vpack.c.bf16 %v2149_v61, %v2137_v53  ;;  %v1135_v47 = vadd.f32 %v1134_v35, %v1104_v28 }
  0xcd   : > { %v2134_v52 = vpop.f32.mrf.mxu1 }
  0xce   : > { %1882 = vst [vmem:[%s2061_s29 + $0x60] sm:$0xff] %v1839_v62  }
  0xcf   : > { %v2131_v49 = vpop.f32.mrf.mxu2 }
  0xd1   : > { %v616_v50 = vpop.f32.mrf.mxu0 }
  0xd2   : > { %v1714_v51 = vpack.c.bf16 %v616_v50, %v614_v42  ;;  %v1105_v38 = vmul.f32 %v616_v50, %v616_v50 }
  0xd3   : > { %v2159_v3 = vpop.f32.mrf.mxu3 }
  0xd4   : > { %1858 = vst [vmem:[%s2070_s13 + $0x18] sm:$0xff] %v1714_v51   ;;  %v1067_v51 = vadd.f32 %v1066_v36, %v616_v50  ;;  %v1136_v34 = vadd.f32 %v1135_v47, %v1105_v38  ;;  %v1214_v50 = vmul.f32 %v2134_v52, %v2134_v52 }
  0xd5   : > { %v2143_v57 = vpop.f32.mrf.mxu1 }
  0xd6   : > { %v1799_v58 = vpack.c.bf16 %v2143_v57, %v2134_v52 }
  0xd7   : > { %v2139_v54 = vpop.f32.mrf.mxu2 }
  0xd8   : > { %v1754_v56 = vpack.c.bf16 %v2139_v54, %v2131_v49  ;;  %1874 = vst [vmem:[%s2061_s29 + $0x20] sm:$0xff] %v1799_v58  }
  0xd9   : > { %v619_v55 = vpop.f32.mrf.mxu0 }
  0xda   : > { %1866 = vst [vmem:[%s2070_s13 + $0x58] sm:$0xff] %v1754_v56   ;;  %v1106_v56 = vmul.f32 %v619_v55, %v619_v55  ;;  %v1068_v62 = vadd.f32 %v1067_v51, %v619_v55 }
  0xdb   : > { %v2171_v11 = vpop.f32.mrf.mxu3 }
  0xdc   : > { %v1844_v12 = vpack.c.bf16 %v2171_v11, %v2159_v3  ;;  %v1137_v29 = vadd.f32 %v1136_v34, %v1106_v56 }
  0xdd   : > { %v2156_v2 = vpop.f32.mrf.mxu1 }
  0xde   : > { %1883 = vst [vmem:[%s2061_s29 + $0x68] sm:$0xff] %v1844_v12  }
  0xdf   : > { %v2153_v63 = vpop.f32.mrf.mxu2 }
  0xe1   : > { %v621_v0 = vpop.f32.mrf.mxu0 }
  0xe2   : > { %v1719_v1 = vpack.c.bf16 %v621_v0, %v619_v55  ;;  %v1069_v42 = vadd.f32 %v1068_v62, %v621_v0 }
  0xe3   : > { %v2181_v17 = vpop.f32.mrf.mxu3 }
  0xe4   : > { %1859 = vst [vmem:[%s2070_s13 + $0x20] sm:$0xff] %v1719_v1   ;;  %v1107_v1 = vmul.f32 %v621_v0, %v621_v0  ;;  %v1215_v0 = vmul.f32 %v2143_v57, %v2143_v57 }
  0xe5   : > { %v2165_v8 = vpop.f32.mrf.mxu1 }
  0xe6   : > { %v1804_v10 = vpack.c.bf16 %v2165_v8, %v2156_v2 }
  0xe7   : > { %v2161_v4 = vpop.f32.mrf.mxu2 }
  0xe8   : > { %v1759_v6 = vpack.c.bf16 %v2161_v4, %v2153_v63  ;;  %1875 = vst [vmem:[%s2061_s29 + $0x28] sm:$0xff] %v1804_v10  }
  0xe9   : > { %v624_v5 = vpop.f32.mrf.mxu0 }
  0xea   : > { %1867 = vst [vmem:[%s2070_s13 + $0x60] sm:$0xff] %v1759_v6   ;;  %v1213_v6 = vmul.f32 %v2122_v44, %v2122_v44  ;;  %v1108_v10 = vmul.f32 %v624_v5, %v624_v5 }
  0xeb   : > { %v2197_v30 = vpop.f32.mrf.mxu3 }
  0xec   : > { %v1849_v32 = vpack.c.bf16 %v2197_v30, %v2181_v17  ;;  %v1244_v27 = vadd.f32 %v2114_v39, %v1213_v6  ;;  %v1216_v39 = vmul.f32 %v2156_v2, %v2156_v2 }
  0xed   : > { %v2178_v16 = vpop.f32.mrf.mxu1 }
  0xee   : > { %1884 = vst [vmem:[%s2061_s29 + $0x70] sm:$0xff] %v1849_v32   ;;  %v1245_v38 = vadd.f32 %v1244_v27, %v1214_v50 }
  0xef   : > { %v2175_v13 = vpop.f32.mrf.mxu2 }
  0xf0   : > { %v1246_v34 = vadd.f32 %v1245_v38, %v1215_v0 }
  0xf1   : > { %v626_v14 = vpop.f32.mrf.mxu0 }
  0xf2   : > { %v1724_v15 = vpack.c.bf16 %v626_v14, %v624_v5  ;;  %v1109_v55 = vmul.f32 %v626_v14, %v626_v14 }
  0xf3   : > { %v2210_v12 = vpop.f32.mrf.mxu3 }
  0xf4   : > { %1860 = vst [vmem:[%s2070_s13 + $0x28] sm:$0xff] %v1724_v15   ;;  %v1175_v15 = vadd.f32 %v2111_v37, %v2122_v44 }
  0xf5   : > { %v2187_v24 = vpop.f32.mrf.mxu1 }
  0xf6   : > { %v1809_v25 = vpack.c.bf16 %v2187_v24, %v2178_v16  ;;  %v1176_v28 = vadd.f32 %v1175_v15, %v2134_v52 }
  0xf7   : > { %v2183_v18 = vpop.f32.mrf.mxu2 }
  0xf8   : > { %v1764_v22 = vpack.c.bf16 %v2183_v18, %v2175_v13  ;;  %1876 = vst [vmem:[%s2061_s29 + $0x30] sm:$0xff] %v1809_v25   ;;  %v1070_v25 = vadd.f32 %v1069_v42, %v624_v5  ;;  %v1177_v47 = vadd.f32 %v1176_v28, %v2143_v57  ;;  %v1247_v42 = vadd.f32 %v1246_v34, %v1216_v39 }
  0xf9   : > { %v629_v21 = vpop.f32.mrf.mxu0 }
  0xfa   : > { %1868 = vst [vmem:[%s2070_s13 + $0x68] sm:$0xff] %v1764_v22   ;;  %v1138_v22 = vadd.f32 %v1137_v29, %v1107_v1  ;;  %v1071_v35 = vadd.f32 %v1070_v25, %v626_v14  ;;  %v1110_v36 = vmul.f32 %v629_v21, %v629_v21  ;;  %v1178_v62 = vadd.f32 %v1177_v47, %v2156_v2 }
  0xfb   : > { %v1217_v14 = vmul.f32 %v2165_v8, %v2165_v8  ;;  %v2233_v29 = vpop.f32.mrf.mxu3  ;;  %v1114_v47 = vmul.f32 %v2064_v48, %v2064_v48 }
  0xfc   : > { %v1139_v44 = vadd.f32 %v1138_v22, %v1108_v10  ;;  %v1072_v56 = vadd.f32 %v1071_v35, %v629_v21  ;;  %v1179_v10 = vadd.f32 %v1178_v62, %v2165_v8  ;;  %v1854_v15 = vpack.c.bf16 %v2233_v29, %v2210_v12 }
  0xfd   : > { %v2205_v23 = vpop.f32.mrf.mxu1  ;;  %v1248_v25 = vadd.f32 %v1247_v42, %v1217_v14 }
  0xfe   : > { %v1140_v51 = vadd.f32 %v1139_v44, %v1109_v55  ;;  %v1219_v55 = vmul.f32 %v2187_v24, %v2187_v24  ;;  %1885 = vst [vmem:[%s2061_s29 + $0x78] sm:$0xff] %v1854_v15   ;;  %v1220_v38 = vmul.f32 %v2205_v23, %v2205_v23 }
  0xff   : > { %v2202_v43 = vpop.f32.mrf.mxu2 }
 0x100   : > { %v1141_v1 = vadd.f32 %v1140_v51, %v1110_v36 }
 0x101   : > { %v631_v45 = vpop.f32.mrf.mxu0 }
 0x102   : > { %v1729_v58 = vpack.c.bf16 %v631_v45, %v629_v21  ;;  %v1073_v6 = vadd.f32 %v1072_v56, %v631_v45  ;;  %v1218_v21 = vmul.f32 %v2178_v16, %v2178_v16  ;;  %v1115_v56 = vmul.f32 %v2075_v60, %v2075_v60 }
 0x104   : > { %1861 = vst [vmem:[%s2070_s13 + $0x30] sm:$0xff] %v1729_v58   ;;  %v1111_v58 = vmul.f32 %v631_v45, %v631_v45  ;;  %v1180_v45 = vadd.f32 %v1179_v10, %v2178_v16  ;;  %v1249_v35 = vadd.f32 %v1248_v25, %v1218_v21 }
 0x105   : > { %v890_v5 = vpop.f32.mrf.mxu1 }
 0x106   : > { %v1814_v52 = vpack.c.bf16 %v890_v5, %v2205_v23  ;;  %v1142_v2 = vadd.f32 %v1141_v1, %v1111_v58  ;;  %v1181_v36 = vadd.f32 %v1180_v45, %v2187_v24  ;;  %v1116_v1 = vmul.f32 %v2085_v9, %v2085_v9 }
 0x107   : > { %v2216_v26 = vpop.f32.mrf.mxu2  ;;  %v1118_v45 = vmul.f32 %v2105_v33, %v2105_v33 }
 0x108   : > { %v1769_v37 = vpack.c.bf16 %v2216_v26, %v2202_v43  ;;  %1877 = vst [vmem:[%s2061_s29 + $0x38] sm:$0xff] %v1814_v52   ;;  %v1250_v52 = vadd.f32 %v1249_v35, %v1219_v55  ;;  %v1182_v51 = vadd.f32 %v1181_v36, %v2205_v23  ;;  %v1225_v35 = vmul.f32 %v2081_v7, %v2081_v7 }
 0x109   : > { %v634_v32 = vpop.f32.mrf.mxu0 }
 0x10a   : > { %1869 = vst [vmem:[%s2070_s13 + $0x70] sm:$0xff] %v1769_v37   ;;  %v1112_v57 = vmul.f32 %v634_v32, %v634_v32  ;;  %v1074_v50 = vadd.f32 %v1073_v6, %v634_v32  ;;  %v1251_v34 = vadd.f32 %v1250_v52, %v1220_v38  ;;  %v1183_v62 = vadd.f32 %v1182_v51, %v890_v5 }
 0x10b   : > { %v1120_v38 = vmul.f32 %v2131_v49, %v2131_v49 }
 0x10c   : > { %v1143_v8 = vadd.f32 %v1142_v2, %v1112_v57 }
 0x10d   : > { %v893_v44 = vpop.f32.mrf.mxu1 }
 0x10e   : > { %v1222_v14 = vmul.f32 %v893_v44, %v893_v44  ;;  %v1184_v42 = vadd.f32 %v1183_v62, %v893_v44 }
 0x10f   : > { %v2240_v22 = vpop.f32.mrf.mxu2 }
 0x111   : > { %v636_v27 = vpop.f32.mrf.mxu0 }
 0x112   : > { %v1734_v28 = vpack.c.bf16 %v636_v27, %v634_v32  ;;  %v1075_v0 = vadd.f32 %v1074_v50, %v636_v27  ;;  %v1113_v37 = vmul.f32 %v636_v27, %v636_v27  ;;  %v1221_v32 = vmul.f32 %v890_v5, %v890_v5 }
 0x114   : > { %1862 = vst [vmem:[%s2070_s13 + $0x38] sm:$0xff] %v1734_v28   ;;  %v1076_v16 = vadd.f32 %v1075_v0, %v2064_v48  ;;  %v1144_v39 = vadd.f32 %v1143_v8, %v1113_v37  ;;  %v1252_v23 = vadd.f32 %v1251_v34, %v1221_v32  ;;  %v1224_v8 = vmul.f32 %v2073_v59, %v2073_v59 }
 0x115   : > { %v895_v15 = vpop.f32.mrf.mxu1  ;;  %v1119_v0 = vmul.f32 %v2118_v41, %v2118_v41 }
 0x116   : > { %v1077_v58 = vadd.f32 %v1076_v16, %v2075_v60  ;;  %v1145_v24 = vadd.f32 %v1144_v39, %v1114_v47  ;;  %v1117_v60 = vmul.f32 %v2091_v20, %v2091_v20  ;;  %v1253_v2 = vadd.f32 %v1252_v23, %v1222_v14 }
 0x117   : > { %v2260_v57 = vpop.f32.mrf.mxu2  ;;  %v1819_v50 = vpack.c.bf16 %v895_v15, %v893_v44  ;;  %v1185_v25 = vadd.f32 %v1184_v42, %v895_v15 }
 0x118   : > { %v1078_v48 = vadd.f32 %v1077_v58, %v2085_v9  ;;  %v1146_v6 = vadd.f32 %v1145_v24, %v1115_v56  ;;  %v1774_v10 = vpack.c.bf16 %v2260_v57, %v2240_v22  ;;  %v1223_v9 = vmul.f32 %v895_v15, %v895_v15 }
 0x119   : > { %1878 = vst [vmem:[%s2061_s29 + $0x40] sm:$0xff] %v1819_v50   ;;  %v1186_v28 = vadd.f32 %v1185_v25, %v2073_v59  ;;  %v1226_v59 = vmul.f32 %v2089_v19, %v2089_v19  ;;  %v1126_v25 = vmul.f32 %v2202_v43, %v2202_v43 }
 0x11a   : > { %v1079_v5 = vadd.f32 %v1078_v48, %v2091_v20  ;;  %v1147_v21 = vadd.f32 %v1146_v6, %v1116_v1  ;;  %1870 = vst [vmem:[%s2070_s13 + $0x78] sm:$0xff] %v1774_v10   ;;  %v1254_v20 = vadd.f32 %v1253_v2, %v1223_v9 }
 0x11b   : > { %v1187_v36 = vadd.f32 %v1186_v28, %v2081_v7  ;;  %v1227_v7 = vmul.f32 %v2101_v31, %v2101_v31 }
 0x11c   : > { %v1080_v55 = vadd.f32 %v1079_v5, %v2105_v33  ;;  %v1148_v27 = vadd.f32 %v1147_v21, %v1117_v60  ;;  %v1255_v33 = vadd.f32 %v1254_v20, %v1224_v8  ;;  %v1127_v8 = vmul.f32 %v2216_v26, %v2216_v26 }
 0x11d   : > { %v1188_v39 = vadd.f32 %v1187_v36, %v2089_v19  ;;  %v1228_v19 = vmul.f32 %v2116_v40, %v2116_v40 }
 0x11e   : > { %v1081_v37 = vadd.f32 %v1080_v55, %v2118_v41  ;;  %v1149_v44 = vadd.f32 %v1148_v27, %v1118_v45  ;;  %v1256_v52 = vadd.f32 %v1255_v33, %v1225_v35  ;;  %v1121_v41 = vmul.f32 %v2139_v54, %v2139_v54 }
 0x11f   : > { %v1189_v56 = vadd.f32 %v1188_v39, %v2101_v31  ;;  %v1229_v31 = vmul.f32 %v2127_v46, %v2127_v46 }
 0x120   : > { %v1150_v47 = vadd.f32 %v1149_v44, %v1119_v0  ;;  %v1082_v16 = vadd.f32 %v1081_v37, %v2131_v49  ;;  %v1257_v58 = vadd.f32 %v1256_v52, %v1226_v59  ;;  %v1122_v49 = vmul.f32 %v2153_v63, %v2153_v63 }
 0x121   : > { %v1190_v62 = vadd.f32 %v1189_v56, %v2116_v40  ;;  %v1230_v40 = vmul.f32 %v2137_v53, %v2137_v53  ;;  %v1234_v37 = vmul.f32 %v2181_v17, %v2181_v17 }
 0x122   : > { %v1083_v51 = vadd.f32 %v1082_v16, %v2139_v54  ;;  %v1151_v32 = vadd.f32 %v1150_v47, %v1120_v38  ;;  %v1258_v14 = vadd.f32 %v1257_v58, %v1227_v7  ;;  %v1123_v54 = vmul.f32 %v2161_v4, %v2161_v4 }
 0x123   : > { %v1191_v6 = vadd.f32 %v1190_v62, %v2127_v46  ;;  %v1231_v46 = vmul.f32 %v2149_v61, %v2149_v61  ;;  %v1235_v38 = vmul.f32 %v2197_v30, %v2197_v30 }
 0x124   : > { %v1084_v24 = vadd.f32 %v1083_v51, %v2153_v63  ;;  %v1152_v34 = vadd.f32 %v1151_v32, %v1121_v41  ;;  %v1259_v23 = vadd.f32 %v1258_v14, %v1228_v19  ;;  %v1124_v63 = vmul.f32 %v2175_v13, %v2175_v13 }
 0x125   : > { %v1192_v5 = vadd.f32 %v1191_v6, %v2137_v53  ;;  %v1232_v53 = vmul.f32 %v2159_v3, %v2159_v3  ;;  %v1237_v32 = vmul.f32 %v2233_v29, %v2233_v29 }
 0x126   : > { %v1085_v1 = vadd.f32 %v1084_v24, %v2161_v4  ;;  %v1153_v48 = vadd.f32 %v1152_v34, %v1122_v49  ;;  %v1260_v60 = vadd.f32 %v1259_v23, %v1229_v31  ;;  %v1125_v4 = vmul.f32 %v2183_v18, %v2183_v18 }
 0x127   : > { %v1193_v2 = vadd.f32 %v1192_v5, %v2149_v61  ;;  %v1233_v61 = vmul.f32 %v2171_v11, %v2171_v11 }
 0x128   : > { %v1086_v42 = vadd.f32 %v1085_v1, %v2175_v13  ;;  %v1154_v10 = vadd.f32 %v1153_v48, %v1123_v54  ;;  %v1261_v50 = vadd.f32 %v1260_v60, %v1230_v40 }
 0x129   : > { %v1194_v45 = vadd.f32 %v1193_v2, %v2159_v3  ;;  %v1128_v3 = vmul.f32 %v2240_v22, %v2240_v22 }
 0x12a   : > { %v1087_v21 = vadd.f32 %v1086_v42, %v2183_v18  ;;  %v1155_v15 = vadd.f32 %v1154_v10, %v1124_v63  ;;  %v1262_v55 = vadd.f32 %v1261_v50, %v1231_v46 }
 0x12b   : > { %v1195_v28 = vadd.f32 %v1194_v45, %v2171_v11  ;;  %v1129_v11 = vmul.f32 %v2260_v57, %v2260_v57 }
 0x12c   : > { %v1088_v13 = vadd.f32 %v1087_v21, %v2202_v43  ;;  %v1156_v9 = vadd.f32 %v1155_v15, %v1125_v4  ;;  %v1263_v20 = vadd.f32 %v1262_v55, %v1232_v53 }
 0x12d   : > { %v1196_v44 = vadd.f32 %v1195_v28, %v2181_v17  ;;  %v1236_v17 = vmul.f32 %v2210_v12, %v2210_v12 }
 0x12e   : > { %v1157_v18 = vadd.f32 %v1156_v9, %v1126_v25  ;;  %v1089_v27 = vadd.f32 %v1088_v13, %v2216_v26  ;;  %v1264_v35 = vadd.f32 %v1263_v20, %v1233_v61 }
 0x12f   : > { %v1197_v33 = vadd.f32 %v1196_v44, %v2197_v30 }
 0x130   : > { %v1158_v43 = vadd.f32 %v1157_v18, %v1127_v8  ;;  %v1090_v0 = vadd.f32 %v1089_v27, %v2240_v22  ;;  %v1265_v47 = vadd.f32 %v1264_v35, %v1234_v37 }
 0x131   : > { %v1198_v39 = vadd.f32 %v1197_v33, %v2210_v12 }
 0x132   : > { %v1159_v26 = vadd.f32 %v1158_v43, %v1128_v3  ;;  %v1091_v36 = vadd.f32 %v1090_v0, %v2260_v57  ;;  %v1266_v59 = vadd.f32 %v1265_v47, %v1235_v38 }
 0x133   : > { %v1199_v57 = vadd.f32 %v1198_v39, %v2233_v29 }
 0x134   : > { %v1092_v22 = vrot.slane %v1091_v36, 4  ;;  %v1160_v16 = vadd.f32 %v1159_v26, %v1129_v11  ;;  %v1267_v51 = vadd.f32 %v1266_v59, %v1236_v17 }
 0x135   : > { %v1200_v56 = vrot.slane %v1199_v57, 4 }
 0x136   : > { %v1093_v52 = vadd.f32 %v1092_v22, %v1091_v36  ;;  %v1161_v41 = vrot.slane %v1160_v16, 4  ;;  %v1268_v58 = vadd.f32 %v1267_v51, %v1237_v32 }
 0x137   : > { %v1201_v34 = vadd.f32 %v1200_v56, %v1199_v57 }
 0x138   : > { %v1094_v7 = vrot.slane %v1093_v52, 2  ;;  %v1162_v30 = vadd.f32 %v1161_v41, %v1160_v16  ;;  %v1269_v19 = vrot.slane %v1268_v58, 4 }
 0x139   : > { %v1202_v14 = vrot.slane %v1201_v34, 2 }
 0x13a   : > { %v1095_v49 = vadd.f32 %v1094_v7, %v1093_v52  ;;  %v1163_v24 = vrot.slane %v1162_v30, 2  ;;  %v1270_v54 = vadd.f32 %v1269_v19, %v1268_v58 }
 0x13b   : > { %v1203_v29 = vadd.f32 %v1202_v14, %v1201_v34 }
 0x13c   : > { %v1096_v62 = vrot.slane %v1095_v49, 1  ;;  %v1164_v12 = vadd.f32 %v1163_v24, %v1162_v30  ;;  %v1271_v31 = vrot.slane %v1270_v54, 2 }
 0x13d   : > { %v1204_v23 = vrot.slane %v1203_v29, 1 }
 0x13e   : > { %v1097_v1 = vadd.f32 %v1096_v62, %v1095_v49  ;;  %v1165_v48 = vrot.slane %v1164_v12, 1  ;;  %v1272_v63 = vadd.f32 %v1271_v31, %v1270_v54 }
 0x13f   : > { %v1205_v42 = vadd.f32 %v1204_v23, %v1203_v29 }
 0x140   : > { %v1166_v6 = vadd.f32 %v1165_v48, %v1164_v12  ;;  %1167 = vst [vmem:[%s394_s16] sm:$0x1] %v1097_v1  ;;  %v1273_v10 = vrot.slane %v1272_v63, 1 }
 0x141   : > { %1275 = vst [vmem:[%s400_s22] sm:$0x1] %v1205_v42 }
 0x142   : > { %1168 = vst [vmem:[%s397_s19] sm:$0x1] %v1166_v6  ;;  %v1274_v40 = vadd.f32 %v1273_v10, %v1272_v63 }
 0x144   : > { %1276 = vst [vmem:[%s403_s25] sm:$0x1] %v1274_v40 }
 0x145 PF: > { %s20_s30 = sadd.s32 1, %s1904_s30  }
 0x146   : > { %p17_p5 = scmp.ge.s32.totalorder %s20_s30, 4  }
 0x148   :  { %19 = sbr.rel (!%p17_p5) target bundleno = 1 (0x1), region = 129 }

// kernel: a_call__.5
= control target key start
LH: loop header
LB: loop body
LE: loop exit
PB: predicated region body
PF: predicated region fallthrough
CT: control target
= control target key end

     0   :  { %s1435_s24 = smov 0   ;;  %s1685_s0 = inlined_call_operand.vmem [shape: bf16[512,128], index: 0, kind: input, shape index: {}]   ;;  %s1686_s1 = inlined_call_operand.vmem [shape: bf16[512,128], index: 1, kind: input, shape index: {}]   ;;  %s1687_s2 = inlined_call_operand.vmem [shape: f32[1,128], index: 2, kind: input, shape index: {}]   ;;  %s1688_s3 = inlined_call_operand.vmem [shape: f32[1,128], index: 3, kind: input, shape index: {}]   ;;  %s1689_s4 = inlined_call_operand.vmem [shape: f32[1,128], index: 4, kind: input, shape index: {}]   ;;  %s1690_s5 = inlined_call_operand.vmem [shape: f32[1,128], index: 5, kind: input, shape index: {}]   ;;  %s1691_s6 = inlined_call_operand.vmem [shape: bf16[512,128], index: 6, kind: output, shape index: {0}]   ;;  %s1692_s7 = inlined_call_operand.vmem [shape: bf16[512,128], index: 7, kind: output, shape index: {1}]  }
   0x1 LB: > { %s1012_s25 = sadd.s32 4294967295, %s1393_s24   ;;  %p1016_p0 = scmp.ge.s32.totalorder %s1393_s24, 1  ;;  %s1393_s24 = sphi %s1435_s24, %s18_s24  }
   0x2   : > { %p252_p1 = scmp.lt.s32.totalorder %s1393_s24, 3 }
   0x4   : > { %p253_p2 = pnand %p1016_p0, %p252_p1 }
   0x5   : > { %s1017_s26 = sshll.u32 (!%p253_p2), %s1012_s25, 5 }
   0x6   : > { %256 = sbr.rel (%p253_p2) target bundleno = 127 (0x7f), region = 44  ;;  %p295_p3 = scmp.lt.s32.totalorder (!%p253_p2), %s1017_s26, 63 }
   0xb   : > { %s1694_s26 = smov (!%p295_p3, %s1017_s26), 63  ;;  %v1454_v0 = vld [vmem:[%s1687_s2] ss:$0 sm:$0xff] }
   0xc   : > { %s1443_s27 = sshll.u32 %s1694_s26, 2  ;;  %v1462_v6 = vld [vmem:[%s1688_s3] ss:$0 sm:$0xff] }
   0xd   : > { %s1449_s30 = scalar_lea.vmem %s1685_s0, %s1443_s27  ;;  %s1485_s14 = scalar_lea.vmem %s1691_s6, %s1443_s27 }
   0xe   : > { %v1028_v1 = vld [vmem:[%s1449_s30] sm:$0xff]   ;;  %v1315_v2 = vld [vmem:[%s1449_s30 + $0x8] sm:$0xff]   ;;  %v1316_v3 = vld [vmem:[%s1449_s30 + $0x10] sm:$0xff]   ;;  %s1551_s17 = scalar_lea.vmem %s1686_s1, %s1443_s27  ;;  %s1594_s25 = scalar_lea.vmem %s1692_s7, %s1443_s27 }
   0xf   : > { %v1029_v4 = vunpack.c.l.bf16 %v1028_v1  ;;  %v1030_v5 = vunpack.c.h.bf16 %v1028_v1  ;;  %v1033_v7 = vunpack.c.l.bf16 %v1315_v2  ;;  %v1034_v8 = vunpack.c.h.bf16 %v1315_v2  ;;  %v1317_v9 = vld [vmem:[%s1449_s30 + $0x18] sm:$0xff]   ;;  %v1318_v36 = vld [vmem:[%s1449_s30 + $0x20] sm:$0xff]   ;;  %v1319_v41 = vld [vmem:[%s1449_s30 + $0x28] sm:$0xff]  }
  0x10   : > { %v1037_v10 = vunpack.c.l.bf16 %v1316_v3  ;;  %v1038_v11 = vunpack.c.h.bf16 %v1316_v3  ;;  %v1041_v12 = vunpack.c.l.bf16 %v1317_v9  ;;  %v1042_v13 = vunpack.c.h.bf16 %v1317_v9  ;;  %v1320_v52 = vld [vmem:[%s1449_s30 + $0x30] sm:$0xff]   ;;  %v1321_v53 = vld [vmem:[%s1449_s30 + $0x38] sm:$0xff]  }
  0x11   : > { %v386_v14 = vmul.f32 %v1454_v0, %v1029_v4  ;;  %v387_v15 = vmul.f32 %v1454_v0, %v1030_v5  ;;  %v388_v16 = vmul.f32 %v1454_v0, %v1033_v7  ;;  %v389_v17 = vmul.f32 %v1454_v0, %v1034_v8 }
  0x12   : > { %v390_v18 = vmul.f32 %v1454_v0, %v1037_v10  ;;  %v391_v19 = vmul.f32 %v1454_v0, %v1038_v11  ;;  %v392_v20 = vmul.f32 %v1454_v0, %v1041_v12  ;;  %v393_v21 = vmul.f32 %v1454_v0, %v1042_v13 }
  0x13   : > { %v422_v22 = vadd.f32 %v1462_v6, %v386_v14  ;;  %v423_v23 = vadd.f32 %v1462_v6, %v387_v15  ;;  %v424_v24 = vadd.f32 %v1462_v6, %v388_v16  ;;  %v425_v25 = vadd.f32 %v1462_v6, %v389_v17 }
  0x14   : > { %v426_v26 = vadd.f32 %v1462_v6, %v390_v18  ;;  %v427_v27 = vadd.f32 %v1462_v6, %v391_v19  ;;  %v428_v28 = vadd.f32 %v1462_v6, %v392_v20  ;;  %v429_v29 = vadd.f32 %v1462_v6, %v393_v21  ;;  %v1322_v20 = vld [vmem:[%s1449_s30 + $0x40] sm:$0xff]  }
  0x15   : > { %vm454_vm0 = vcmp.gt.f32.partialorder %v422_v22, 0.0  ;;  %vm455_vm1 = vcmp.gt.f32.partialorder %v423_v23, 0.0  ;;  %v486_v30 = vmul.f32 0.1, %v422_v22  ;;  %v487_v31 = vmul.f32 0.1, %v423_v23 }
  0x16   : > { %vm456_vm2 = vcmp.gt.f32.partialorder %v424_v24, 0.0  ;;  %vm457_vm3 = vcmp.gt.f32.partialorder %v425_v25, 0.0  ;;  %v488_v32 = vmul.f32 0.1, %v424_v24  ;;  %v489_v33 = vmul.f32 0.1, %v425_v25 }
  0x17   : > { %v518_v34 = vsel %vm454_vm0, %v422_v22, %v486_v30  ;;  %v519_v35 = vsel %vm455_vm1, %v423_v23, %v487_v31  ;;  %vm458_vm4 = vcmp.gt.f32.partialorder %v426_v26, 0.0  ;;  %vm459_vm5 = vcmp.gt.f32.partialorder %v427_v27, 0.0 }
  0x18   : > { %v1094_v37 = vpack.c.bf16 %v519_v35, %v518_v34  ;;  %v520_v38 = vsel %vm456_vm2, %v424_v24, %v488_v32  ;;  %v521_v39 = vsel %vm457_vm3, %v425_v25, %v489_v33  ;;  %v490_v40 = vmul.f32 0.1, %v426_v26  ;;  %v1323_v24 = vld [vmem:[%s1449_s30 + $0x48] sm:$0xff]  }
  0x19   : > { %v1099_v42 = vpack.c.bf16 %v521_v39, %v520_v38  ;;  %v491_v43 = vmul.f32 0.1, %v427_v27  ;;  %vm460_vm6 = vcmp.gt.f32.partialorder %v428_v28, 0.0  ;;  %vm461_vm7 = vcmp.gt.f32.partialorder %v429_v29, 0.0 }
  0x1a   : > { %1095 = vst [vmem:[%s1485_s14] sm:$0xff] %v1094_v37   ;;  %v522_v44 = vsel %vm458_vm4, %v426_v26, %v490_v40  ;;  %v492_v45 = vmul.f32 0.1, %v428_v28  ;;  %v493_v46 = vmul.f32 0.1, %v429_v29  ;;  %v1045_v47 = vunpack.c.l.bf16 %v1318_v36 }
  0x1b   : > { %1330 = vst [vmem:[%s1485_s14 + $0x8] sm:$0xff] %v1099_v42   ;;  %v523_v48 = vsel %vm459_vm5, %v427_v27, %v491_v43  ;;  %v1046_v49 = vunpack.c.h.bf16 %v1318_v36  ;;  %v1049_v50 = vunpack.c.l.bf16 %v1319_v41  ;;  %v1050_v51 = vunpack.c.h.bf16 %v1319_v41  ;;  %v1324_v36 = vld [vmem:[%s1449_s30 + $0x50] sm:$0xff]  }
  0x1c   : > { %v1104_v54 = vpack.c.bf16 %v523_v48, %v522_v44  ;;  %v524_v55 = vsel %vm460_vm6, %v428_v28, %v492_v45  ;;  %v525_v56 = vsel %vm461_vm7, %v429_v29, %v493_v46  ;;  %v394_v57 = vmul.f32 %v1454_v0, %v1045_v47 }
  0x1d   : > { %v1109_v58 = vpack.c.bf16 %v525_v56, %v524_v55  ;;  %v395_v59 = vmul.f32 %v1454_v0, %v1046_v49  ;;  %v396_v60 = vmul.f32 %v1454_v0, %v1049_v50  ;;  %v397_v61 = vmul.f32 %v1454_v0, %v1050_v51 }
  0x1e   : > { %1331 = vst [vmem:[%s1485_s14 + $0x10] sm:$0xff] %v1104_v54   ;;  %v430_v62 = vadd.f32 %v1462_v6, %v394_v57  ;;  %v1053_v63 = vunpack.c.l.bf16 %v1320_v52  ;;  %v1054_v1 = vunpack.c.h.bf16 %v1320_v52  ;;  %v1057_v2 = vunpack.c.l.bf16 %v1321_v53 }
  0x1f   : > { %1332 = vst [vmem:[%s1485_s14 + $0x18] sm:$0xff] %v1109_v58   ;;  %v431_v3 = vadd.f32 %v1462_v6, %v395_v59  ;;  %v432_v4 = vadd.f32 %v1462_v6, %v396_v60  ;;  %v433_v5 = vadd.f32 %v1462_v6, %v397_v61  ;;  %v1058_v7 = vunpack.c.h.bf16 %v1321_v53  ;;  %v1325_v59 = vld [vmem:[%s1449_s30 + $0x58] sm:$0xff]  }
  0x20   : > { %vm462_vm8 = vcmp.gt.f32.partialorder %v430_v62, 0.0  ;;  %v494_v8 = vmul.f32 0.1, %v430_v62  ;;  %v398_v9 = vmul.f32 %v1454_v0, %v1053_v63  ;;  %v399_v10 = vmul.f32 %v1454_v0, %v1054_v1  ;;  %v1326_v1 = vld [vmem:[%s1449_s30 + $0x60] sm:$0xff]  }
  0x21   : > { %vm463_vm9 = vcmp.gt.f32.partialorder %v431_v3, 0.0  ;;  %v495_v11 = vmul.f32 0.1, %v431_v3  ;;  %vm464_vm10 = vcmp.gt.f32.partialorder %v432_v4, 0.0  ;;  %vm465_vm11 = vcmp.gt.f32.partialorder %v433_v5, 0.0 }
  0x22   : > { %v526_v12 = vsel %vm462_vm8, %v430_v62, %v494_v8  ;;  %v496_v13 = vmul.f32 0.1, %v432_v4  ;;  %v497_v14 = vmul.f32 0.1, %v433_v5  ;;  %v434_v15 = vadd.f32 %v1462_v6, %v398_v9 }
  0x23   : > { %v527_v16 = vsel %vm463_vm9, %v431_v3, %v495_v11  ;;  %v435_v17 = vadd.f32 %v1462_v6, %v399_v10  ;;  %v400_v18 = vmul.f32 %v1454_v0, %v1057_v2  ;;  %v401_v19 = vmul.f32 %v1454_v0, %v1058_v7 }
  0x24   : > { %v1114_v21 = vpack.c.bf16 %v527_v16, %v526_v12  ;;  %v528_v22 = vsel %vm464_vm10, %v432_v4, %v496_v13  ;;  %v529_v23 = vsel %vm465_vm11, %v433_v5, %v497_v14  ;;  %vm466_vm12 = vcmp.gt.f32.partialorder %v434_v15, 0.0  ;;  %v1327_v5 = vld [vmem:[%s1449_s30 + $0x68] sm:$0xff]   ;;  %v1328_v14 = vld [vmem:[%s1449_s30 + $0x70] sm:$0xff]  }
  0x25   : > { %v1119_v25 = vpack.c.bf16 %v529_v23, %v528_v22  ;;  %vm467_vm13 = vcmp.gt.f32.partialorder %v435_v17, 0.0  ;;  %v498_v26 = vmul.f32 0.1, %v434_v15  ;;  %v499_v27 = vmul.f32 0.1, %v435_v17 }
  0x26   : > { %1333 = vst [vmem:[%s1485_s14 + $0x20] sm:$0xff] %v1114_v21   ;;  %v436_v28 = vadd.f32 %v1462_v6, %v400_v18  ;;  %v437_v29 = vadd.f32 %v1462_v6, %v401_v19  ;;  %v1061_v30 = vunpack.c.l.bf16 %v1322_v20  ;;  %v1062_v31 = vunpack.c.h.bf16 %v1322_v20 }
  0x27   : > { %1334 = vst [vmem:[%s1485_s14 + $0x28] sm:$0xff] %v1119_v25   ;;  %v530_v32 = vsel %vm466_vm12, %v434_v15, %v498_v26  ;;  %v531_v33 = vsel %vm467_vm13, %v435_v17, %v499_v27  ;;  %v1065_v34 = vunpack.c.l.bf16 %v1323_v24  ;;  %v1066_v35 = vunpack.c.h.bf16 %v1323_v24 }
  0x28   : > { %v1124_v37 = vpack.c.bf16 %v531_v33, %v530_v32  ;;  %vm468_vm14 = vcmp.gt.f32.partialorder %v436_v28, 0.0  ;;  %vm469_vm15 = vcmp.gt.f32.partialorder %v437_v29, 0.0  ;;  %v500_v38 = vmul.f32 0.1, %v436_v28 }
  0x29   : > { %v501_v39 = vmul.f32 0.1, %v437_v29  ;;  %v402_v40 = vmul.f32 %v1454_v0, %v1061_v30  ;;  %v403_v41 = vmul.f32 %v1454_v0, %v1062_v31  ;;  %v404_v42 = vmul.f32 %v1454_v0, %v1065_v34 }
  0x2a   : > { %1335 = vst [vmem:[%s1485_s14 + $0x30] sm:$0xff] %v1124_v37   ;;  %v532_v43 = vsel %vm468_vm14, %v436_v28, %v500_v38  ;;  %v405_v44 = vmul.f32 %v1454_v0, %v1066_v35  ;;  %v1069_v45 = vunpack.c.l.bf16 %v1324_v36  ;;  %v1070_v46 = vunpack.c.h.bf16 %v1324_v36 }
  0x2b   : > { %v533_v47 = vsel %vm469_vm15, %v437_v29, %v501_v39  ;;  %v438_v48 = vadd.f32 %v1462_v6, %v402_v40  ;;  %v439_v49 = vadd.f32 %v1462_v6, %v403_v41  ;;  %v440_v50 = vadd.f32 %v1462_v6, %v404_v42  ;;  %v1329_v42 = vld [vmem:[%s1449_s30 + $0x78] sm:$0xff]  }
  0x2c   : > { %v1129_v51 = vpack.c.bf16 %v533_v47, %v532_v43  ;;  %v441_v52 = vadd.f32 %v1462_v6, %v405_v44  ;;  %v406_v53 = vmul.f32 %v1454_v0, %v1069_v45  ;;  %v407_v54 = vmul.f32 %v1454_v0, %v1070_v46  ;;  %v1172_v43 = vld [vmem:[%s1551_s17] sm:$0xff]  }
  0x2d   : > { %vm470_vm0 = vcmp.gt.f32.partialorder %v438_v48, 0.0  ;;  %vm471_vm1 = vcmp.gt.f32.partialorder %v439_v49, 0.0  ;;  %v502_v55 = vmul.f32 0.1, %v438_v48  ;;  %v503_v56 = vmul.f32 0.1, %v439_v49 }
  0x2e   : > { %1336 = vst [vmem:[%s1485_s14 + $0x38] sm:$0xff] %v1129_v51   ;;  %vm472_vm2 = vcmp.gt.f32.partialorder %v440_v50, 0.0  ;;  %vm473_vm3 = vcmp.gt.f32.partialorder %v441_v52, 0.0  ;;  %v504_v57 = vmul.f32 0.1, %v440_v50  ;;  %v442_v58 = vadd.f32 %v1462_v6, %v406_v53 }
  0x2f   : > { %v534_v60 = vsel %vm470_vm0, %v438_v48, %v502_v55  ;;  %v535_v61 = vsel %vm471_vm1, %v439_v49, %v503_v56  ;;  %v505_v62 = vmul.f32 0.1, %v441_v52  ;;  %v443_v63 = vadd.f32 %v1462_v6, %v407_v54  ;;  %v1561_v47 = vld [vmem:[%s1689_s4] ss:$0 sm:$0xff] }
  0x30   : > { %v1134_v2 = vpack.c.bf16 %v535_v61, %v534_v60  ;;  %v536_v3 = vsel %vm472_vm2, %v440_v50, %v504_v57  ;;  %vm474_vm4 = vcmp.gt.f32.partialorder %v442_v58, 0.0  ;;  %v506_v4 = vmul.f32 0.1, %v442_v58  ;;  %v1570_v57 = vld [vmem:[%s1690_s5] ss:$0 sm:$0xff] }
  0x31   : > { %v537_v7 = vsel %vm473_vm3, %v441_v52, %v505_v62  ;;  %vm475_vm5 = vcmp.gt.f32.partialorder %v443_v63, 0.0  ;;  %v507_v8 = vmul.f32 0.1, %v443_v63  ;;  %v1073_v9 = vunpack.c.l.bf16 %v1325_v59  ;;  %v1345_v52 = vld [vmem:[%s1551_s17 + $0x8] sm:$0xff]  }
  0x32   : > { %1337 = vst [vmem:[%s1485_s14 + $0x40] sm:$0xff] %v1134_v2   ;;  %v1139_v10 = vpack.c.bf16 %v537_v7, %v536_v3  ;;  %v538_v11 = vsel %vm474_vm4, %v442_v58, %v506_v4  ;;  %v1074_v12 = vunpack.c.h.bf16 %v1325_v59  ;;  %v1077_v13 = vunpack.c.l.bf16 %v1326_v1 }
  0x33   : > { %v539_v15 = vsel %vm475_vm5, %v443_v63, %v507_v8  ;;  %v408_v16 = vmul.f32 %v1454_v0, %v1073_v9  ;;  %v1078_v17 = vunpack.c.h.bf16 %v1326_v1  ;;  %v1081_v18 = vunpack.c.l.bf16 %v1327_v5 }
  0x34   : > { %1338 = vst [vmem:[%s1485_s14 + $0x48] sm:$0xff] %v1139_v10   ;;  %v1144_v19 = vpack.c.bf16 %v539_v15, %v538_v11  ;;  %v409_v20 = vmul.f32 %v1454_v0, %v1074_v12  ;;  %v410_v21 = vmul.f32 %v1454_v0, %v1077_v13  ;;  %v1082_v22 = vunpack.c.h.bf16 %v1327_v5  ;;  %v1346_v15 = vld [vmem:[%s1551_s17 + $0x10] sm:$0xff]  }
  0x35   : > { %v444_v23 = vadd.f32 %v1462_v6, %v408_v16  ;;  %v411_v24 = vmul.f32 %v1454_v0, %v1078_v17  ;;  %v412_v25 = vmul.f32 %v1454_v0, %v1081_v18  ;;  %v1085_v26 = vunpack.c.l.bf16 %v1328_v14 }
  0x36   : > { %1339 = vst [vmem:[%s1485_s14 + $0x50] sm:$0xff] %v1144_v19   ;;  %v445_v27 = vadd.f32 %v1462_v6, %v409_v20  ;;  %v446_v28 = vadd.f32 %v1462_v6, %v410_v21  ;;  %v413_v29 = vmul.f32 %v1454_v0, %v1082_v22  ;;  %v1086_v30 = vunpack.c.h.bf16 %v1328_v14 }
  0x37   : > { %vm476_vm6 = vcmp.gt.f32.partialorder %v444_v23, 0.0  ;;  %v508_v31 = vmul.f32 0.1, %v444_v23  ;;  %v447_v32 = vadd.f32 %v1462_v6, %v411_v24  ;;  %v448_v33 = vadd.f32 %v1462_v6, %v412_v25  ;;  %v1347_v25 = vld [vmem:[%s1551_s17 + $0x18] sm:$0xff]  }
  0x38   : > { %vm477_vm7 = vcmp.gt.f32.partialorder %v445_v27, 0.0  ;;  %v509_v34 = vmul.f32 0.1, %v445_v27  ;;  %vm478_vm8 = vcmp.gt.f32.partialorder %v446_v28, 0.0  ;;  %v510_v35 = vmul.f32 0.1, %v446_v28 }
  0x39   : > { %v540_v36 = vsel %vm476_vm6, %v444_v23, %v508_v31  ;;  %vm479_vm9 = vcmp.gt.f32.partialorder %v447_v32, 0.0  ;;  %v511_v37 = vmul.f32 0.1, %v447_v32  ;;  %v449_v38 = vadd.f32 %v1462_v6, %v413_v29 }
  0x3a   : > { %v541_v39 = vsel %vm477_vm7, %v445_v27, %v509_v34  ;;  %v542_v40 = vsel %vm478_vm8, %v446_v28, %v510_v35  ;;  %vm480_vm10 = vcmp.gt.f32.partialorder %v448_v33, 0.0  ;;  %v512_v41 = vmul.f32 0.1, %v448_v33 }
  0x3b   : > { %v1149_v44 = vpack.c.bf16 %v541_v39, %v540_v36  ;;  %v543_v45 = vsel %vm479_vm9, %v447_v32, %v511_v37  ;;  %vm481_vm11 = vcmp.gt.f32.partialorder %v449_v38, 0.0  ;;  %v513_v46 = vmul.f32 0.1, %v449_v38 }
  0x3c   : > { %v1154_v48 = vpack.c.bf16 %v543_v45, %v542_v40  ;;  %v544_v49 = vsel %vm480_vm10, %v448_v33, %v512_v41  ;;  %v414_v50 = vmul.f32 %v1454_v0, %v1085_v26  ;;  %v415_v51 = vmul.f32 %v1454_v0, %v1086_v30  ;;  %v1348_v30 = vld [vmem:[%s1551_s17 + $0x20] sm:$0xff]   ;;  %v1349_v45 = vld [vmem:[%s1551_s17 + $0x28] sm:$0xff]  }
  0x3d   : > { %1340 = vst [vmem:[%s1485_s14 + $0x58] sm:$0xff] %v1149_v44   ;;  %v545_v53 = vsel %vm481_vm11, %v449_v38, %v513_v46  ;;  %v1089_v54 = vunpack.c.l.bf16 %v1329_v42  ;;  %v1090_v55 = vunpack.c.h.bf16 %v1329_v42  ;;  %v1173_v56 = vunpack.c.l.bf16 %v1172_v43 }
  0x3e   : > { %1341 = vst [vmem:[%s1485_s14 + $0x60] sm:$0xff] %v1154_v48   ;;  %v1159_v58 = vpack.c.bf16 %v545_v53, %v544_v49  ;;  %v450_v59 = vadd.f32 %v1462_v6, %v414_v50  ;;  %v451_v60 = vadd.f32 %v1462_v6, %v415_v51  ;;  %v1174_v61 = vunpack.c.h.bf16 %v1172_v43 }
  0x3f   : > { %v416_v62 = vmul.f32 %v1454_v0, %v1089_v54  ;;  %v417_v63 = vmul.f32 %v1454_v0, %v1090_v55  ;;  %v682_v1 = vmul.f32 %v1561_v47, %v1173_v56  ;;  %v1177_v2 = vunpack.c.l.bf16 %v1345_v52 }
  0x40   : > { %1342 = vst [vmem:[%s1485_s14 + $0x68] sm:$0xff] %v1159_v58   ;;  %vm482_vm12 = vcmp.gt.f32.partialorder %v450_v59, 0.0  ;;  %vm483_vm13 = vcmp.gt.f32.partialorder %v451_v60, 0.0  ;;  %v514_v3 = vmul.f32 0.1, %v450_v59  ;;  %v683_v4 = vmul.f32 %v1561_v47, %v1174_v61 }
  0x41   : > { %v515_v5 = vmul.f32 0.1, %v451_v60  ;;  %v452_v7 = vadd.f32 %v1462_v6, %v416_v62  ;;  %v453_v8 = vadd.f32 %v1462_v6, %v417_v63  ;;  %v718_v9 = vadd.f32 %v1570_v57, %v682_v1  ;;  %v1350_v1 = vld [vmem:[%s1551_s17 + $0x30] sm:$0xff]  }
  0x42   : > { %v546_v10 = vsel %vm482_vm12, %v450_v59, %v514_v3  ;;  %v719_v0 = vadd.f32 %v1570_v57, %v683_v4  ;;  %v1178_v11 = vunpack.c.h.bf16 %v1345_v52  ;;  %v684_v12 = vmul.f32 %v1561_v47, %v1177_v2 }
  0x43   : > { %v547_v13 = vsel %vm483_vm13, %v451_v60, %v515_v5  ;;  %vm484_vm14 = vcmp.gt.f32.partialorder %v452_v7, 0.0  ;;  %vm485_vm15 = vcmp.gt.f32.partialorder %v453_v8, 0.0  ;;  %v516_v14 = vmul.f32 0.1, %v452_v7  ;;  %v1351_v5 = vld [vmem:[%s1551_s17 + $0x38] sm:$0xff]  }
  0x44   : > { %v1164_v16 = vpack.c.bf16 %v547_v13, %v546_v10  ;;  %v517_v17 = vmul.f32 0.1, %v453_v8  ;;  %vm750_vm0 = vcmp.gt.f32.partialorder %v718_v9, 0.0  ;;  %vm751_vm1 = vcmp.gt.f32.partialorder %v719_v0, 0.0 }
  0x45   : > { %v548_v6 = vsel %vm484_vm14, %v452_v7, %v516_v14  ;;  %v782_v18 = vmul.f32 0.1, %v718_v9  ;;  %v783_v19 = vmul.f32 0.1, %v719_v0  ;;  %v685_v20 = vmul.f32 %v1561_v47, %v1178_v11 }
  0x46   : > { %1343 = vst [vmem:[%s1485_s14 + $0x70] sm:$0xff] %v1164_v16   ;;  %v549_v21 = vsel %vm485_vm15, %v453_v8, %v517_v17  ;;  %v720_v22 = vadd.f32 %v1570_v57, %v684_v12  ;;  %v1181_v23 = vunpack.c.l.bf16 %v1346_v15  ;;  %v1182_v24 = vunpack.c.h.bf16 %v1346_v15 }
  0x47   : > { %v1169_v26 = vpack.c.bf16 %v549_v21, %v548_v6  ;;  %v814_v27 = vsel %vm750_vm0, %v718_v9, %v782_v18  ;;  %v815_v28 = vsel %vm751_vm1, %v719_v0, %v783_v19  ;;  %v721_v29 = vadd.f32 %v1570_v57, %v685_v20  ;;  %v1352_v20 = vld [vmem:[%s1551_s17 + $0x40] sm:$0xff]  }
  0x48   : > { %v1238_v31 = vpack.c.bf16 %v815_v28, %v814_v27  ;;  %vm752_vm2 = vcmp.gt.f32.partialorder %v720_v22, 0.0  ;;  %v784_v32 = vmul.f32 0.1, %v720_v22  ;;  %v686_v33 = vmul.f32 %v1561_v47, %v1181_v23 }
  0x49   : > { %1344 = vst [vmem:[%s1485_s14 + $0x78] sm:$0xff] %v1169_v26   ;;  %vm753_vm3 = vcmp.gt.f32.partialorder %v721_v29, 0.0  ;;  %v785_v34 = vmul.f32 0.1, %v721_v29  ;;  %v687_v35 = vmul.f32 %v1561_v47, %v1182_v24  ;;  %v1185_v36 = vunpack.c.l.bf16 %v1347_v25 }
  0x4a   : > { %1239 = vst [vmem:[%s1594_s25] sm:$0xff] %v1238_v31   ;;  %v816_v37 = vsel %vm752_vm2, %v720_v22, %v784_v32  ;;  %v722_v38 = vadd.f32 %v1570_v57, %v686_v33  ;;  %v1186_v39 = vunpack.c.h.bf16 %v1347_v25  ;;  %v1189_v40 = vunpack.c.l.bf16 %v1348_v30 }
  0x4b   : > { %v817_v41 = vsel %vm753_vm3, %v721_v29, %v785_v34  ;;  %v723_v42 = vadd.f32 %v1570_v57, %v687_v35  ;;  %v688_v43 = vmul.f32 %v1561_v47, %v1185_v36  ;;  %v1190_v44 = vunpack.c.h.bf16 %v1348_v30  ;;  %v1353_v34 = vld [vmem:[%s1551_s17 + $0x48] sm:$0xff]  }
  0x4c   : > { %v1243_v46 = vpack.c.bf16 %v817_v41, %v816_v37  ;;  %vm754_vm4 = vcmp.gt.f32.partialorder %v722_v38, 0.0  ;;  %v786_v48 = vmul.f32 0.1, %v722_v38  ;;  %v689_v49 = vmul.f32 %v1561_v47, %v1186_v39 }
  0x4d   : > { %vm755_vm5 = vcmp.gt.f32.partialorder %v723_v42, 0.0  ;;  %v787_v50 = vmul.f32 0.1, %v723_v42  ;;  %v724_v51 = vadd.f32 %v1570_v57, %v688_v43  ;;  %v690_v52 = vmul.f32 %v1561_v47, %v1189_v40 }
  0x4e   : > { %1360 = vst [vmem:[%s1594_s25 + $0x8] sm:$0xff] %v1243_v46   ;;  %v818_v53 = vsel %vm754_vm4, %v722_v38, %v786_v48  ;;  %v725_v54 = vadd.f32 %v1570_v57, %v689_v49  ;;  %v691_v55 = vmul.f32 %v1561_v47, %v1190_v44  ;;  %v1193_v56 = vunpack.c.l.bf16 %v1349_v45  ;;  %v1354_v44 = vld [vmem:[%s1551_s17 + $0x50] sm:$0xff]  }
  0x4f   : > { %v819_v58 = vsel %vm755_vm5, %v723_v42, %v787_v50  ;;  %vm756_vm6 = vcmp.gt.f32.partialorder %v724_v51, 0.0  ;;  %v788_v59 = vmul.f32 0.1, %v724_v51  ;;  %v726_v60 = vadd.f32 %v1570_v57, %v690_v52 }
  0x50   : > { %v1248_v61 = vpack.c.bf16 %v819_v58, %v818_v53  ;;  %vm757_vm7 = vcmp.gt.f32.partialorder %v725_v54, 0.0  ;;  %v789_v62 = vmul.f32 0.1, %v725_v54  ;;  %v727_v63 = vadd.f32 %v1570_v57, %v691_v55 }
  0x51   : > { %v820_v2 = vsel %vm756_vm6, %v724_v51, %v788_v59  ;;  %vm758_vm8 = vcmp.gt.f32.partialorder %v726_v60, 0.0  ;;  %v790_v3 = vmul.f32 0.1, %v726_v60  ;;  %v1194_v4 = vunpack.c.h.bf16 %v1349_v45  ;;  %v1355_v45 = vld [vmem:[%s1551_s17 + $0x58] sm:$0xff]  }
  0x52   : > { %1361 = vst [vmem:[%s1594_s25 + $0x10] sm:$0xff] %v1248_v61   ;;  %v821_v7 = vsel %vm757_vm7, %v725_v54, %v789_v62  ;;  %vm759_vm9 = vcmp.gt.f32.partialorder %v727_v63, 0.0  ;;  %v791_v8 = vmul.f32 0.1, %v727_v63  ;;  %v692_v9 = vmul.f32 %v1561_v47, %v1193_v56 }
  0x53   : > { %v1253_v10 = vpack.c.bf16 %v821_v7, %v820_v2  ;;  %v822_v0 = vsel %vm758_vm8, %v726_v60, %v790_v3  ;;  %v693_v11 = vmul.f32 %v1561_v47, %v1194_v4  ;;  %v1197_v12 = vunpack.c.l.bf16 %v1350_v1 }
  0x54   : > { %v823_v13 = vsel %vm759_vm9, %v727_v63, %v791_v8  ;;  %v728_v14 = vadd.f32 %v1570_v57, %v692_v9  ;;  %v1198_v15 = vunpack.c.h.bf16 %v1350_v1  ;;  %v1201_v16 = vunpack.c.l.bf16 %v1351_v5 }
  0x55   : > { %1362 = vst [vmem:[%s1594_s25 + $0x18] sm:$0xff] %v1253_v10   ;;  %v1258_v17 = vpack.c.bf16 %v823_v13, %v822_v0  ;;  %v729_v6 = vadd.f32 %v1570_v57, %v693_v11  ;;  %v694_v18 = vmul.f32 %v1561_v47, %v1197_v12  ;;  %v1202_v19 = vunpack.c.h.bf16 %v1351_v5  ;;  %v1356_v13 = vld [vmem:[%s1551_s17 + $0x60] sm:$0xff]  }
  0x56   : > { %vm760_vm10 = vcmp.gt.f32.partialorder %v728_v14, 0.0  ;;  %v792_v21 = vmul.f32 0.1, %v728_v14  ;;  %v695_v22 = vmul.f32 %v1561_v47, %v1198_v15  ;;  %v696_v23 = vmul.f32 %v1561_v47, %v1201_v16 }
  0x57   : > { %1363 = vst [vmem:[%s1594_s25 + $0x20] sm:$0xff] %v1258_v17   ;;  %vm761_vm11 = vcmp.gt.f32.partialorder %v729_v6, 0.0  ;;  %v793_v24 = vmul.f32 0.1, %v729_v6  ;;  %v730_v25 = vadd.f32 %v1570_v57, %v694_v18  ;;  %v697_v26 = vmul.f32 %v1561_v47, %v1202_v19  ;;  %v1357_v17 = vld [vmem:[%s1551_s17 + $0x68] sm:$0xff]  }
  0x58   : > { %v824_v27 = vsel %vm760_vm10, %v728_v14, %v792_v21  ;;  %v731_v28 = vadd.f32 %v1570_v57, %v695_v22  ;;  %v732_v29 = vadd.f32 %v1570_v57, %v696_v23  ;;  %v1205_v30 = vunpack.c.l.bf16 %v1352_v20 }
  0x59   : > { %v825_v31 = vsel %vm761_vm11, %v729_v6, %v793_v24  ;;  %vm762_vm12 = vcmp.gt.f32.partialorder %v730_v25, 0.0  ;;  %v794_v32 = vmul.f32 0.1, %v730_v25  ;;  %v733_v33 = vadd.f32 %v1570_v57, %v697_v26 }
  0x5a   : > { %v1263_v35 = vpack.c.bf16 %v825_v31, %v824_v27  ;;  %vm763_vm13 = vcmp.gt.f32.partialorder %v731_v28, 0.0  ;;  %v795_v36 = vmul.f32 0.1, %v731_v28  ;;  %vm764_vm14 = vcmp.gt.f32.partialorder %v732_v29, 0.0 }
  0x5b   : > { %v826_v37 = vsel %vm762_vm12, %v730_v25, %v794_v32  ;;  %vm765_vm15 = vcmp.gt.f32.partialorder %v733_v33, 0.0  ;;  %v796_v38 = vmul.f32 0.1, %v732_v29  ;;  %v797_v39 = vmul.f32 0.1, %v733_v33 }
  0x5c   : > { %1364 = vst [vmem:[%s1594_s25 + $0x28] sm:$0xff] %v1263_v35   ;;  %v827_v40 = vsel %vm763_vm13, %v731_v28, %v795_v36  ;;  %v1206_v41 = vunpack.c.h.bf16 %v1352_v20  ;;  %v698_v42 = vmul.f32 %v1561_v47, %v1205_v30  ;;  %v1209_v43 = vunpack.c.l.bf16 %v1353_v34  ;;  %v1358_v28 = vld [vmem:[%s1551_s17 + $0x70] sm:$0xff]  }
  0x5d   : > { %v1268_v46 = vpack.c.bf16 %v827_v40, %v826_v37  ;;  %v828_v48 = vsel %vm764_vm14, %v732_v29, %v796_v38  ;;  %v829_v49 = vsel %vm765_vm15, %v733_v33, %v797_v39  ;;  %v1210_v50 = vunpack.c.h.bf16 %v1353_v34 }
  0x5e   : > { %v1273_v51 = vpack.c.bf16 %v829_v49, %v828_v48  ;;  %v699_v52 = vmul.f32 %v1561_v47, %v1206_v41  ;;  %v734_v53 = vadd.f32 %v1570_v57, %v698_v42  ;;  %v700_v54 = vmul.f32 %v1561_v47, %v1209_v43 }
  0x5f   : > { %1365 = vst [vmem:[%s1594_s25 + $0x30] sm:$0xff] %v1268_v46   ;;  %v701_v55 = vmul.f32 %v1561_v47, %v1210_v50  ;;  %v1213_v56 = vunpack.c.l.bf16 %v1354_v44  ;;  %v1214_v58 = vunpack.c.h.bf16 %v1354_v44  ;;  %v1217_v59 = vunpack.c.l.bf16 %v1355_v45 }
  0x60   : > { %1366 = vst [vmem:[%s1594_s25 + $0x38] sm:$0xff] %v1273_v51   ;;  %v735_v60 = vadd.f32 %v1570_v57, %v699_v52  ;;  %vm766_vm0 = vcmp.gt.f32.partialorder %v734_v53, 0.0  ;;  %v798_v61 = vmul.f32 0.1, %v734_v53  ;;  %v736_v62 = vadd.f32 %v1570_v57, %v700_v54  ;;  %v1359_v52 = vld [vmem:[%s1551_s17 + $0x78] sm:$0xff]  }
  0x61   : > { %v737_v63 = vadd.f32 %v1570_v57, %v701_v55  ;;  %v702_v1 = vmul.f32 %v1561_v47, %v1213_v56  ;;  %v703_v2 = vmul.f32 %v1561_v47, %v1214_v58  ;;  %v1218_v3 = vunpack.c.h.bf16 %v1355_v45 }
  0x62   : > { %vm767_vm1 = vcmp.gt.f32.partialorder %v735_v60, 0.0  ;;  %v799_v4 = vmul.f32 0.1, %v735_v60  ;;  %v830_v5 = vsel %vm766_vm0, %v734_v53, %v798_v61  ;;  %vm768_vm2 = vcmp.gt.f32.partialorder %v736_v62, 0.0 }
  0x63   : > { %vm769_vm3 = vcmp.gt.f32.partialorder %v737_v63, 0.0  ;;  %v800_v7 = vmul.f32 0.1, %v736_v62  ;;  %v801_v8 = vmul.f32 0.1, %v737_v63  ;;  %v738_v9 = vadd.f32 %v1570_v57, %v702_v1 }
  0x64   : > { %v831_v10 = vsel %vm767_vm1, %v735_v60, %v799_v4  ;;  %v739_v0 = vadd.f32 %v1570_v57, %v703_v2  ;;  %v704_v11 = vmul.f32 %v1561_v47, %v1217_v59  ;;  %v705_v12 = vmul.f32 %v1561_v47, %v1218_v3 }
  0x65   : > { %v1278_v14 = vpack.c.bf16 %v831_v10, %v830_v5  ;;  %v832_v15 = vsel %vm768_vm2, %v736_v62, %v800_v7  ;;  %v833_v16 = vsel %vm769_vm3, %v737_v63, %v801_v8  ;;  %vm770_vm4 = vcmp.gt.f32.partialorder %v738_v9, 0.0 }
  0x66   : > { %v1283_v6 = vpack.c.bf16 %v833_v16, %v832_v15  ;;  %vm771_vm5 = vcmp.gt.f32.partialorder %v739_v0, 0.0  ;;  %v802_v18 = vmul.f32 0.1, %v738_v9  ;;  %v803_v19 = vmul.f32 0.1, %v739_v0 }
  0x67   : > { %1367 = vst [vmem:[%s1594_s25 + $0x40] sm:$0xff] %v1278_v14   ;;  %v740_v20 = vadd.f32 %v1570_v57, %v704_v11  ;;  %v741_v21 = vadd.f32 %v1570_v57, %v705_v12  ;;  %v1221_v22 = vunpack.c.l.bf16 %v1356_v13  ;;  %v1222_v23 = vunpack.c.h.bf16 %v1356_v13 }
  0x68   : > { %1368 = vst [vmem:[%s1594_s25 + $0x48] sm:$0xff] %v1283_v6   ;;  %v834_v24 = vsel %vm770_vm4, %v738_v9, %v802_v18  ;;  %v835_v25 = vsel %vm771_vm5, %v739_v0, %v803_v19  ;;  %v1225_v26 = vunpack.c.l.bf16 %v1357_v17  ;;  %v1226_v27 = vunpack.c.h.bf16 %v1357_v17 }
  0x69   : > { %v1288_v29 = vpack.c.bf16 %v835_v25, %v834_v24  ;;  %vm772_vm6 = vcmp.gt.f32.partialorder %v740_v20, 0.0  ;;  %vm773_vm7 = vcmp.gt.f32.partialorder %v741_v21, 0.0  ;;  %v804_v30 = vmul.f32 0.1, %v740_v20 }
  0x6a   : > { %v805_v31 = vmul.f32 0.1, %v741_v21  ;;  %v706_v32 = vmul.f32 %v1561_v47, %v1221_v22  ;;  %v707_v33 = vmul.f32 %v1561_v47, %v1222_v23  ;;  %v708_v34 = vmul.f32 %v1561_v47, %v1225_v26 }
  0x6b   : > { %1369 = vst [vmem:[%s1594_s25 + $0x50] sm:$0xff] %v1288_v29   ;;  %v836_v35 = vsel %vm772_vm6, %v740_v20, %v804_v30  ;;  %v709_v36 = vmul.f32 %v1561_v47, %v1226_v27  ;;  %v1229_v37 = vunpack.c.l.bf16 %v1358_v28  ;;  %v1230_v38 = vunpack.c.h.bf16 %v1358_v28 }
  0x6c   : > { %v837_v39 = vsel %vm773_vm7, %v741_v21, %v805_v31  ;;  %v742_v40 = vadd.f32 %v1570_v57, %v706_v32  ;;  %v743_v41 = vadd.f32 %v1570_v57, %v707_v33  ;;  %v744_v42 = vadd.f32 %v1570_v57, %v708_v34 }
  0x6d   : > { %v1293_v43 = vpack.c.bf16 %v837_v39, %v836_v35  ;;  %v745_v44 = vadd.f32 %v1570_v57, %v709_v36  ;;  %v710_v45 = vmul.f32 %v1561_v47, %v1229_v37  ;;  %v711_v46 = vmul.f32 %v1561_v47, %v1230_v38 }
  0x6e   : > { %vm774_vm8 = vcmp.gt.f32.partialorder %v742_v40, 0.0  ;;  %vm775_vm9 = vcmp.gt.f32.partialorder %v743_v41, 0.0  ;;  %v806_v48 = vmul.f32 0.1, %v742_v40  ;;  %v807_v49 = vmul.f32 0.1, %v743_v41 }
  0x6f   : > { %1370 = vst [vmem:[%s1594_s25 + $0x58] sm:$0xff] %v1293_v43   ;;  %vm776_vm10 = vcmp.gt.f32.partialorder %v744_v42, 0.0  ;;  %vm777_vm11 = vcmp.gt.f32.partialorder %v745_v44, 0.0  ;;  %v808_v50 = vmul.f32 0.1, %v744_v42  ;;  %v746_v51 = vadd.f32 %v1570_v57, %v710_v45 }
  0x70   : > { %v838_v53 = vsel %vm774_vm8, %v742_v40, %v806_v48  ;;  %v839_v54 = vsel %vm775_vm9, %v743_v41, %v807_v49  ;;  %v809_v55 = vmul.f32 0.1, %v745_v44  ;;  %v747_v56 = vadd.f32 %v1570_v57, %v711_v46 }
  0x71   : > { %v1298_v58 = vpack.c.bf16 %v839_v54, %v838_v53  ;;  %v840_v59 = vsel %vm776_vm10, %v744_v42, %v808_v50  ;;  %vm778_vm12 = vcmp.gt.f32.partialorder %v746_v51, 0.0  ;;  %v810_v60 = vmul.f32 0.1, %v746_v51 }
  0x72   : > { %v841_v61 = vsel %vm777_vm11, %v745_v44, %v809_v55  ;;  %vm779_vm13 = vcmp.gt.f32.partialorder %v747_v56, 0.0  ;;  %v811_v62 = vmul.f32 0.1, %v747_v56  ;;  %v1233_v63 = vunpack.c.l.bf16 %v1359_v52 }
  0x73   : > { %1371 = vst [vmem:[%s1594_s25 + $0x60] sm:$0xff] %v1298_v58   ;;  %v1303_v1 = vpack.c.bf16 %v841_v61, %v840_v59  ;;  %v842_v2 = vsel %vm778_vm12, %v746_v51, %v810_v60  ;;  %v1234_v3 = vunpack.c.h.bf16 %v1359_v52 }
  0x74   : > { %v843_v4 = vsel %vm779_vm13, %v747_v56, %v811_v62  ;;  %v712_v5 = vmul.f32 %v1561_v47, %v1233_v63 }
  0x75   : > { %1372 = vst [vmem:[%s1594_s25 + $0x68] sm:$0xff] %v1303_v1   ;;  %v1308_v7 = vpack.c.bf16 %v843_v4, %v842_v2  ;;  %v713_v8 = vmul.f32 %v1561_v47, %v1234_v3 }
  0x76   : > { %v748_v9 = vadd.f32 %v1570_v57, %v712_v5 }
  0x77   : > { %1373 = vst [vmem:[%s1594_s25 + $0x70] sm:$0xff] %v1308_v7   ;;  %v749_v10 = vadd.f32 %v1570_v57, %v713_v8 }
  0x78   : > { %vm780_vm14 = vcmp.gt.f32.partialorder %v748_v9, 0.0  ;;  %v812_v0 = vmul.f32 0.1, %v748_v9 }
  0x79   : > { %vm781_vm15 = vcmp.gt.f32.partialorder %v749_v10, 0.0  ;;  %v813_v11 = vmul.f32 0.1, %v749_v10 }
  0x7a   : > { %v844_v12 = vsel %vm780_vm14, %v748_v9, %v812_v0 }
  0x7b   : > { %v845_v13 = vsel %vm781_vm15, %v749_v10, %v813_v11 }
  0x7c   : > { %v1313_v14 = vpack.c.bf16 %v845_v13, %v844_v12 }
  0x7e   : > { %1374 = vst [vmem:[%s1594_s25 + $0x78] sm:$0xff] %v1313_v14  }
  0x7f PF: > { %s18_s24 = sadd.s32 1, %s1393_s24  }
  0x80   : > { %p15_p4 = scmp.ge.s32.totalorder %s18_s24, 4  }
  0x82   :  { %17 = sbr.rel (!%p15_p4) target bundleno = 1 (0x1), region = 89 }

// kernel: a_call__.7
= control target key start
LH: loop header
LB: loop body
LE: loop exit
PB: predicated region body
PF: predicated region fallthrough
CT: control target
= control target key end

     0   :  { %s865_s15 = smov 0   ;;  %s1037_s0 = inlined_call_operand.vmem [shape: bf16[512,128], index: 0, kind: input, shape index: {}]   ;;  %s1038_s1 = inlined_call_operand.vmem [shape: f32[1,128], index: 1, kind: input, shape index: {}]   ;;  %s1039_s2 = inlined_call_operand.vmem [shape: f32[1,128], index: 2, kind: input, shape index: {}]   ;;  %s1040_s3 = inlined_call_operand.vmem [shape: bf16[512,128], index: 3, kind: input, shape index: {}]   ;;  %s1041_s4 = inlined_call_operand.vmem [shape: f32[512,128], index: 4, kind: output, shape index: {}]  }
   0x1 LB: > { %s651_s16 = sadd.s32 4294967295, %s838_s15   ;;  %p655_p0 = scmp.ge.s32.totalorder %s838_s15, 1  ;;  %s838_s15 = sphi %s865_s15, %s14_s15  }
   0x2   : > { %p174_p1 = scmp.lt.s32.totalorder %s838_s15, 3 }
   0x4   : > { %p175_p2 = pnand %p655_p0, %p174_p1 }
   0x5   : > { %s656_s17 = sshll.u32 (!%p175_p2), %s651_s16, 5 }
   0x6   : > { %178 = sbr.rel (%p175_p2) target bundleno = 84 (0x54), region = 36  ;;  %p206_p3 = scmp.lt.s32.totalorder (!%p175_p2), %s656_s17, 63 }
   0xb   : > { %s1043_s17 = smov (!%p206_p3, %s656_s17), 63  ;;  %v889_v0 = vld [vmem:[%s1038_s1] ss:$0 sm:$0xff] }
   0xc   : > { %s657_s18 = sshll.u32 %s1043_s17, 2  ;;  %v894_v1 = vld [vmem:[%s1039_s2] ss:$0 sm:$0xff]  ;;  %s661_s29 = sshll.u32 %s1043_s17, 3 }
   0xd   : > { %s879_s21 = scalar_lea.vmem %s1037_s0, %s657_s18  ;;  %s884_s24 = scalar_lea.vmem %s1040_s3, %s657_s18 }
   0xe   : > { %v665_v2 = vld [vmem:[%s879_s21] sm:$0xff]   ;;  %v792_v4 = vld [vmem:[%s879_s21 + $0x8] sm:$0xff]   ;;  %v793_v9 = vld [vmem:[%s879_s21 + $0x10] sm:$0xff]   ;;  %s921_s6 = scalar_lea.vmem %s1041_s4, %s661_s29 }
   0xf   : > { %v729_v3 = vld [vmem:[%s884_s24] sm:$0xff]   ;;  %v666_v5 = vunpack.c.l.bf16 %v665_v2  ;;  %v667_v7 = vunpack.c.h.bf16 %v665_v2  ;;  %v807_v8 = vld [vmem:[%s884_s24 + $0x8] sm:$0xff]   ;;  %v902_v10 = vld [vmem:[%s884_s24 + $0x10] sm:$0xff]   ;;  %v670_v12 = vunpack.c.l.bf16 %v792_v4  ;;  %v671_v14 = vunpack.c.h.bf16 %v792_v4 }
  0x10   : > { %v730_v6 = vunpack.c.l.bf16 %v729_v3  ;;  %v731_v11 = vunpack.c.h.bf16 %v729_v3  ;;  %v734_v13 = vunpack.c.l.bf16 %v807_v8  ;;  %v735_v17 = vunpack.c.h.bf16 %v807_v8  ;;  %v794_v19 = vld [vmem:[%s879_s21 + $0x18] sm:$0xff]   ;;  %v795_v45 = vld [vmem:[%s879_s21 + $0x20] sm:$0xff]   ;;  %v796_v57 = vld [vmem:[%s879_s21 + $0x28] sm:$0xff]  }
  0x11   : > { %v291_v15 = vmul.f32 %v889_v0, %v666_v5  ;;  %v292_v16 = vmul.f32 %v889_v0, %v667_v7  ;;  %v674_v18 = vunpack.c.l.bf16 %v793_v9  ;;  %v293_v20 = vmul.f32 %v889_v0, %v670_v12  ;;  %v809_v44 = vld [vmem:[%s884_s24 + $0x18] sm:$0xff]   ;;  %v810_v52 = vld [vmem:[%s884_s24 + $0x20] sm:$0xff]  }
  0x12   : > { %v294_v21 = vmul.f32 %v889_v0, %v671_v14  ;;  %v738_v22 = vunpack.c.l.bf16 %v902_v10  ;;  %v675_v23 = vunpack.c.h.bf16 %v793_v9  ;;  %v739_v27 = vunpack.c.h.bf16 %v902_v10  ;;  %v811_v10 = vld [vmem:[%s884_s24 + $0x28] sm:$0xff]  }
  0x13   : > { %v327_v24 = vadd.f32 %v894_v1, %v291_v15  ;;  %v328_v25 = vadd.f32 %v894_v1, %v292_v16  ;;  %v295_v26 = vmul.f32 %v889_v0, %v674_v18  ;;  %v329_v28 = vadd.f32 %v894_v1, %v293_v20 }
  0x14   : > { %v330_v29 = vadd.f32 %v894_v1, %v294_v21  ;;  %v296_v30 = vmul.f32 %v889_v0, %v675_v23  ;;  %v678_v31 = vunpack.c.l.bf16 %v794_v19  ;;  %v679_v51 = vunpack.c.h.bf16 %v794_v19 }
  0x15   : > { %vm359_vm0 = vcmp.gt.f32.partialorder %v327_v24, 0.0  ;;  %v391_v32 = vmul.f32 0.1, %v327_v24  ;;  %vm360_vm1 = vcmp.gt.f32.partialorder %v328_v25, 0.0  ;;  %v392_v33 = vmul.f32 0.1, %v328_v25 }
  0x16   : > { %vm361_vm2 = vcmp.gt.f32.partialorder %v329_v28, 0.0  ;;  %v393_v34 = vmul.f32 0.1, %v329_v28  ;;  %vm362_vm3 = vcmp.gt.f32.partialorder %v330_v29, 0.0  ;;  %v394_v35 = vmul.f32 0.1, %v330_v29 }
  0x17   : > { %v423_v36 = vsel %vm359_vm0, %v327_v24, %v391_v32  ;;  %v424_v37 = vsel %vm360_vm1, %v328_v25, %v392_v33  ;;  %v331_v38 = vadd.f32 %v894_v1, %v295_v26  ;;  %v332_v39 = vadd.f32 %v894_v1, %v296_v30 }
  0x18   : > { %v519_v40 = vadd.f32 %v730_v6, %v423_v36  ;;  %v520_v41 = vadd.f32 %v731_v11, %v424_v37  ;;  %v425_v42 = vsel %vm361_vm2, %v329_v28, %v393_v34  ;;  %v426_v43 = vsel %vm362_vm3, %v330_v29, %v394_v35  ;;  %v812_v29 = vld [vmem:[%s884_s24 + $0x30] sm:$0xff]   ;;  %v798_v34 = vld [vmem:[%s879_s21 + $0x38] sm:$0xff]  }
  0x19   : > { %v521_v46 = vadd.f32 %v734_v13, %v425_v42  ;;  %v522_v47 = vadd.f32 %v735_v17, %v426_v43  ;;  %vm363_vm4 = vcmp.gt.f32.partialorder %v331_v38, 0.0  ;;  %v395_v48 = vmul.f32 0.1, %v331_v38  ;;  %v799_v43 = vld [vmem:[%s879_s21 + $0x40] sm:$0xff]  }
  0x1a   : > { %551 = vst [vmem:[%s921_s6] sm:$0xff] %v519_v40  ;;  %vm364_vm5 = vcmp.gt.f32.partialorder %v332_v39, 0.0  ;;  %v396_v49 = vmul.f32 0.1, %v332_v39  ;;  %v297_v50 = vmul.f32 %v889_v0, %v678_v31  ;;  %v742_v54 = vunpack.c.l.bf16 %v809_v44 }
  0x1b   : > { %552 = vst [vmem:[%s921_s6 + $0x8] sm:$0xff] %v520_v41  ;;  %v427_v53 = vsel %vm363_vm4, %v331_v38, %v395_v48  ;;  %v743_v55 = vunpack.c.h.bf16 %v809_v44  ;;  %v682_v56 = vunpack.c.l.bf16 %v795_v45  ;;  %v298_v61 = vmul.f32 %v889_v0, %v679_v51  ;;  %v813_v38 = vld [vmem:[%s884_s24 + $0x38] sm:$0xff]  }
  0x1c   : > { %553 = vst [vmem:[%s921_s6 + $0x10] sm:$0xff] %v521_v46  ;;  %v523_v58 = vadd.f32 %v738_v22, %v427_v53  ;;  %v428_v59 = vsel %vm364_vm5, %v332_v39, %v396_v49  ;;  %v333_v60 = vadd.f32 %v894_v1, %v297_v50  ;;  %v746_v2 = vunpack.c.l.bf16 %v810_v52  ;;  %v797_v22 = vld [vmem:[%s879_s21 + $0x30] sm:$0xff]  }
  0x1d   : > { %554 = vst [vmem:[%s921_s6 + $0x18] sm:$0xff] %v522_v47  ;;  %v524_v62 = vadd.f32 %v739_v27, %v428_v59  ;;  %v299_v63 = vmul.f32 %v889_v0, %v682_v56  ;;  %v683_v3 = vunpack.c.h.bf16 %v795_v45  ;;  %v334_v5 = vadd.f32 %v894_v1, %v298_v61  ;;  %v814_v56 = vld [vmem:[%s884_s24 + $0x40] sm:$0xff]  }
  0x1e   : > { %555 = vst [vmem:[%s921_s6 + $0x20] sm:$0xff] %v523_v58  ;;  %vm365_vm6 = vcmp.gt.f32.partialorder %v333_v60, 0.0  ;;  %v397_v4 = vmul.f32 0.1, %v333_v60  ;;  %v686_v6 = vunpack.c.l.bf16 %v796_v57  ;;  %v747_v9 = vunpack.c.h.bf16 %v810_v52 }
  0x1f   : > { %556 = vst [vmem:[%s921_s6 + $0x28] sm:$0xff] %v524_v62  ;;  %v335_v7 = vadd.f32 %v894_v1, %v299_v63  ;;  %v300_v8 = vmul.f32 %v889_v0, %v683_v3  ;;  %v687_v11 = vunpack.c.h.bf16 %v796_v57  ;;  %vm366_vm7 = vcmp.gt.f32.partialorder %v334_v5, 0.0  ;;  %v800_v57 = vld [vmem:[%s879_s21 + $0x48] sm:$0xff]  }
  0x20   : > { %v429_v12 = vsel %vm365_vm6, %v333_v60, %v397_v4  ;;  %v398_v13 = vmul.f32 0.1, %v334_v5  ;;  %v301_v14 = vmul.f32 %v889_v0, %v686_v6  ;;  %v750_v20 = vunpack.c.l.bf16 %v811_v10 }
  0x21   : > { %v525_v15 = vadd.f32 %v742_v54, %v429_v12  ;;  %vm367_vm8 = vcmp.gt.f32.partialorder %v335_v7, 0.0  ;;  %v399_v16 = vmul.f32 0.1, %v335_v7  ;;  %v336_v17 = vadd.f32 %v894_v1, %v300_v8 }
  0x22   : > { %v430_v18 = vsel %vm366_vm7, %v334_v5, %v398_v13  ;;  %v337_v19 = vadd.f32 %v894_v1, %v301_v14  ;;  %v302_v21 = vmul.f32 %v889_v0, %v687_v11  ;;  %v751_v31 = vunpack.c.h.bf16 %v811_v10 }
  0x23   : > { %557 = vst [vmem:[%s921_s6 + $0x30] sm:$0xff] %v525_v15  ;;  %v526_v23 = vadd.f32 %v743_v55, %v430_v18  ;;  %v431_v24 = vsel %vm367_vm8, %v335_v7, %v399_v16  ;;  %vm368_vm9 = vcmp.gt.f32.partialorder %v336_v17, 0.0  ;;  %v400_v25 = vmul.f32 0.1, %v336_v17  ;;  %v815_v16 = vld [vmem:[%s884_s24 + $0x48] sm:$0xff]  }
  0x24   : > { %v527_v26 = vadd.f32 %v746_v2, %v431_v24  ;;  %vm369_vm10 = vcmp.gt.f32.partialorder %v337_v19, 0.0  ;;  %v401_v27 = vmul.f32 0.1, %v337_v19  ;;  %v338_v28 = vadd.f32 %v894_v1, %v302_v21 }
  0x25   : > { %558 = vst [vmem:[%s921_s6 + $0x38] sm:$0xff] %v526_v23  ;;  %v432_v30 = vsel %vm368_vm9, %v336_v17, %v400_v25  ;;  %v690_v32 = vunpack.c.l.bf16 %v797_v22  ;;  %v691_v33 = vunpack.c.h.bf16 %v797_v22  ;;  %v754_v41 = vunpack.c.l.bf16 %v812_v29  ;;  %v801_v17 = vld [vmem:[%s879_s21 + $0x50] sm:$0xff]  }
  0x26   : > { %559 = vst [vmem:[%s921_s6 + $0x40] sm:$0xff] %v527_v26  ;;  %v528_v35 = vadd.f32 %v747_v9, %v432_v30  ;;  %v433_v36 = vsel %vm369_vm10, %v337_v19, %v401_v27  ;;  %vm370_vm11 = vcmp.gt.f32.partialorder %v338_v28, 0.0  ;;  %v402_v37 = vmul.f32 0.1, %v338_v28 }
  0x27   : > { %v529_v39 = vadd.f32 %v750_v20, %v433_v36  ;;  %v303_v40 = vmul.f32 %v889_v0, %v690_v32  ;;  %v304_v42 = vmul.f32 %v889_v0, %v691_v33  ;;  %v755_v45 = vunpack.c.h.bf16 %v812_v29  ;;  %v802_v29 = vld [vmem:[%s879_s21 + $0x58] sm:$0xff]  }
  0x28   : > { %560 = vst [vmem:[%s921_s6 + $0x48] sm:$0xff] %v528_v35  ;;  %v434_v44 = vsel %vm370_vm11, %v338_v28, %v402_v37  ;;  %v694_v46 = vunpack.c.l.bf16 %v798_v34  ;;  %v695_v47 = vunpack.c.h.bf16 %v798_v34  ;;  %v758_v51 = vunpack.c.l.bf16 %v813_v38  ;;  %v816_v28 = vld [vmem:[%s884_s24 + $0x50] sm:$0xff]   ;;  %v817_v37 = vld [vmem:[%s884_s24 + $0x58] sm:$0xff]  }
  0x29   : > { %561 = vst [vmem:[%s921_s6 + $0x50] sm:$0xff] %v529_v39  ;;  %v530_v48 = vadd.f32 %v751_v31, %v434_v44  ;;  %v339_v49 = vadd.f32 %v894_v1, %v303_v40  ;;  %v340_v50 = vadd.f32 %v894_v1, %v304_v42  ;;  %v759_v54 = vunpack.c.h.bf16 %v813_v38  ;;  %v803_v42 = vld [vmem:[%s879_s21 + $0x60] sm:$0xff]  }
  0x2a   : > { %v305_v52 = vmul.f32 %v889_v0, %v694_v46  ;;  %v306_v53 = vmul.f32 %v889_v0, %v695_v47  ;;  %v698_v55 = vunpack.c.l.bf16 %v799_v43  ;;  %v699_v59 = vunpack.c.h.bf16 %v799_v43 }
  0x2b   : > { %562 = vst [vmem:[%s921_s6 + $0x58] sm:$0xff] %v530_v48  ;;  %vm371_vm12 = vcmp.gt.f32.partialorder %v339_v49, 0.0  ;;  %v403_v58 = vmul.f32 0.1, %v339_v49  ;;  %vm372_vm13 = vcmp.gt.f32.partialorder %v340_v50, 0.0  ;;  %v762_v3 = vunpack.c.l.bf16 %v814_v56 }
  0x2c   : > { %v404_v60 = vmul.f32 0.1, %v340_v50  ;;  %v341_v61 = vadd.f32 %v894_v1, %v305_v52  ;;  %v342_v62 = vadd.f32 %v894_v1, %v306_v53  ;;  %v307_v63 = vmul.f32 %v889_v0, %v698_v55 }
  0x2d   : > { %v435_v2 = vsel %vm371_vm12, %v339_v49, %v403_v58  ;;  %v308_v4 = vmul.f32 %v889_v0, %v699_v59  ;;  %v702_v5 = vunpack.c.l.bf16 %v800_v57  ;;  %v763_v14 = vunpack.c.h.bf16 %v814_v56 }
  0x2e   : > { %v531_v6 = vadd.f32 %v754_v41, %v435_v2  ;;  %v436_v7 = vsel %vm372_vm13, %v340_v50, %v404_v60  ;;  %vm373_vm14 = vcmp.gt.f32.partialorder %v341_v61, 0.0  ;;  %v405_v8 = vmul.f32 0.1, %v341_v61  ;;  %v818_v60 = vld [vmem:[%s884_s24 + $0x60] sm:$0xff]  }
  0x2f   : > { %v532_v9 = vadd.f32 %v755_v45, %v436_v7  ;;  %vm374_vm15 = vcmp.gt.f32.partialorder %v342_v62, 0.0  ;;  %v406_v10 = vmul.f32 0.1, %v342_v62  ;;  %v343_v11 = vadd.f32 %v894_v1, %v307_v63 }
  0x30   : > { %563 = vst [vmem:[%s921_s6 + $0x60] sm:$0xff] %v531_v6  ;;  %v437_v12 = vsel %vm373_vm14, %v341_v61, %v405_v8  ;;  %v344_v13 = vadd.f32 %v894_v1, %v308_v4  ;;  %v309_v15 = vmul.f32 %v889_v0, %v702_v5  ;;  %v766_v25 = vunpack.c.l.bf16 %v815_v16 }
  0x31   : > { %564 = vst [vmem:[%s921_s6 + $0x68] sm:$0xff] %v532_v9  ;;  %v533_v18 = vadd.f32 %v758_v51, %v437_v12  ;;  %v438_v19 = vsel %vm374_vm15, %v342_v62, %v406_v10  ;;  %vm375_vm0 = vcmp.gt.f32.partialorder %v343_v11, 0.0  ;;  %v407_v20 = vmul.f32 0.1, %v343_v11  ;;  %v804_v10 = vld [vmem:[%s879_s21 + $0x68] sm:$0xff]  }
  0x32   : > { %v534_v21 = vadd.f32 %v759_v54, %v438_v19  ;;  %vm376_vm1 = vcmp.gt.f32.partialorder %v344_v13, 0.0  ;;  %v408_v22 = vmul.f32 0.1, %v344_v13  ;;  %v345_v23 = vadd.f32 %v894_v1, %v309_v15 }
  0x33   : > { %565 = vst [vmem:[%s921_s6 + $0x70] sm:$0xff] %v533_v18  ;;  %v439_v24 = vsel %vm375_vm0, %v343_v11, %v407_v20  ;;  %v703_v26 = vunpack.c.h.bf16 %v800_v57  ;;  %v706_v27 = vunpack.c.l.bf16 %v801_v17  ;;  %v767_v35 = vunpack.c.h.bf16 %v815_v16 }
  0x34   : > { %566 = vst [vmem:[%s921_s6 + $0x78] sm:$0xff] %v534_v21  ;;  %v535_v30 = vadd.f32 %v762_v3, %v439_v24  ;;  %v440_v31 = vsel %vm376_vm1, %v344_v13, %v408_v22  ;;  %vm377_vm2 = vcmp.gt.f32.partialorder %v345_v23, 0.0  ;;  %v409_v32 = vmul.f32 0.1, %v345_v23  ;;  %v805_v21 = vld [vmem:[%s879_s21 + $0x70] sm:$0xff]  }
  0x35   : > { %v536_v33 = vadd.f32 %v763_v14, %v440_v31  ;;  %v310_v34 = vmul.f32 %v889_v0, %v703_v26  ;;  %v311_v36 = vmul.f32 %v889_v0, %v706_v27  ;;  %v770_v39 = vunpack.c.l.bf16 %v816_v28 }
  0x36   : > { %567 = vst [vmem:[%s921_s6 + $0x80] sm:$0xff] %v535_v30  ;;  %v441_v38 = vsel %vm377_vm2, %v345_v23, %v409_v32  ;;  %v707_v40 = vunpack.c.h.bf16 %v801_v17  ;;  %v710_v41 = vunpack.c.l.bf16 %v802_v29  ;;  %v771_v46 = vunpack.c.h.bf16 %v816_v28 }
  0x37   : > { %568 = vst [vmem:[%s921_s6 + $0x88] sm:$0xff] %v536_v33  ;;  %v537_v43 = vadd.f32 %v766_v25, %v441_v38  ;;  %v346_v44 = vadd.f32 %v894_v1, %v310_v34  ;;  %v347_v45 = vadd.f32 %v894_v1, %v311_v36  ;;  %v774_v49 = vunpack.c.l.bf16 %v817_v37  ;;  %v819_v25 = vld [vmem:[%s884_s24 + $0x68] sm:$0xff]  }
  0x38   : > { %v312_v47 = vmul.f32 %v889_v0, %v707_v40  ;;  %v313_v48 = vmul.f32 %v889_v0, %v710_v41  ;;  %v711_v50 = vunpack.c.h.bf16 %v802_v29  ;;  %v714_v52 = vunpack.c.l.bf16 %v803_v42  ;;  %v806_v29 = vld [vmem:[%s879_s21 + $0x78] sm:$0xff]  }
  0x39   : > { %569 = vst [vmem:[%s921_s6 + $0x90] sm:$0xff] %v537_v43  ;;  %vm378_vm3 = vcmp.gt.f32.partialorder %v346_v44, 0.0  ;;  %v410_v51 = vmul.f32 0.1, %v346_v44  ;;  %vm379_vm4 = vcmp.gt.f32.partialorder %v347_v45, 0.0  ;;  %v775_v58 = vunpack.c.h.bf16 %v817_v37 }
  0x3a   : > { %v411_v53 = vmul.f32 0.1, %v347_v45  ;;  %v348_v54 = vadd.f32 %v894_v1, %v312_v47  ;;  %v349_v55 = vadd.f32 %v894_v1, %v313_v48  ;;  %v314_v56 = vmul.f32 %v889_v0, %v711_v50 }
  0x3b   : > { %v442_v57 = vsel %vm378_vm3, %v346_v44, %v410_v51  ;;  %v315_v59 = vmul.f32 %v889_v0, %v714_v52  ;;  %v715_v61 = vunpack.c.h.bf16 %v803_v42  ;;  %v778_v8 = vunpack.c.l.bf16 %v818_v60  ;;  %v821_v51 = vld [vmem:[%s884_s24 + $0x78] sm:$0xff]  }
  0x3c   : > { %v538_v62 = vadd.f32 %v767_v35, %v442_v57  ;;  %v443_v63 = vsel %vm379_vm4, %v347_v45, %v411_v53  ;;  %vm380_vm5 = vcmp.gt.f32.partialorder %v348_v54, 0.0  ;;  %v412_v2 = vmul.f32 0.1, %v348_v54 }
  0x3d   : > { %v539_v3 = vadd.f32 %v770_v39, %v443_v63  ;;  %vm381_vm6 = vcmp.gt.f32.partialorder %v349_v55, 0.0  ;;  %v413_v4 = vmul.f32 0.1, %v349_v55  ;;  %v350_v5 = vadd.f32 %v894_v1, %v314_v56  ;;  %v820_v39 = vld [vmem:[%s884_s24 + $0x70] sm:$0xff]  }
  0x3e   : > { %570 = vst [vmem:[%s921_s6 + $0x98] sm:$0xff] %v538_v62  ;;  %v444_v6 = vsel %vm380_vm5, %v348_v54, %v412_v2  ;;  %v351_v7 = vadd.f32 %v894_v1, %v315_v59  ;;  %v316_v9 = vmul.f32 %v889_v0, %v715_v61  ;;  %v779_v18 = vunpack.c.h.bf16 %v818_v60 }
  0x3f   : > { %571 = vst [vmem:[%s921_s6 + $0xa0] sm:$0xff] %v539_v3  ;;  %v540_v11 = vadd.f32 %v771_v46, %v444_v6  ;;  %v445_v12 = vsel %vm381_vm6, %v349_v55, %v413_v4  ;;  %vm382_vm7 = vcmp.gt.f32.partialorder %v350_v5, 0.0  ;;  %v414_v13 = vmul.f32 0.1, %v350_v5 }
  0x40   : > { %v541_v14 = vadd.f32 %v774_v49, %v445_v12  ;;  %vm383_vm8 = vcmp.gt.f32.partialorder %v351_v7, 0.0  ;;  %v415_v15 = vmul.f32 0.1, %v351_v7  ;;  %v352_v16 = vadd.f32 %v894_v1, %v316_v9 }
  0x41   : > { %572 = vst [vmem:[%s921_s6 + $0xa8] sm:$0xff] %v540_v11  ;;  %v446_v17 = vsel %vm382_vm7, %v350_v5, %v414_v13  ;;  %v718_v19 = vunpack.c.l.bf16 %v804_v10  ;;  %v719_v20 = vunpack.c.h.bf16 %v804_v10  ;;  %v722_v31 = vunpack.c.l.bf16 %v805_v21 }
  0x42   : > { %573 = vst [vmem:[%s921_s6 + $0xb0] sm:$0xff] %v541_v14  ;;  %v542_v22 = vadd.f32 %v775_v58, %v446_v17  ;;  %v447_v23 = vsel %vm383_vm8, %v351_v7, %v415_v15  ;;  %vm384_vm9 = vcmp.gt.f32.partialorder %v352_v16, 0.0  ;;  %v416_v24 = vmul.f32 0.1, %v352_v16 }
  0x43   : > { %v543_v26 = vadd.f32 %v778_v8, %v447_v23  ;;  %v317_v27 = vmul.f32 %v889_v0, %v718_v19  ;;  %v318_v28 = vmul.f32 %v889_v0, %v719_v20  ;;  %v723_v32 = vunpack.c.h.bf16 %v805_v21 }
  0x44   : > { %574 = vst [vmem:[%s921_s6 + $0xb8] sm:$0xff] %v542_v22  ;;  %v448_v30 = vsel %vm384_vm9, %v352_v16, %v416_v24  ;;  %v782_v35 = vunpack.c.l.bf16 %v819_v25  ;;  %v783_v37 = vunpack.c.h.bf16 %v819_v25  ;;  %v319_v38 = vmul.f32 %v889_v0, %v722_v31 }
  0x45   : > { %575 = vst [vmem:[%s921_s6 + $0xc0] sm:$0xff] %v543_v26  ;;  %v544_v33 = vadd.f32 %v779_v18, %v448_v30  ;;  %v353_v34 = vadd.f32 %v894_v1, %v317_v27  ;;  %v354_v36 = vadd.f32 %v894_v1, %v318_v28  ;;  %v320_v40 = vmul.f32 %v889_v0, %v723_v32 }
  0x46   : > { %v726_v41 = vunpack.c.l.bf16 %v806_v29  ;;  %v727_v43 = vunpack.c.h.bf16 %v806_v29  ;;  %v355_v45 = vadd.f32 %v894_v1, %v319_v38  ;;  %v786_v49 = vunpack.c.l.bf16 %v820_v39 }
  0x47   : > { %576 = vst [vmem:[%s921_s6 + $0xc8] sm:$0xff] %v544_v33  ;;  %vm385_vm10 = vcmp.gt.f32.partialorder %v353_v34, 0.0  ;;  %v417_v42 = vmul.f32 0.1, %v353_v34  ;;  %vm386_vm11 = vcmp.gt.f32.partialorder %v354_v36, 0.0  ;;  %v356_v46 = vadd.f32 %v894_v1, %v320_v40 }
  0x48   : > { %v418_v44 = vmul.f32 0.1, %v354_v36  ;;  %v321_v47 = vmul.f32 %v889_v0, %v726_v41  ;;  %v787_v50 = vunpack.c.h.bf16 %v820_v39  ;;  %v322_v52 = vmul.f32 %v889_v0, %v727_v43 }
  0x49   : > { %v449_v48 = vsel %vm385_vm10, %v353_v34, %v417_v42  ;;  %vm387_vm12 = vcmp.gt.f32.partialorder %v355_v45, 0.0  ;;  %v419_v55 = vmul.f32 0.1, %v355_v45  ;;  %vm388_vm13 = vcmp.gt.f32.partialorder %v356_v46, 0.0 }
  0x4a   : > { %v545_v53 = vadd.f32 %v782_v35, %v449_v48  ;;  %v450_v54 = vsel %vm386_vm11, %v354_v36, %v418_v44  ;;  %v420_v57 = vmul.f32 0.1, %v356_v46  ;;  %v357_v58 = vadd.f32 %v894_v1, %v321_v47 }
  0x4b   : > { %v546_v56 = vadd.f32 %v783_v37, %v450_v54  ;;  %v451_v59 = vsel %vm387_vm12, %v355_v45, %v419_v55  ;;  %v790_v60 = vunpack.c.l.bf16 %v821_v51  ;;  %v358_v61 = vadd.f32 %v894_v1, %v322_v52 }
  0x4c   : > { %577 = vst [vmem:[%s921_s6 + $0xd0] sm:$0xff] %v545_v53  ;;  %v791_v62 = vunpack.c.h.bf16 %v821_v51  ;;  %v547_v0 = vadd.f32 %v786_v49, %v451_v59  ;;  %v452_v63 = vsel %vm388_vm13, %v356_v46, %v420_v57  ;;  %vm389_vm14 = vcmp.gt.f32.partialorder %v357_v58, 0.0 }
  0x4d   : > { %578 = vst [vmem:[%s921_s6 + $0xd8] sm:$0xff] %v546_v56  ;;  %v421_v2 = vmul.f32 0.1, %v357_v58  ;;  %v548_v3 = vadd.f32 %v787_v50, %v452_v63  ;;  %vm390_vm15 = vcmp.gt.f32.partialorder %v358_v61, 0.0  ;;  %v422_v4 = vmul.f32 0.1, %v358_v61 }
  0x4e   : > { %579 = vst [vmem:[%s921_s6 + $0xe0] sm:$0xff] %v547_v0 }
  0x4f   : > { %v453_v5 = vsel %vm389_vm14, %v357_v58, %v421_v2  ;;  %580 = vst [vmem:[%s921_s6 + $0xe8] sm:$0xff] %v548_v3  ;;  %v454_v7 = vsel %vm390_vm15, %v358_v61, %v422_v4 }
  0x50   : > { %v549_v6 = vadd.f32 %v790_v60, %v453_v5  ;;  %v550_v8 = vadd.f32 %v791_v62, %v454_v7 }
  0x52   : > { %581 = vst [vmem:[%s921_s6 + $0xf0] sm:$0xff] %v549_v6 }
  0x53   : > { %582 = vst [vmem:[%s921_s6 + $0xf8] sm:$0xff] %v550_v8 }
  0x54 PF: > { %s14_s15 = sadd.s32 1, %s838_s15  }
  0x55   : > { %p11_p4 = scmp.ge.s32.totalorder %s14_s15, 4  }
  0x57   :  { %13 = sbr.rel (!%p11_p4) target bundleno = 1 (0x1), region = 69 }

// kernel: a_call__.6
= control target key start
LH: loop header
LB: loop body
LE: loop exit
PB: predicated region body
PF: predicated region fallthrough
CT: control target
= control target key end

     0   :  { %s4024_s15 = smov 0   ;;  %s4772_s0 = inlined_call_operand.vmem [shape: bf16[512,1152], index: 0, kind: input, shape index: {}]   ;;  %s4773_s1 = inlined_call_operand.vmem [shape: bf16[1152,128], index: 1, kind: input, shape index: {}]   ;;  %s4774_s2 = inlined_call_operand.vmem [shape: bf16[512,128], index: 2, kind: output, shape index: {0}]   ;;  %s4775_s3 = inlined_call_operand.vmem [shape: f32[2,1,128], index: 3, kind: output, shape index: {1}]   ;;  %s4776_s4 = inlined_call_operand.vmem [shape: f32[2,1,128], index: 4, kind: output, shape index: {2}]  }
   0x1 LB: > { %s4030_s16 = sadd.s32 4294967295, %s3997_s15   ;;  %p2776_p0 = scmp.ge.s32.totalorder %s3997_s15, 1  ;;  %s3997_s15 = sphi %s4024_s15, %s15_s15  }
   0x2   : > { %p169_p1 = scmp.lt.s32.totalorder %s3997_s15, 3 }
   0x4   : > { %p170_p2 = pnand %p2776_p0, %p169_p1 }
   0x5   : > { %s2777_s23 = sshll.u32 (!%p170_p2), %s4030_s16, 5  ;;  %p215_p4 = scmp.lt.s32.totalorder (!%p170_p2), %s4030_s16, 1 }
   0x6   : > { %173 = sbr.rel (%p170_p2) target bundleno = 766 (0x2fe), region = 28  ;;  %p203_p3 = scmp.lt.s32.totalorder (!%p170_p2), %s2777_s23, 63 }
   0xb   : > { %v3798_v0 = vld [vmem:[%s4773_s1 + $0x38] sm:$0xff]  ;;  %v3797_v1 = vld [vmem:[%s4773_s1 + $0x30] sm:$0xff]  ;;  %v3796_v2 = vld [vmem:[%s4773_s1 + $0x28] sm:$0xff]  ;;  %s4778_s23 = smov (!%p203_p3, %s2777_s23), 63  ;;  %s4780_s16 = smov (!%p215_p4, %s4030_s16), 1 }
   0xc   : > { %3958 = vmatpush.bf16.msra.mxu1 %v3798_v0  ;;  %3959 = vmatpush.bf16.msra.mxu2 %v3798_v0  ;;  %v3795_v3 = vld [vmem:[%s4773_s1 + $0x20] sm:$0xff]  ;;  %v3794_v4 = vld [vmem:[%s4773_s1 + $0x18] sm:$0xff]  ;;  %v3793_v5 = vld [vmem:[%s4773_s1 + $0x10] sm:$0xff]  ;;  %s3982_s30 = smul.u32 36, %s4778_s23  ;;  %s2780_s7 = sshll.u32 %s4778_s23, 2 }
   0xd   : > { %3960 = vmatpush.bf16.msra.mxu3 %v3798_v0  ;;  %1693 = vmatpush.bf16.msra.mxu0 %v3798_v0  ;;  %v3792_v6 = vld [vmem:[%s4773_s1 + $0x8] sm:$0xff]  ;;  %v3791_v7 = vld [vmem:[%s4773_s1] sm:$0xff]  ;;  %v3814_v16 = vld [vmem:[%s4773_s1 + $0xb8] sm:$0xff]  ;;  %s4665_s11 = scalar_lea.vmem %s4774_s2, %s2780_s7  ;;  %s217_s12 = scalar_lea.vmem %s4775_s3, %s4780_s16 }
   0xe   : > { %s4062_s9 = scalar_lea.vmem %s4772_s0, %s3982_s30  ;;  %v3822_v17 = vld [vmem:[%s4773_s1 + $0xf8] sm:$0xff]  ;;  %v3813_v24 = vld [vmem:[%s4773_s1 + $0xb0] sm:$0xff]  ;;  %v3812_v28 = vld [vmem:[%s4773_s1 + $0xa8] sm:$0xff]  ;;  %s220_s17 = scalar_lea.vmem %s4776_s4, %s4780_s16 }
   0xf   : > { %v2927_v8 = vld [vmem:[%s4062_s9 + $0x120] sm:$0xf]  ;;  %v3687_v9 = vld [vmem:[%s4062_s9 + $0x140] sm:$0xf0]  ;;  %v3806_v22 = vld [vmem:[%s4773_s1 + $0x78] sm:$0xff] }
  0x10   : > { %3961 = vmatpush.bf16.msra.mxu1 %v3797_v1  ;;  %3962 = vmatpush.bf16.msra.mxu2 %v3797_v1  ;;  %v3071_v10 = vld [vmem:[%s4062_s9 + $0x240] sm:$0xf]  ;;  %v3723_v11 = vld [vmem:[%s4062_s9 + $0x260] sm:$0xf0]  ;;  %v2928_v18 = vor.u32 %v3687_v9, %v2927_v8  ;;  %v3830_v23 = vld [vmem:[%s4773_s1 + $0x138] sm:$0xff] }
  0x11   : > { %3963 = vmatpush.bf16.msra.mxu3 %v3797_v1  ;;  %1694 = vmatpush.bf16.msra.mxu0 %v3797_v1  ;;  %v3215_v12 = vld [vmem:[%s4062_s9 + $0x360] sm:$0xf]  ;;  %v3759_v13 = vld [vmem:[%s4062_s9 + $0x380] sm:$0xf0]  ;;  %v3072_v19 = vor.u32 %v3723_v11, %v3071_v10  ;;  %v3821_v25 = vld [vmem:[%s4773_s1 + $0xf0] sm:$0xff] }
  0x12   : > { %v2783_v14 = vld [vmem:[%s4062_s9] sm:$0xf]  ;;  %v3651_v15 = vld [vmem:[%s4062_s9 + $0x20] sm:$0xf0]  ;;  %v3216_v20 = vor.u32 %v3759_v13, %v3215_v12  ;;  %v3805_v26 = vld [vmem:[%s4773_s1 + $0x70] sm:$0xff] }
  0x13   : > { %v2784_v21 = vor.u32 %v3651_v15, %v2783_v14  ;;  %v3829_v27 = vld [vmem:[%s4773_s1 + $0x130] sm:$0xff]  ;;  %v3820_v29 = vld [vmem:[%s4773_s1 + $0xe8] sm:$0xff]  ;;  %v3811_v33 = vld [vmem:[%s4773_s1 + $0xa0] sm:$0xff] }
  0x14   : > { %3964 = vmatpush.bf16.msra.mxu1 %v3796_v2  ;;  %3965 = vmatpush.bf16.msra.mxu2 %v3796_v2  ;;  %v3804_v30 = vld [vmem:[%s4773_s1 + $0x68] sm:$0xff]  ;;  %v3819_v34 = vld [vmem:[%s4773_s1 + $0xe0] sm:$0xff]  ;;  %v3810_v44 = vld [vmem:[%s4773_s1 + $0x98] sm:$0xff] }
  0x15   : > { %3966 = vmatpush.bf16.msra.mxu3 %v3796_v2  ;;  %1695 = vmatpush.bf16.msra.mxu0 %v3796_v2  ;;  %v3828_v31 = vld [vmem:[%s4773_s1 + $0x128] sm:$0xff]  ;;  %v3803_v42 = vld [vmem:[%s4773_s1 + $0x60] sm:$0xff]  ;;  %v3818_v45 = vld [vmem:[%s4773_s1 + $0xd8] sm:$0xff] }
  0x16   : > { %v2963_v32 = vld [vmem:[%s4062_s9 + $0x168] sm:$0xf]  ;;  %v3696_v35 = vld [vmem:[%s4062_s9 + $0x188] sm:$0xf0]  ;;  %v3827_v43 = vld [vmem:[%s4773_s1 + $0x120] sm:$0xff] }
  0x17   : > { %v3107_v36 = vld [vmem:[%s4062_s9 + $0x288] sm:$0xf]  ;;  %v3732_v37 = vld [vmem:[%s4062_s9 + $0x2a8] sm:$0xf0]  ;;  %v2964_v46 = vor.u32 %v3696_v35, %v2963_v32  ;;  %v3802_v50 = vld [vmem:[%s4773_s1 + $0x58] sm:$0xff] }
  0x18   : > { %3967 = vmatpush.bf16.msra.mxu1 %v3795_v3  ;;  %3968 = vmatpush.bf16.msra.mxu2 %v3795_v3  ;;  %v3251_v38 = vld [vmem:[%s4062_s9 + $0x3a8] sm:$0xf]  ;;  %v3768_v39 = vld [vmem:[%s4062_s9 + $0x3c8] sm:$0xf0]  ;;  %v3108_v47 = vor.u32 %v3732_v37, %v3107_v36  ;;  %v3826_v51 = vld [vmem:[%s4773_s1 + $0x118] sm:$0xff] }
  0x19   : > { %3969 = vmatpush.bf16.msra.mxu3 %v3795_v3  ;;  %1696 = vmatpush.bf16.msra.mxu0 %v3795_v3  ;;  %v2819_v40 = vld [vmem:[%s4062_s9 + $0x48] sm:$0xf]  ;;  %v3660_v41 = vld [vmem:[%s4062_s9 + $0x68] sm:$0xf0]  ;;  %v3252_v48 = vor.u32 %v3768_v39, %v3251_v38  ;;  %v3809_v52 = vld [vmem:[%s4773_s1 + $0x90] sm:$0xff] }
  0x1a   : > { %v2820_v49 = vor.u32 %v3660_v41, %v2819_v40  ;;  %v3817_v53 = vld [vmem:[%s4773_s1 + $0xd0] sm:$0xff]  ;;  %v3808_v56 = vld [vmem:[%s4773_s1 + $0x88] sm:$0xff]  ;;  %v3807_v61 = vld [vmem:[%s4773_s1 + $0x80] sm:$0xff] }
  0x1b   : > { %v3801_v54 = vld [vmem:[%s4773_s1 + $0x50] sm:$0xff]  ;;  %v3816_v57 = vld [vmem:[%s4773_s1 + $0xc8] sm:$0xff]  ;;  %v3815_v62 = vld [vmem:[%s4773_s1 + $0xc0] sm:$0xff] }
  0x1c   : > { %3970 = vmatpush.bf16.msra.mxu1 %v3794_v4  ;;  %3971 = vmatpush.bf16.msra.mxu2 %v3794_v4  ;;  %v3825_v55 = vld [vmem:[%s4773_s1 + $0x110] sm:$0xff]  ;;  %v3800_v58 = vld [vmem:[%s4773_s1 + $0x48] sm:$0xff]  ;;  %v3846_v12 = vld [vmem:[%s4773_s1 + $0x1b8] sm:$0xff] }
  0x1d   : > { %3972 = vmatpush.bf16.msra.mxu3 %v3794_v4  ;;  %1697 = vmatpush.bf16.msra.mxu0 %v3794_v4  ;;  %v3824_v59 = vld [vmem:[%s4773_s1 + $0x108] sm:$0xff]  ;;  %v2999_v60 = vld [vmem:[%s4062_s9 + $0x1b0] sm:$0xf]  ;;  %v3705_v63 = vld [vmem:[%s4062_s9 + $0x1d0] sm:$0xf0] }
  0x1e   : > { %v3143_v0 = vld [vmem:[%s4062_s9 + $0x2d0] sm:$0xf]  ;;  %v3741_v1 = vld [vmem:[%s4062_s9 + $0x2f0] sm:$0xf0]  ;;  %v3000_v8 = vor.u32 %v3705_v63, %v2999_v60  ;;  %v3854_v13 = vld [vmem:[%s4773_s1 + $0x1f8] sm:$0xff] }
  0x1f   : > { %v3287_v2 = vld [vmem:[%s4062_s9 + $0x3f0] sm:$0xf]  ;;  %v3777_v3 = vld [vmem:[%s4062_s9 + $0x410] sm:$0xf0]  ;;  %v3144_v9 = vor.u32 %v3741_v1, %v3143_v0  ;;  %v3838_v14 = vld [vmem:[%s4773_s1 + $0x178] sm:$0xff] }
  0x20   : > { %3973 = vmatpush.bf16.msra.mxu1 %v3793_v5  ;;  %3974 = vmatpush.bf16.msra.mxu2 %v3793_v5  ;;  %v2855_v4 = vld [vmem:[%s4062_s9 + $0x90] sm:$0xf]  ;;  %v3288_v10 = vor.u32 %v3777_v3, %v3287_v2  ;;  %v3862_v15 = vld [vmem:[%s4773_s1 + $0x238] sm:$0xff]  ;;  %v3648_v32 = vld [vmem:[%s4062_s9 + $0xc] sm:$0xf] }
  0x21   : > { %3975 = vmatpush.bf16.msra.mxu3 %v3793_v5  ;;  %1698 = vmatpush.bf16.msra.mxu0 %v3793_v5  ;;  %v3669_v5 = vld [vmem:[%s4062_s9 + $0xb0] sm:$0xf0]  ;;  %v3666_v60 = vld [vmem:[%s4062_s9 + $0x9c] sm:$0xf]  ;;  %v3671_v63 = vld [vmem:[%s4062_s9 + $0xc0] sm:$0xf0] }
  0x22   : > { %v2856_v11 = vor.u32 %v3669_v5, %v2855_v4  ;;  %v3653_v35 = vld [vmem:[%s4062_s9 + $0x30] sm:$0xf0]  ;;  %v3844_v4 = vld [vmem:[%s4773_s1 + $0x1a8] sm:$0xff] }
  0x23   : > { %v3845_v40 = vld [vmem:[%s4773_s1 + $0x1b0] sm:$0xff]  ;;  %v3852_v5 = vld [vmem:[%s4773_s1 + $0x1e8] sm:$0xff] }
  0x24   : > { %3976 = vmatpush.bf16.msra.mxu1 %v3792_v6  ;;  %3977 = vmatpush.bf16.msra.mxu2 %v3792_v6  ;;  %v3853_v41 = vld [vmem:[%s4773_s1 + $0x1f0] sm:$0xff] }
  0x25   : > { %3978 = vmatpush.bf16.msra.mxu3 %v3792_v6  ;;  %1699 = vmatpush.bf16.msra.mxu0 %v3792_v6  ;;  %v3799_v6 = vld [vmem:[%s4773_s1 + $0x40] sm:$0xff] }
  0x28   : > { %3979 = vmatpush.bf16.msra.mxu1 %v3791_v7  ;;  %3980 = vmatpush.bf16.msra.mxu2 %v3791_v7 }
  0x29   : > { %3981 = vmatpush.bf16.msra.mxu3 %v3791_v7  ;;  %1700 = vmatpush.bf16.msra.mxu0 %v3791_v7  ;;  %v3823_v7 = vld [vmem:[%s4773_s1 + $0x100] sm:$0xff] }
  0x2b   : > { %1721 = vmatmul.bf16.vlgmr.msra.gmra.mxu1 %v2928_v18  ;;  %1741 = vmatmul.bf16.vlgmr.msra.gmra.mxu2 %v3072_v19  ;;  %v3179_v18 = vld [vmem:[%s4062_s9 + $0x318] sm:$0xf]  ;;  %v3750_v19 = vld [vmem:[%s4062_s9 + $0x338] sm:$0xf0] }
  0x2c   : > { %1871 = vmatpush.bf16.msrb.mxu2 %v3814_v16  ;;  %1761 = vmatmul.bf16.vlgmr.msra.gmra.mxu3 %v3216_v20  ;;  %v3035_v16 = vld [vmem:[%s4062_s9 + $0x1f8] sm:$0xf] }
  0x2d   : > { %1960 = vmatpush.bf16.msrb.mxu3 %v3822_v17  ;;  %1701 = vmatmul.bf16.vlgmr.msra.gmra.mxu0 %v2784_v21  ;;  %v3714_v17 = vld [vmem:[%s4062_s9 + $0x218] sm:$0xf0]  ;;  %v3323_v20 = vld [vmem:[%s4062_s9 + $0x438] sm:$0xf] }
  0x2e   : > { %1782 = vmatpush.bf16.msrb.mxu1 %v3806_v22  ;;  %2049 = vmatpush.bf16.msrb.mxu0 %v3830_v23  ;;  %v3786_v21 = vld [vmem:[%s4062_s9 + $0x458] sm:$0xf0]  ;;  %v2891_v22 = vld [vmem:[%s4062_s9 + $0xd8] sm:$0xf] }
  0x2f   : > { %v3678_v23 = vld [vmem:[%s4062_s9 + $0xf8] sm:$0xf0] }
  0x30   : > { %1872 = vmatpush.bf16.msrb.mxu2 %v3813_v24  ;;  %v3036_v24 = vor.u32 %v3714_v17, %v3035_v16 }
  0x31   : > { %1961 = vmatpush.bf16.msrb.mxu3 %v3821_v25  ;;  %v3180_v25 = vor.u32 %v3750_v19, %v3179_v18 }
  0x32   : > { %1783 = vmatpush.bf16.msrb.mxu1 %v3805_v26  ;;  %2050 = vmatpush.bf16.msrb.mxu0 %v3829_v27  ;;  %v3324_v26 = vor.u32 %v3786_v21, %v3323_v20  ;;  %v2892_v27 = vor.u32 %v3678_v23, %v2891_v22  ;;  %v3683_v20 = vld [vmem:[%s4062_s9 + $0x124] sm:$0xf]  ;;  %v2929_v21 = vld [vmem:[%s4062_s9 + $0x144] sm:$0xf0]  ;;  %v3688_v23 = vld [vmem:[%s4062_s9 + $0x148] sm:$0xf0] }
  0x33   : > { %v2935_v22 = vld [vmem:[%s4062_s9 + $0x128] sm:$0xf] }
  0x34   : > { %1873 = vmatpush.bf16.msrb.mxu2 %v3812_v28  ;;  %v3647_v28 = vld [vmem:[%s4062_s9 + $0x4] sm:$0xf] }
  0x35   : > { %1962 = vmatpush.bf16.msrb.mxu3 %v3820_v29  ;;  %v2785_v29 = vld [vmem:[%s4062_s9 + $0x24] sm:$0xf0] }
  0x36   : > { %1784 = vmatpush.bf16.msrb.mxu1 %v3804_v30  ;;  %2051 = vmatpush.bf16.msrb.mxu0 %v3828_v31  ;;  %v2791_v30 = vld [vmem:[%s4062_s9 + $0x8] sm:$0xf]  ;;  %v3652_v31 = vld [vmem:[%s4062_s9 + $0x28] sm:$0xf0]  ;;  %v2788_v36 = vor.u32 %v3647_v28, %v2785_v29  ;;  %v2932_v28 = vor.u32 %v3683_v20, %v2929_v21  ;;  %v2936_v29 = vor.u32 %v3688_v23, %v2935_v22  ;;  %v3834_v20 = vld [vmem:[%s4773_s1 + $0x158] sm:$0xff] }
  0x37   : > { %v2792_v37 = vor.u32 %v3652_v31, %v2791_v30  ;;  %v3858_v21 = vld [vmem:[%s4773_s1 + $0x218] sm:$0xff]  ;;  %v3037_v23 = vld [vmem:[%s4062_s9 + $0x21c] sm:$0xf0] }
  0x38   : > { %1874 = vmatpush.bf16.msrb.mxu2 %v3811_v33  ;;  %v2793_v33 = vld [vmem:[%s4062_s9 + $0x2c] sm:$0xf0]  ;;  %v3710_v22 = vld [vmem:[%s4062_s9 + $0x1fc] sm:$0xf] }
  0x39   : > { %1963 = vmatpush.bf16.msrb.mxu3 %v3819_v34  ;;  %v2799_v34 = vld [vmem:[%s4062_s9 + $0x10] sm:$0xf]  ;;  %v2796_v38 = vor.u32 %v3648_v32, %v2793_v33 }
  0x3a   : > { %1785 = vmatpush.bf16.msrb.mxu1 %v3803_v42  ;;  %2052 = vmatpush.bf16.msrb.mxu0 %v3827_v43  ;;  %v2800_v39 = vor.u32 %v3653_v35, %v2799_v34  ;;  %v3837_v42 = vld [vmem:[%s4773_s1 + $0x170] sm:$0xff]  ;;  %v3843_v34 = vld [vmem:[%s4773_s1 + $0x1a0] sm:$0xff] }
  0x3b   : > { %1726 = vmatmul.bf16.gmra.mxu1 %v2964_v46  ;;  %1746 = vmatmul.bf16.gmra.mxu2 %v3108_v47  ;;  %v3861_v43 = vld [vmem:[%s4773_s1 + $0x230] sm:$0xff]  ;;  %v3851_v35 = vld [vmem:[%s4773_s1 + $0x1e0] sm:$0xff] }
  0x3c   : > { %1875 = vmatpush.bf16.msrb.mxu2 %v3810_v44  ;;  %1766 = vmatmul.bf16.gmra.mxu3 %v3252_v48  ;;  %v3656_v44 = vld [vmem:[%s4062_s9 + $0x4c] sm:$0xf]  ;;  %v2827_v46 = vld [vmem:[%s4062_s9 + $0x50] sm:$0xf]  ;;  %v3661_v47 = vld [vmem:[%s4062_s9 + $0x70] sm:$0xf0] }
  0x3d   : > { %1964 = vmatpush.bf16.msrb.mxu3 %v3818_v45  ;;  %1706 = vmatmul.bf16.gmra.mxu0 %v2820_v49  ;;  %v2821_v45 = vld [vmem:[%s4062_s9 + $0x6c] sm:$0xf0]  ;;  %v3657_v48 = vld [vmem:[%s4062_s9 + $0x54] sm:$0xf]  ;;  %v2829_v49 = vld [vmem:[%s4062_s9 + $0x74] sm:$0xf0] }
  0x3e   : > { %1786 = vmatpush.bf16.msrb.mxu1 %v3802_v50  ;;  %2053 = vmatpush.bf16.msrb.mxu0 %v3826_v51  ;;  %v2835_v50 = vld [vmem:[%s4062_s9 + $0x58] sm:$0xf]  ;;  %v3662_v51 = vld [vmem:[%s4062_s9 + $0x78] sm:$0xf0] }
  0x40   : > { %1876 = vmatpush.bf16.msrb.mxu2 %v3809_v52  ;;  %v2824_v52 = vor.u32 %v3656_v44, %v2821_v45  ;;  %v2971_v44 = vld [vmem:[%s4062_s9 + $0x170] sm:$0xf]  ;;  %v3697_v45 = vld [vmem:[%s4062_s9 + $0x190] sm:$0xf0] }
  0x41   : > { %1965 = vmatpush.bf16.msrb.mxu3 %v3817_v53  ;;  %v2828_v53 = vor.u32 %v3661_v47, %v2827_v46  ;;  %v3693_v46 = vld [vmem:[%s4062_s9 + $0x174] sm:$0xf]  ;;  %v2973_v47 = vld [vmem:[%s4062_s9 + $0x194] sm:$0xf0] }
  0x42   : > { %1787 = vmatpush.bf16.msrb.mxu1 %v3801_v54  ;;  %2054 = vmatpush.bf16.msrb.mxu0 %v3825_v55  ;;  %v2832_v54 = vor.u32 %v3657_v48, %v2829_v49  ;;  %v2836_v55 = vor.u32 %v3662_v51, %v2835_v50  ;;  %v2979_v48 = vld [vmem:[%s4062_s9 + $0x178] sm:$0xf]  ;;  %v3698_v49 = vld [vmem:[%s4062_s9 + $0x198] sm:$0xf0] }
  0x44   : > { %1877 = vmatpush.bf16.msrb.mxu2 %v3808_v56  ;;  %v3665_v56 = vld [vmem:[%s4062_s9 + $0x94] sm:$0xf] }
  0x45   : > { %1966 = vmatpush.bf16.msrb.mxu3 %v3816_v57  ;;  %v2857_v57 = vld [vmem:[%s4062_s9 + $0xb4] sm:$0xf0] }
  0x46   : > { %1788 = vmatpush.bf16.msrb.mxu1 %v3800_v58  ;;  %2055 = vmatpush.bf16.msrb.mxu0 %v3824_v59  ;;  %v2863_v58 = vld [vmem:[%s4062_s9 + $0x98] sm:$0xf]  ;;  %v3670_v59 = vld [vmem:[%s4062_s9 + $0xb8] sm:$0xf0]  ;;  %v2860_v0 = vor.u32 %v3665_v56, %v2857_v57  ;;  %v2980_v56 = vor.u32 %v3698_v49, %v2979_v48  ;;  %v3719_v48 = vld [vmem:[%s4062_s9 + $0x244] sm:$0xf] }
  0x47   : > { %v2864_v1 = vor.u32 %v3670_v59, %v2863_v58  ;;  %v3073_v49 = vld [vmem:[%s4062_s9 + $0x264] sm:$0xf0] }
  0x48   : > { %1878 = vmatpush.bf16.msrb.mxu2 %v3807_v61  ;;  %v2865_v61 = vld [vmem:[%s4062_s9 + $0xbc] sm:$0xf0] }
  0x49   : > { %1967 = vmatpush.bf16.msrb.mxu3 %v3815_v62  ;;  %v2871_v62 = vld [vmem:[%s4062_s9 + $0xa0] sm:$0xf]  ;;  %v2868_v2 = vor.u32 %v3666_v60, %v2865_v61 }
  0x4a   : > { %1789 = vmatpush.bf16.msrb.mxu1 %v3799_v6  ;;  %2056 = vmatpush.bf16.msrb.mxu0 %v3823_v7  ;;  %v2872_v3 = vor.u32 %v3671_v63, %v2871_v62  ;;  %v3836_v6 = vld [vmem:[%s4773_s1 + $0x168] sm:$0xff]  ;;  %v3701_v62 = vld [vmem:[%s4062_s9 + $0x1b4] sm:$0xf]  ;;  %v3001_v63 = vld [vmem:[%s4062_s9 + $0x1d4] sm:$0xf0] }
  0x4b   : > { %1731 = vmatmul.bf16.gmra.mxu1 %v3000_v8  ;;  %1751 = vmatmul.bf16.gmra.mxu2 %v3144_v9  ;;  %v3860_v7 = vld [vmem:[%s4773_s1 + $0x228] sm:$0xff]  ;;  %v3674_v8 = vld [vmem:[%s4062_s9 + $0xdc] sm:$0xf]  ;;  %v2893_v9 = vld [vmem:[%s4062_s9 + $0xfc] sm:$0xf0] }
  0x4c   : > { %1771 = vmatmul.bf16.gmra.mxu3 %v3288_v10  ;;  %2227 = vmatpush.bf16.msra.mxu2 %v3846_v12  ;;  %v2899_v10 = vld [vmem:[%s4062_s9 + $0xe0] sm:$0xf]  ;;  %v3675_v12 = vld [vmem:[%s4062_s9 + $0xe4] sm:$0xf]  ;;  %v2896_v16 = vor.u32 %v3674_v8, %v2893_v9  ;;  %v3004_v8 = vor.u32 %v3701_v62, %v3001_v63  ;;  %v3087_v62 = vld [vmem:[%s4062_s9 + $0x250] sm:$0xf] }
  0x4d   : > { %1711 = vmatmul.bf16.gmra.mxu0 %v2856_v11  ;;  %2316 = vmatpush.bf16.msra.mxu3 %v3854_v13  ;;  %v3679_v11 = vld [vmem:[%s4062_s9 + $0x100] sm:$0xf0]  ;;  %v2901_v13 = vld [vmem:[%s4062_s9 + $0x104] sm:$0xf0]  ;;  %v3725_v63 = vld [vmem:[%s4062_s9 + $0x270] sm:$0xf0] }
  0x4e   : > { %2138 = vmatpush.bf16.msra.mxu1 %v3838_v14  ;;  %2405 = vmatpush.bf16.msra.mxu0 %v3862_v15  ;;  %v2907_v14 = vld [vmem:[%s4062_s9 + $0xe8] sm:$0xf]  ;;  %v3680_v15 = vld [vmem:[%s4062_s9 + $0x108] sm:$0xf0]  ;;  %v2900_v17 = vor.u32 %v3679_v11, %v2899_v10  ;;  %v2904_v18 = vor.u32 %v3675_v12, %v2901_v13 }
  0x4f   : > { %v2908_v19 = vor.u32 %v3680_v15, %v2907_v14  ;;  %v3842_v14 = vld [vmem:[%s4773_s1 + $0x198] sm:$0xff] }
  0x50   : > { %2228 = vmatpush.bf16.msra.mxu2 %v3845_v40  ;;  %v3850_v15 = vld [vmem:[%s4773_s1 + $0x1d8] sm:$0xff] }
  0x51   : > { %2317 = vmatpush.bf16.msra.mxu3 %v3853_v41  ;;  %v3859_v41 = vld [vmem:[%s4773_s1 + $0x220] sm:$0xff] }
  0x52   : > { %2139 = vmatpush.bf16.msra.mxu1 %v3837_v42  ;;  %2406 = vmatpush.bf16.msra.mxu0 %v3861_v43  ;;  %v3692_v42 = vld [vmem:[%s4062_s9 + $0x16c] sm:$0xf]  ;;  %v2965_v43 = vld [vmem:[%s4062_s9 + $0x18c] sm:$0xf0] }
  0x54   : > { %2229 = vmatpush.bf16.msra.mxu2 %v3844_v4  ;;  %v3015_v4 = vld [vmem:[%s4062_s9 + $0x1c0] sm:$0xf] }
  0x55   : > { %2318 = vmatpush.bf16.msra.mxu3 %v3852_v5  ;;  %v3707_v5 = vld [vmem:[%s4062_s9 + $0x1e0] sm:$0xf0] }
  0x56   : > { %2140 = vmatpush.bf16.msra.mxu1 %v3836_v6  ;;  %2407 = vmatpush.bf16.msra.mxu0 %v3860_v7  ;;  %v3016_v12 = vor.u32 %v3707_v5, %v3015_v4 }
  0x58   : > { %2230 = vmatpush.bf16.msra.mxu2 %v3843_v34  ;;  %v3040_v34 = vor.u32 %v3710_v22, %v3037_v23 }
  0x59   : > { %2319 = vmatpush.bf16.msra.mxu3 %v3851_v35 }
  0x5a   : > { %2408 = vmatpush.bf16.msra.mxu0 %v3859_v41 }
  0x5b   : > { %1736 = vmatmul.bf16.gmra.mxu1 %v3036_v24  ;;  %1756 = vmatmul.bf16.gmra.mxu2 %v3180_v25  ;;  %v3684_v24 = vld [vmem:[%s4062_s9 + $0x12c] sm:$0xf]  ;;  %v2937_v25 = vld [vmem:[%s4062_s9 + $0x14c] sm:$0xf0] }
  0x5c   : > { %1776 = vmatmul.bf16.gmra.mxu3 %v3324_v26  ;;  %v2943_v26 = vld [vmem:[%s4062_s9 + $0x130] sm:$0xf]  ;;  %v2940_v31 = vor.u32 %v3684_v24, %v2937_v25  ;;  %2231 = vmatpush.bf16.msra.mxu2 %v3842_v14  ;;  %v3043_v24 = vld [vmem:[%s4062_s9 + $0x200] sm:$0xf]  ;;  %v3715_v25 = vld [vmem:[%s4062_s9 + $0x220] sm:$0xf0] }
  0x5d   : > { %1716 = vmatmul.bf16.gmra.mxu0 %v2892_v27  ;;  %v3689_v27 = vld [vmem:[%s4062_s9 + $0x150] sm:$0xf0]  ;;  %2320 = vmatpush.bf16.msra.mxu3 %v3850_v15  ;;  %v3044_v35 = vor.u32 %v3715_v25, %v3043_v24 }
  0x5e   : > { %v2944_v32 = vor.u32 %v3689_v27, %v2943_v26  ;;  %2409 = vmatpush.bf16.msra.mxu0 %v3858_v21  ;;  %v3711_v26 = vld [vmem:[%s4062_s9 + $0x204] sm:$0xf]  ;;  %v3045_v27 = vld [vmem:[%s4062_s9 + $0x224] sm:$0xf0]  ;;  %v3849_v14 = vld [vmem:[%s4773_s1 + $0x1d0] sm:$0xff] }
  0x5f   : > { %v3048_v41 = vor.u32 %v3711_v26, %v3045_v27  ;;  %v3833_v25 = vld [vmem:[%s4773_s1 + $0x150] sm:$0xff]  ;;  %v3728_v27 = vld [vmem:[%s4062_s9 + $0x28c] sm:$0xf] }
  0x60   : > { %v3857_v26 = vld [vmem:[%s4773_s1 + $0x210] sm:$0xff] }
  0x61   : > { %2321 = vmatpush.bf16.msra.mxu3 %v3849_v14 }
  0x62   : > { %2410 = vmatpush.bf16.msra.mxu0 %v3857_v26  ;;  %v3153_v26 = vld [vmem:[%s4062_s9 + $0x2fc] sm:$0xf0] }
  0x6b   : > { %1790 = vmatmul.bf16.vlgmr.msrb.gmra.mxu1 %v2788_v36  ;;  %1879 = vmatmul.bf16.vlgmr.msrb.gmra.mxu2 %v2792_v37 }
  0x6c   : > { %1968 = vmatmul.bf16.vlgmr.msrb.gmra.mxu3 %v2796_v38  ;;  %v3835_v38 = vld [vmem:[%s4773_s1 + $0x160] sm:$0xff] }
  0x6d   : > { %2057 = vmatmul.bf16.vlgmr.msrb.gmra.mxu0 %v2800_v39  ;;  %2141 = vmatpush.bf16.msra.mxu1 %v3835_v38 }
  0x71   : > { %2142 = vmatpush.bf16.msra.mxu1 %v3834_v20 }
  0x75   : > { %2143 = vmatpush.bf16.msra.mxu1 %v3833_v25  ;;  %v3738_v25 = vld [vmem:[%s4062_s9 + $0x2dc] sm:$0xf] }
  0x7b   : > { %1795 = vmatmul.bf16.gmra.mxu1 %v2824_v52  ;;  %1884 = vmatmul.bf16.gmra.mxu2 %v2828_v53  ;;  %v2968_v52 = vor.u32 %v3692_v42, %v2965_v43  ;;  %v2972_v53 = vor.u32 %v3697_v45, %v2971_v44 }
  0x7c   : > { %1973 = vmatmul.bf16.gmra.mxu3 %v2832_v54 }
  0x7d   : > { %2062 = vmatmul.bf16.gmra.mxu0 %v2836_v55  ;;  %v2976_v55 = vor.u32 %v3693_v46, %v2973_v47 }
  0x8b   : > { %1800 = vmatmul.bf16.gmra.mxu1 %v2860_v0  ;;  %1889 = vmatmul.bf16.gmra.mxu2 %v2864_v1  ;;  %v3007_v0 = vld [vmem:[%s4062_s9 + $0x1b8] sm:$0xf]  ;;  %v3706_v1 = vld [vmem:[%s4062_s9 + $0x1d8] sm:$0xf0] }
  0x8c   : > { %1978 = vmatmul.bf16.gmra.mxu3 %v2868_v2  ;;  %v3702_v2 = vld [vmem:[%s4062_s9 + $0x1bc] sm:$0xf]  ;;  %v3008_v9 = vor.u32 %v3706_v1, %v3007_v0 }
  0x8d   : > { %2067 = vmatmul.bf16.gmra.mxu0 %v2872_v3  ;;  %v3009_v3 = vld [vmem:[%s4062_s9 + $0x1dc] sm:$0xf0] }
  0x8e   : > { %v3012_v11 = vor.u32 %v3702_v2, %v3009_v3  ;;  %v3076_v2 = vor.u32 %v3719_v48, %v3073_v49  ;;  %v3734_v48 = vld [vmem:[%s4062_s9 + $0x2b8] sm:$0xf0] }
  0x9b   : > { %1805 = vmatmul.bf16.gmra.mxu1 %v2896_v16  ;;  %1894 = vmatmul.bf16.gmra.mxu2 %v2900_v17 }
  0x9c   : > { %1983 = vmatmul.bf16.gmra.mxu3 %v2904_v18 }
  0x9d   : > { %2072 = vmatmul.bf16.gmra.mxu0 %v2908_v19 }
  0xa8   : > { %v4271_v30 = vpop.f32.mrf.mxu1 }
  0xaa   : > { %v4273_v33 = vpop.f32.mrf.mxu0 }
  0xab   : > { %1810 = vmatmul.bf16.gmra.mxu1 %v2932_v28  ;;  %1899 = vmatmul.bf16.gmra.mxu2 %v2936_v29  ;;  %v3051_v28 = vld [vmem:[%s4062_s9 + $0x208] sm:$0xf]  ;;  %v3716_v29 = vld [vmem:[%s4062_s9 + $0x228] sm:$0xf0] }
  0xac   : > { %1988 = vmatmul.bf16.gmra.mxu3 %v2940_v31  ;;  %v3052_v42 = vor.u32 %v3716_v29, %v3051_v28  ;;  %v3109_v28 = vld [vmem:[%s4062_s9 + $0x2ac] sm:$0xf0] }
  0xad   : > { %2077 = vmatmul.bf16.gmra.mxu0 %v2944_v32 }
  0xae   : > { %v4281_v36 = vpop.f32.mrf.mxu2 }
  0xaf   : > { %v4283_v37 = vpop.f32.mrf.mxu3 }
  0xb0   : > { %v4288_v39 = vpop.f32.mrf.mxu1 }
  0xb2   : > { %v4290_v40 = vpop.f32.mrf.mxu0 }
  0xb6   : > { %v4303_v50 = vpop.f32.mrf.mxu2 }
  0xb7   : > { %v4305_v51 = vpop.f32.mrf.mxu3 }
  0xb8   : > { %v4307_v54 = vpop.f32.mrf.mxu1 }
  0xba   : > { %v4309_v57 = vpop.f32.mrf.mxu0 }
  0xbb   : > { %1815 = vmatmul.bf16.gmra.mxu1 %v2968_v52  ;;  %1904 = vmatmul.bf16.gmra.mxu2 %v2972_v53  ;;  %v3079_v52 = vld [vmem:[%s4062_s9 + $0x248] sm:$0xf]  ;;  %v3724_v53 = vld [vmem:[%s4062_s9 + $0x268] sm:$0xf0] }
  0xbc   : > { %1993 = vmatmul.bf16.gmra.mxu3 %v2976_v55  ;;  %v3720_v55 = vld [vmem:[%s4062_s9 + $0x24c] sm:$0xf]  ;;  %v3080_v3 = vor.u32 %v3724_v53, %v3079_v52 }
  0xbd   : > { %2082 = vmatmul.bf16.gmra.mxu0 %v2980_v56  ;;  %v3081_v56 = vld [vmem:[%s4062_s9 + $0x26c] sm:$0xf0] }
  0xbe   : > { %v4311_v58 = vpop.f32.mrf.mxu2  ;;  %v3084_v5 = vor.u32 %v3720_v55, %v3081_v56  ;;  %v3112_v55 = vor.u32 %v3728_v27, %v3109_v28  ;;  %v3159_v27 = vld [vmem:[%s4062_s9 + $0x2e0] sm:$0xf]  ;;  %v3743_v28 = vld [vmem:[%s4062_s9 + $0x300] sm:$0xf0] }
  0xbf   : > { %v4313_v59 = vpop.f32.mrf.mxu3 }
  0xc0   : > { %v4315_v60 = vpop.f32.mrf.mxu1 }
  0xc2   : > { %v4317_v61 = vpop.f32.mrf.mxu0 }
  0xc6   : > { %v4327_v6 = vpop.f32.mrf.mxu2 }
  0xc7   : > { %v4329_v7 = vpop.f32.mrf.mxu3 }
  0xc8   : > { %v4331_v10 = vpop.f32.mrf.mxu1 }
  0xca   : > { %v4333_v13 = vpop.f32.mrf.mxu0 }
  0xcb   : > { %1820 = vmatmul.bf16.gmra.mxu1 %v3004_v8  ;;  %1909 = vmatmul.bf16.gmra.mxu2 %v3008_v9  ;;  %v3088_v8 = vor.u32 %v3725_v63, %v3087_v62 }
  0xcc   : > { %1998 = vmatmul.bf16.gmra.mxu3 %v3012_v11 }
  0xcd   : > { %2087 = vmatmul.bf16.gmra.mxu0 %v3016_v12  ;;  %v3841_v12 = vld [vmem:[%s4773_s1 + $0x190] sm:$0xff] }
  0xce   : > { %v4341_v16 = vpop.f32.mrf.mxu2  ;;  %2232 = vmatpush.bf16.msra.mxu2 %v3841_v12 }
  0xcf   : > { %v4343_v17 = vpop.f32.mrf.mxu3 }
  0xd0   : > { %v4345_v18 = vpop.f32.mrf.mxu1 }
  0xd2   : > { %v4347_v19 = vpop.f32.mrf.mxu0 }
  0xd6   : > { %v4363_v31 = vpop.f32.mrf.mxu2 }
  0xd7   : > { %v4365_v32 = vpop.f32.mrf.mxu3 }
  0xd8   : > { %v4367_v38 = vpop.f32.mrf.mxu1 }
  0xda   : > { %v4369_v43 = vpop.f32.mrf.mxu0 }
  0xdb   : > { %1825 = vmatmul.bf16.gmra.mxu1 %v3040_v34  ;;  %1914 = vmatmul.bf16.gmra.mxu2 %v3044_v35  ;;  %v3115_v34 = vld [vmem:[%s4062_s9 + $0x290] sm:$0xf]  ;;  %v3733_v35 = vld [vmem:[%s4062_s9 + $0x2b0] sm:$0xf0] }
  0xdc   : > { %2003 = vmatmul.bf16.gmra.mxu3 %v3048_v41  ;;  %v3729_v41 = vld [vmem:[%s4062_s9 + $0x294] sm:$0xf]  ;;  %v3116_v56 = vor.u32 %v3733_v35, %v3115_v34 }
  0xdd   : > { %2092 = vmatmul.bf16.gmra.mxu0 %v3052_v42  ;;  %v3117_v42 = vld [vmem:[%s4062_s9 + $0x2b4] sm:$0xf0] }
  0xde   : > { %v4371_v44 = vpop.f32.mrf.mxu2  ;;  %v3120_v63 = vor.u32 %v3729_v41, %v3117_v42 }
  0xdf   : > { %v4373_v45 = vpop.f32.mrf.mxu3 }
  0xe0   : > { %v4375_v46 = vpop.f32.mrf.mxu1 }
  0xe2   : > { %v4377_v47 = vpop.f32.mrf.mxu0 }
  0xe6   : > { %v4387_v0 = vpop.f32.mrf.mxu2 }
  0xe7   : > { %v4389_v1 = vpop.f32.mrf.mxu3 }
  0xe8   : > { %v1791_v4 = vpop.f32.mrf.mxu1 }
  0xe9   : > { %v1792_v9 = vadd.f32 %v1791_v4, %v4273_v33 }
  0xea   : > { %v2058_v11 = vpop.f32.mrf.mxu0 }
  0xeb   : > { %1830 = vmatmul.bf16.gmra.mxu1 %v3076_v2  ;;  %1919 = vmatmul.bf16.gmra.mxu2 %v3080_v3 }
  0xec   : > { %2008 = vmatmul.bf16.gmra.mxu3 %v3084_v5 }
  0xed   : > { %2097 = vmatmul.bf16.gmra.mxu0 %v3088_v8 }
  0xee   : > { %v1880_v15 = vpop.f32.mrf.mxu2 }
  0xef   : > { %v1881_v33 = vadd.f32 %v1880_v15, %v1792_v9  ;;  %v1969_v20 = vpop.f32.mrf.mxu3 }
  0xf0   : > { %v1793_v21 = vpop.f32.mrf.mxu1 }
  0xf1   : > { %v1970_v22 = vadd.f32 %v1969_v20, %v1881_v33  ;;  %v1794_v23 = vadd.f32 %v1793_v21, %v4290_v40  ;;  %v3123_v40 = vld [vmem:[%s4062_s9 + $0x298] sm:$0xf]  ;;  %v3737_v20 = vld [vmem:[%s4062_s9 + $0x2d4] sm:$0xf] }
  0xf2   : > { %v2060_v24 = vpop.f32.mrf.mxu0  ;;  %v3124_v2 = vor.u32 %v3734_v48, %v3123_v40  ;;  %v3145_v21 = vld [vmem:[%s4062_s9 + $0x2f4] sm:$0xf0] }
  0xf3   : > { %v4407_v29 = vadd.f32 %v2058_v11, %v1970_v22  ;;  %v3148_v42 = vor.u32 %v3737_v20, %v3145_v21  ;;  %v3187_v20 = vld [vmem:[%s4062_s9 + $0x320] sm:$0xf]  ;;  %v3751_v21 = vld [vmem:[%s4062_s9 + $0x340] sm:$0xf0] }
  0xf6   : > { %v1882_v49 = vpop.f32.mrf.mxu2 }
  0xf7   : > { %v1883_v52 = vadd.f32 %v1882_v49, %v1794_v23  ;;  %v1971_v53 = vpop.f32.mrf.mxu3  ;;  %v3151_v23 = vld [vmem:[%s4062_s9 + $0x2d8] sm:$0xf]  ;;  %v3156_v49 = vor.u32 %v3738_v25, %v3153_v26  ;;  %v3752_v25 = vld [vmem:[%s4062_s9 + $0x348] sm:$0xf0] }
  0xf8   : > { %v1796_v62 = vpop.f32.mrf.mxu1 }
  0xf9   : > { %v1972_v3 = vadd.f32 %v1971_v53, %v1883_v52  ;;  %v1797_v4 = vadd.f32 %v1796_v62, %v4309_v57  ;;  %v3160_v52 = vor.u32 %v3743_v28, %v3159_v27  ;;  %v3840_v62 = vld [vmem:[%s4773_s1 + $0x188] sm:$0xff] }
  0xfa   : > { %v2063_v5 = vpop.f32.mrf.mxu0  ;;  %2233 = vmatpush.bf16.msra.mxu2 %v3840_v62 }
  0xfb   : > { %1835 = vmatmul.bf16.gmra.mxu1 %v3112_v55  ;;  %1924 = vmatmul.bf16.gmra.mxu2 %v3116_v56  ;;  %v4416_v8 = vadd.f32 %v2060_v24, %v1972_v3  ;;  %v3742_v24 = vld [vmem:[%s4062_s9 + $0x2f8] sm:$0xf0] }
  0xfc   : > { %2013 = vmatmul.bf16.gmra.mxu3 %v3120_v63  ;;  %v3152_v40 = vor.u32 %v3742_v24, %v3151_v23  ;;  %v3848_v63 = vld [vmem:[%s4773_s1 + $0x1c8] sm:$0xff]  ;;  %v3747_v23 = vld [vmem:[%s4062_s9 + $0x324] sm:$0xf] }
  0xfd   : > { %2102 = vmatmul.bf16.gmra.mxu0 %v3124_v2  ;;  %2322 = vmatpush.bf16.msra.mxu3 %v3848_v63  ;;  %v3189_v24 = vld [vmem:[%s4062_s9 + $0x344] sm:$0xf0] }
  0xfe   : > { %v1885_v9 = vpop.f32.mrf.mxu2 }
  0xff   : > { %v1886_v11 = vadd.f32 %v1885_v9, %v1797_v4  ;;  %v1974_v12 = vpop.f32.mrf.mxu3 }
 0x100   : > { %v1798_v14 = vpop.f32.mrf.mxu1 }
 0x101   : > { %v1975_v15 = vadd.f32 %v1974_v12, %v1886_v11  ;;  %v1799_v57 = vadd.f32 %v1798_v14, %v4317_v61  ;;  %v3832_v12 = vld [vmem:[%s4773_s1 + $0x148] sm:$0xff] }
 0x102   : > { %v2065_v33 = vpop.f32.mrf.mxu0  ;;  %v3856_v14 = vld [vmem:[%s4773_s1 + $0x208] sm:$0xff]  ;;  %2144 = vmatpush.bf16.msra.mxu1 %v3832_v12 }
 0x103   : > { %v4421_v22 = vadd.f32 %v2063_v5, %v1975_v15  ;;  %v3746_v15 = vld [vmem:[%s4062_s9 + $0x31c] sm:$0xf]  ;;  %2411 = vmatpush.bf16.msra.mxu0 %v3856_v14  ;;  %v3756_v12 = vld [vmem:[%s4062_s9 + $0x36c] sm:$0xf]  ;;  %v3225_v14 = vld [vmem:[%s4062_s9 + $0x38c] sm:$0xf0] }
 0x106   : > { %v1887_v34 = vpop.f32.mrf.mxu2 }
 0x107   : > { %v1888_v35 = vadd.f32 %v1887_v34, %v1799_v57  ;;  %v1976_v41 = vpop.f32.mrf.mxu3  ;;  %v3181_v57 = vld [vmem:[%s4062_s9 + $0x33c] sm:$0xf0] }
 0x108   : > { %v1801_v48 = vpop.f32.mrf.mxu1  ;;  %v3184_v34 = vor.u32 %v3746_v15, %v3181_v57  ;;  %v3231_v15 = vld [vmem:[%s4062_s9 + $0x370] sm:$0xf]  ;;  %v3761_v57 = vld [vmem:[%s4062_s9 + $0x390] sm:$0xf0] }
 0x109   : > { %v1977_v61 = vadd.f32 %v1976_v41, %v1888_v35  ;;  %v1802_v53 = vadd.f32 %v1801_v48, %v4333_v13  ;;  %v3188_v35 = vor.u32 %v3751_v21, %v3187_v20 }
 0x10a   : > { %v2068_v55 = vpop.f32.mrf.mxu0 }
 0x10b   : > { %1840 = vmatmul.bf16.gmra.mxu1 %v3148_v42  ;;  %1929 = vmatmul.bf16.gmra.mxu2 %v3152_v40  ;;  %v4430_v56 = vadd.f32 %v2065_v33, %v1977_v61  ;;  %v3192_v42 = vor.u32 %v3747_v23, %v3189_v24 }
 0x10c   : > { %2018 = vmatmul.bf16.gmra.mxu3 %v3156_v49 }
 0x10d   : > { %2107 = vmatmul.bf16.gmra.mxu0 %v3160_v52 }
 0x10e   : > { %v1890_v2 = vpop.f32.mrf.mxu2 }
 0x10f   : > { %v1891_v13 = vadd.f32 %v1890_v2, %v1802_v53  ;;  %v1979_v3 = vpop.f32.mrf.mxu3 }
 0x110   : > { %v1803_v4 = vpop.f32.mrf.mxu1 }
 0x111   : > { %v1980_v5 = vadd.f32 %v1979_v3, %v1891_v13  ;;  %v1804_v9 = vadd.f32 %v1803_v4, %v4347_v19  ;;  %v3195_v19 = vld [vmem:[%s4062_s9 + $0x328] sm:$0xf]  ;;  %v3755_v3 = vld [vmem:[%s4062_s9 + $0x364] sm:$0xf] }
 0x112   : > { %v2070_v11 = vpop.f32.mrf.mxu0  ;;  %v3196_v40 = vor.u32 %v3752_v25, %v3195_v19  ;;  %v3217_v4 = vld [vmem:[%s4062_s9 + $0x384] sm:$0xf0] }
 0x113   : > { %v4447_v33 = vadd.f32 %v2068_v55, %v1980_v5  ;;  %v3220_v24 = vor.u32 %v3755_v3, %v3217_v4  ;;  %v3769_v3 = vld [vmem:[%s4062_s9 + $0x3d0] sm:$0xf0] }
 0x114   : > { %v3765_v4 = vld [vmem:[%s4062_s9 + $0x3b4] sm:$0xf] }
 0x116   : > { %v1892_v26 = vpop.f32.mrf.mxu2 }
 0x117   : > { %v1893_v27 = vadd.f32 %v1892_v26, %v1804_v9  ;;  %v1981_v28 = vpop.f32.mrf.mxu3  ;;  %v3223_v9 = vld [vmem:[%s4062_s9 + $0x368] sm:$0xf]  ;;  %v3228_v26 = vor.u32 %v3756_v12, %v3225_v14  ;;  %v3267_v12 = vld [vmem:[%s4062_s9 + $0x3b8] sm:$0xf]  ;;  %v3770_v14 = vld [vmem:[%s4062_s9 + $0x3d8] sm:$0xf0] }
 0x118   : > { %v1806_v41 = vpop.f32.mrf.mxu1 }
 0x119   : > { %v1982_v48 = vadd.f32 %v1981_v28, %v1893_v27  ;;  %v1807_v49 = vadd.f32 %v1806_v41, %v4369_v43  ;;  %v3232_v27 = vor.u32 %v3761_v57, %v3231_v15  ;;  %v3847_v41 = vld [vmem:[%s4773_s1 + $0x1c0] sm:$0xff] }
 0x11a   : > { %v2073_v52 = vpop.f32.mrf.mxu0  ;;  %2323 = vmatpush.bf16.msra.mxu3 %v3847_v41 }
 0x11b   : > { %1845 = vmatmul.bf16.gmra.mxu1 %v3184_v34  ;;  %1934 = vmatmul.bf16.gmra.mxu2 %v3188_v35  ;;  %v4456_v61 = vadd.f32 %v2070_v11, %v1982_v48  ;;  %v3760_v11 = vld [vmem:[%s4062_s9 + $0x388] sm:$0xf0]  ;;  %v3839_v35 = vld [vmem:[%s4773_s1 + $0x180] sm:$0xff] }
 0x11c   : > { %2023 = vmatmul.bf16.gmra.mxu3 %v3192_v42  ;;  %v3224_v19 = vor.u32 %v3760_v11, %v3223_v9  ;;  %2234 = vmatpush.bf16.msra.mxu2 %v3839_v35  ;;  %v3261_v11 = vld [vmem:[%s4062_s9 + $0x3d4] sm:$0xf0] }
 0x11d   : > { %2112 = vmatmul.bf16.gmra.mxu0 %v3196_v40 }
 0x11e   : > { %v1895_v53 = vpop.f32.mrf.mxu2 }
 0x11f   : > { %v1896_v55 = vadd.f32 %v1895_v53, %v1807_v49  ;;  %v1984_v62 = vpop.f32.mrf.mxu3 }
 0x120   : > { %v1808_v63 = vpop.f32.mrf.mxu1 }
 0x121   : > { %v1985_v2 = vadd.f32 %v1984_v62, %v1896_v55  ;;  %v1809_v43 = vadd.f32 %v1808_v63, %v4377_v47  ;;  %v3831_v62 = vld [vmem:[%s4773_s1 + $0x140] sm:$0xff]  ;;  %v3764_v63 = vld [vmem:[%s4062_s9 + $0x3ac] sm:$0xf] }
 0x122   : > { %v2075_v13 = vpop.f32.mrf.mxu0  ;;  %2145 = vmatpush.bf16.msra.mxu1 %v3831_v62  ;;  %v3295_v62 = vld [vmem:[%s4062_s9 + $0x3f8] sm:$0xf] }
 0x123   : > { %v4461_v5 = vadd.f32 %v2073_v52, %v1985_v2  ;;  %v3253_v2 = vld [vmem:[%s4062_s9 + $0x3cc] sm:$0xf0] }
 0x126   : > { %v1897_v20 = vpop.f32.mrf.mxu2 }
 0x127   : > { %v1898_v21 = vadd.f32 %v1897_v20, %v1809_v43  ;;  %v1986_v23 = vpop.f32.mrf.mxu3 }
 0x128   : > { %v1811_v25 = vpop.f32.mrf.mxu1 }
 0x129   : > { %v1987_v47 = vadd.f32 %v1986_v23, %v1898_v21  ;;  %v1812_v42 = vadd.f32 %v1811_v25, %v4271_v30  ;;  %v3855_v30 = vld [vmem:[%s4773_s1 + $0x200] sm:$0xff]  ;;  %v3256_v21 = vor.u32 %v3764_v63, %v3253_v2  ;;  %v3268_v25 = vor.u32 %v3770_v14, %v3267_v12 }
 0x12a   : > { %v2078_v28 = vpop.f32.mrf.mxu0  ;;  %2412 = vmatpush.bf16.msra.mxu0 %v3855_v30  ;;  %v3774_v30 = vld [vmem:[%s4062_s9 + $0x3fc] sm:$0xf]  ;;  %v3297_v2 = vld [vmem:[%s4062_s9 + $0x41c] sm:$0xf0] }
 0x12b   : > { %1850 = vmatmul.bf16.gmra.mxu1 %v3220_v24  ;;  %1939 = vmatmul.bf16.gmra.mxu2 %v3224_v19  ;;  %v4469_v34 = vadd.f32 %v2075_v13, %v1987_v47  ;;  %v3259_v13 = vld [vmem:[%s4062_s9 + $0x3b0] sm:$0xf]  ;;  %v3264_v19 = vor.u32 %v3765_v4, %v3261_v11 }
 0x12c   : > { %2028 = vmatmul.bf16.gmra.mxu3 %v3228_v26  ;;  %v3260_v23 = vor.u32 %v3769_v3, %v3259_v13  ;;  %v3303_v13 = vld [vmem:[%s4062_s9 + $0x400] sm:$0xf]  ;;  %v3779_v3 = vld [vmem:[%s4062_s9 + $0x420] sm:$0xf0] }
 0x12d   : > { %2117 = vmatmul.bf16.gmra.mxu0 %v3232_v27 }
 0x12e   : > { %v1900_v40 = vpop.f32.mrf.mxu2 }
 0x12f   : > { %v1901_v48 = vadd.f32 %v1900_v40, %v1812_v42  ;;  %v1989_v49 = vpop.f32.mrf.mxu3 }
 0x130   : > { %v1813_v52 = vpop.f32.mrf.mxu1 }
 0x131   : > { %v1990_v53 = vadd.f32 %v1989_v49, %v1901_v48  ;;  %v1814_v9 = vadd.f32 %v1813_v52, %v4288_v39  ;;  %v3773_v49 = vld [vmem:[%s4062_s9 + $0x3f4] sm:$0xf]  ;;  %v3289_v52 = vld [vmem:[%s4062_s9 + $0x414] sm:$0xf0] }
 0x132   : > { %v2080_v55 = vpop.f32.mrf.mxu0  ;;  %v3292_v11 = vor.u32 %v3773_v49, %v3289_v52  ;;  %v3333_v52 = vld [vmem:[%s4062_s9 + $0x464] sm:$0xf0] }
 0x133   : > { %v4486_v43 = vadd.f32 %v2078_v28, %v1990_v53 }
 0x136   : > { %v1902_v15 = vpop.f32.mrf.mxu2 }
 0x137   : > { %v1903_v57 = vadd.f32 %v1902_v15, %v1814_v9  ;;  %v1991_v20 = vpop.f32.mrf.mxu3  ;;  %v3300_v15 = vor.u32 %v3774_v30, %v3297_v2 }
 0x138   : > { %v1816_v24 = vpop.f32.mrf.mxu1 }
 0x139   : > { %v1992_v26 = vadd.f32 %v1991_v20, %v1903_v57  ;;  %v1817_v47 = vadd.f32 %v1816_v24, %v4307_v54  ;;  %v3304_v57 = vor.u32 %v3779_v3, %v3303_v13 }
 0x13a   : > { %v2083_v27 = vpop.f32.mrf.mxu0 }
 0x13b   : > { %1855 = vmatmul.bf16.gmra.mxu1 %v3256_v21  ;;  %1944 = vmatmul.bf16.gmra.mxu2 %v3260_v23  ;;  %v4495_v39 = vadd.f32 %v2080_v55, %v1992_v26  ;;  %v3778_v55 = vld [vmem:[%s4062_s9 + $0x418] sm:$0xf0] }
 0x13c   : > { %2033 = vmatmul.bf16.gmra.mxu3 %v3264_v19  ;;  %v3296_v12 = vor.u32 %v3778_v55, %v3295_v62  ;;  %v3339_v62 = vld [vmem:[%s4062_s9 + $0x448] sm:$0xf]  ;;  %v3788_v55 = vld [vmem:[%s4062_s9 + $0x468] sm:$0xf0] }
 0x13d   : > { %2122 = vmatmul.bf16.gmra.mxu0 %v3268_v25 }
 0x13e   : > { %v1905_v28 = vpop.f32.mrf.mxu2 }
 0x13f   : > { %v1906_v35 = vadd.f32 %v1905_v28, %v1817_v47  ;;  %v1994_v41 = vpop.f32.mrf.mxu3  ;;  %v3782_v28 = vld [vmem:[%s4062_s9 + $0x43c] sm:$0xf] }
 0x140   : > { %v1818_v42 = vpop.f32.mrf.mxu1 }
 0x141   : > { %v1995_v40 = vadd.f32 %v1994_v41, %v1906_v35  ;;  %v1819_v63 = vadd.f32 %v1818_v42, %v4315_v60  ;;  %v3325_v35 = vld [vmem:[%s4062_s9 + $0x45c] sm:$0xf0] }
 0x142   : > { %v2085_v48 = vpop.f32.mrf.mxu0  ;;  %v3331_v42 = vld [vmem:[%s4062_s9 + $0x440] sm:$0xf]  ;;  %v3328_v2 = vor.u32 %v3782_v28, %v3325_v35 }
 0x143   : > { %v4500_v53 = vadd.f32 %v2083_v27, %v1995_v40  ;;  %v3787_v40 = vld [vmem:[%s4062_s9 + $0x460] sm:$0xf0]  ;;  %v2809_v35 = vld [vmem:[%s4062_s9 + $0x3c] sm:$0xf0] }
 0x144   : > { %v3332_v13 = vor.u32 %v3787_v40, %v3331_v42  ;;  %v2815_v42 = vld [vmem:[%s4062_s9 + $0x20] sm:$0xf]  ;;  %v3655_v40 = vld [vmem:[%s4062_s9 + $0x40] sm:$0xf0] }
 0x146   : > { %v1907_v54 = vpop.f32.mrf.mxu2 }
 0x147   : > { %v1908_v4 = vadd.f32 %v1907_v54, %v1819_v63  ;;  %v1996_v9 = vpop.f32.mrf.mxu3 }
 0x148   : > { %v1821_v14 = vpop.f32.mrf.mxu1 }
 0x149   : > { %v1997_v20 = vadd.f32 %v1996_v9, %v1908_v4  ;;  %v1822_v23 = vadd.f32 %v1821_v14, %v4331_v10  ;;  %v3340_v4 = vor.u32 %v3788_v55, %v3339_v62 }
 0x14a   : > { %v2088_v21 = vpop.f32.mrf.mxu0 }
 0x14b   : > { %1860 = vmatmul.bf16.gmra.mxu1 %v3292_v11  ;;  %1949 = vmatmul.bf16.gmra.mxu2 %v3296_v12  ;;  %v4509_v60 = vadd.f32 %v2085_v48, %v1997_v20  ;;  %v3783_v48 = vld [vmem:[%s4062_s9 + $0x444] sm:$0xf] }
 0x14c   : > { %2038 = vmatmul.bf16.gmra.mxu3 %v3300_v15  ;;  %v3336_v54 = vor.u32 %v3783_v48, %v3333_v52 }
 0x14d   : > { %2127 = vmatmul.bf16.gmra.mxu0 %v3304_v57 }
 0x14e   : > { %v1910_v24 = vpop.f32.mrf.mxu2 }
 0x14f   : > { %v1911_v19 = vadd.f32 %v1910_v24, %v1822_v23  ;;  %v1999_v25 = vpop.f32.mrf.mxu3  ;;  %v3649_v24 = vld [vmem:[%s4062_s9 + $0x14] sm:$0xf] }
 0x150   : > { %v1823_v26 = vpop.f32.mrf.mxu1 }
 0x151   : > { %v2000_v27 = vadd.f32 %v1999_v25, %v1911_v19  ;;  %v1824_v49 = vadd.f32 %v1823_v26, %v4345_v18  ;;  %v2801_v19 = vld [vmem:[%s4062_s9 + $0x34] sm:$0xf0] }
 0x152   : > { %v2090_v47 = vpop.f32.mrf.mxu0  ;;  %v2807_v26 = vld [vmem:[%s4062_s9 + $0x18] sm:$0xf]  ;;  %v2804_v52 = vor.u32 %v3649_v24, %v2801_v19  ;;  %v2845_v19 = vld [vmem:[%s4062_s9 + $0x84] sm:$0xf0] }
 0x153   : > { %v4514_v41 = vadd.f32 %v2088_v21, %v2000_v27  ;;  %v3654_v27 = vld [vmem:[%s4062_s9 + $0x38] sm:$0xf0] }
 0x154   : > { %v2808_v62 = vor.u32 %v3654_v27, %v2807_v26  ;;  %v2851_v26 = vld [vmem:[%s4062_s9 + $0x68] sm:$0xf]  ;;  %v3664_v27 = vld [vmem:[%s4062_s9 + $0x88] sm:$0xf0] }
 0x156   : > { %v1912_v10 = vpop.f32.mrf.mxu2 }
 0x157   : > { %v1913_v30 = vadd.f32 %v1912_v10, %v1824_v49  ;;  %v2001_v63 = vpop.f32.mrf.mxu3 }
 0x158   : > { %v1826_v3 = vpop.f32.mrf.mxu1 }
 0x159   : > { %v2002_v9 = vadd.f32 %v2001_v63, %v1913_v30  ;;  %v1827_v12 = vadd.f32 %v1826_v3, %v4367_v38  ;;  %v2816_v30 = vor.u32 %v3655_v40, %v2815_v42 }
 0x15a   : > { %v2093_v11 = vpop.f32.mrf.mxu0 }
 0x15b   : > { %1865 = vmatmul.bf16.gmra.mxu1 %v3328_v2  ;;  %1954 = vmatmul.bf16.gmra.mxu2 %v3332_v13  ;;  %v4523_v18 = vadd.f32 %v2090_v47, %v2002_v9  ;;  %v3650_v47 = vld [vmem:[%s4062_s9 + $0x1c] sm:$0xf] }
 0x15c   : > { %2043 = vmatmul.bf16.gmra.mxu3 %v3336_v54  ;;  %v2812_v10 = vor.u32 %v3650_v47, %v2809_v35 }
 0x15d   : > { %2132 = vmatmul.bf16.gmra.mxu0 %v3340_v4 }
 0x15e   : > { %v1915_v14 = vpop.f32.mrf.mxu2 }
 0x15f   : > { %v1916_v15 = vadd.f32 %v1915_v14, %v1827_v12  ;;  %v2004_v57 = vpop.f32.mrf.mxu3  ;;  %v3658_v14 = vld [vmem:[%s4062_s9 + $0x5c] sm:$0xf] }
 0x160   : > { %v1828_v20 = vpop.f32.mrf.mxu1 }
 0x161   : > { %v2005_v21 = vadd.f32 %v2004_v57, %v1916_v15  ;;  %v1829_v28 = vadd.f32 %v1828_v20, %v4375_v46  ;;  %v2837_v15 = vld [vmem:[%s4062_s9 + $0x7c] sm:$0xf0] }
 0x162   : > { %v2095_v23 = vpop.f32.mrf.mxu0  ;;  %v2843_v20 = vld [vmem:[%s4062_s9 + $0x60] sm:$0xf]  ;;  %v2840_v35 = vor.u32 %v3658_v14, %v2837_v15  ;;  %v2881_v15 = vld [vmem:[%s4062_s9 + $0xcc] sm:$0xf0] }
 0x163   : > { %v4528_v25 = vadd.f32 %v2093_v11, %v2005_v21  ;;  %v3663_v21 = vld [vmem:[%s4062_s9 + $0x80] sm:$0xf0] }
 0x164   : > { %v2844_v42 = vor.u32 %v3663_v21, %v2843_v20  ;;  %v2887_v20 = vld [vmem:[%s4062_s9 + $0xb0] sm:$0xf]  ;;  %v3673_v21 = vld [vmem:[%s4062_s9 + $0xd0] sm:$0xf0] }
 0x166   : > { %v1917_v38 = vpop.f32.mrf.mxu2 }
 0x167   : > { %v1918_v48 = vadd.f32 %v1917_v38, %v1829_v28  ;;  %v2006_v49 = vpop.f32.mrf.mxu3 }
 0x168   : > { %v1831_v55 = vpop.f32.mrf.mxu1 }
 0x169   : > { %v2007_v63 = vadd.f32 %v2006_v49, %v1918_v48  ;;  %v1832_v13 = vadd.f32 %v1831_v55, %v4281_v36  ;;  %v2852_v48 = vor.u32 %v3664_v27, %v2851_v26 }
 0x16a   : > { %v2098_v2 = vpop.f32.mrf.mxu0 }
 0x16b   : > { %2146 = vmatmul.bf16.vlgmr.msra.gmra.mxu1 %v2804_v52  ;;  %2235 = vmatmul.bf16.vlgmr.msra.gmra.mxu2 %v2808_v62  ;;  %v4537_v46 = vadd.f32 %v2095_v23, %v2007_v63  ;;  %v3659_v23 = vld [vmem:[%s4062_s9 + $0x64] sm:$0xf] }
 0x16c   : > { %2324 = vmatmul.bf16.vlgmr.msra.gmra.mxu3 %v2812_v10  ;;  %v2848_v38 = vor.u32 %v3659_v23, %v2845_v19 }
 0x16d   : > { %2413 = vmatmul.bf16.vlgmr.msra.gmra.mxu0 %v2816_v30 }
 0x16e   : > { %v1920_v3 = vpop.f32.mrf.mxu2 }
 0x16f   : > { %v1921_v54 = vadd.f32 %v1920_v3, %v1832_v13  ;;  %v2009_v4 = vpop.f32.mrf.mxu3  ;;  %v3667_v3 = vld [vmem:[%s4062_s9 + $0xa4] sm:$0xf] }
 0x170   : > { %v1833_v9 = vpop.f32.mrf.mxu1 }
 0x171   : > { %v2010_v11 = vadd.f32 %v2009_v4, %v1921_v54  ;;  %v1834_v24 = vadd.f32 %v1833_v9, %v4303_v50  ;;  %v2873_v54 = vld [vmem:[%s4062_s9 + $0xc4] sm:$0xf0] }
 0x172   : > { %v2100_v12 = vpop.f32.mrf.mxu0  ;;  %v2879_v9 = vld [vmem:[%s4062_s9 + $0xa8] sm:$0xf]  ;;  %v2876_v19 = vor.u32 %v3667_v3, %v2873_v54  ;;  %v2917_v54 = vld [vmem:[%s4062_s9 + $0x114] sm:$0xf0] }
 0x173   : > { %v4542_v57 = vadd.f32 %v2098_v2, %v2010_v11  ;;  %v3672_v11 = vld [vmem:[%s4062_s9 + $0xc8] sm:$0xf0] }
 0x174   : > { %v2880_v26 = vor.u32 %v3672_v11, %v2879_v9  ;;  %v2923_v9 = vld [vmem:[%s4062_s9 + $0xf8] sm:$0xf]  ;;  %v3682_v11 = vld [vmem:[%s4062_s9 + $0x118] sm:$0xf0] }
 0x176   : > { %v1922_v36 = vpop.f32.mrf.mxu2 }
 0x177   : > { %v1923_v47 = vadd.f32 %v1922_v36, %v1834_v24  ;;  %v2011_v28 = vpop.f32.mrf.mxu3 }
 0x178   : > { %v1836_v40 = vpop.f32.mrf.mxu1 }
 0x179   : > { %v2012_v49 = vadd.f32 %v2011_v28, %v1923_v47  ;;  %v1837_v62 = vadd.f32 %v1836_v40, %v4311_v58  ;;  %v2888_v47 = vor.u32 %v3673_v21, %v2887_v20 }
 0x17a   : > { %v2103_v52 = vpop.f32.mrf.mxu0 }
 0x17b   : > { %2151 = vmatmul.bf16.gmra.mxu1 %v2840_v35  ;;  %2240 = vmatmul.bf16.gmra.mxu2 %v2844_v42  ;;  %v4551_v50 = vadd.f32 %v2100_v12, %v2012_v49  ;;  %v3668_v12 = vld [vmem:[%s4062_s9 + $0xac] sm:$0xf] }
 0x17c   : > { %2329 = vmatmul.bf16.gmra.mxu3 %v2848_v38  ;;  %v2884_v36 = vor.u32 %v3668_v12, %v2881_v15 }
 0x17d   : > { %2418 = vmatmul.bf16.gmra.mxu0 %v2852_v48 }
 0x17e   : > { %v1925_v55 = vpop.f32.mrf.mxu2 }
 0x17f   : > { %v1926_v10 = vadd.f32 %v1925_v55, %v1837_v62  ;;  %v2014_v30 = vpop.f32.mrf.mxu3  ;;  %v3676_v55 = vld [vmem:[%s4062_s9 + $0xec] sm:$0xf] }
 0x180   : > { %v1838_v63 = vpop.f32.mrf.mxu1 }
 0x181   : > { %v2015_v2 = vadd.f32 %v2014_v30, %v1926_v10  ;;  %v1839_v14 = vadd.f32 %v1838_v63, %v4327_v6  ;;  %v2909_v10 = vld [vmem:[%s4062_s9 + $0x10c] sm:$0xf0] }
 0x182   : > { %v2105_v13 = vpop.f32.mrf.mxu0  ;;  %v2915_v63 = vld [vmem:[%s4062_s9 + $0xf0] sm:$0xf]  ;;  %v2912_v15 = vor.u32 %v3676_v55, %v2909_v10  ;;  %v2953_v10 = vld [vmem:[%s4062_s9 + $0x15c] sm:$0xf0] }
 0x183   : > { %v4556_v4 = vadd.f32 %v2103_v52, %v2015_v2  ;;  %v3681_v2 = vld [vmem:[%s4062_s9 + $0x110] sm:$0xf0] }
 0x184   : > { %v2916_v20 = vor.u32 %v3681_v2, %v2915_v63  ;;  %v2959_v63 = vld [vmem:[%s4062_s9 + $0x140] sm:$0xf]  ;;  %v3691_v2 = vld [vmem:[%s4062_s9 + $0x160] sm:$0xf0] }
 0x186   : > { %v1927_v58 = vpop.f32.mrf.mxu2 }
 0x187   : > { %v1928_v23 = vadd.f32 %v1927_v58, %v1839_v14  ;;  %v2016_v24 = vpop.f32.mrf.mxu3 }
 0x188   : > { %v1841_v27 = vpop.f32.mrf.mxu1 }
 0x189   : > { %v2017_v28 = vadd.f32 %v2016_v24, %v1928_v23  ;;  %v1842_v42 = vadd.f32 %v1841_v27, %v4341_v16  ;;  %v2924_v23 = vor.u32 %v3682_v11, %v2923_v9 }
 0x18a   : > { %v2108_v35 = vpop.f32.mrf.mxu0 }
 0x18b   : > { %2156 = vmatmul.bf16.gmra.mxu1 %v2876_v19  ;;  %2245 = vmatmul.bf16.gmra.mxu2 %v2880_v26  ;;  %v4565_v6 = vadd.f32 %v2105_v13, %v2017_v28  ;;  %v3677_v13 = vld [vmem:[%s4062_s9 + $0xf4] sm:$0xf] }
 0x18c   : > { %2334 = vmatmul.bf16.gmra.mxu3 %v2884_v36  ;;  %v2920_v58 = vor.u32 %v3677_v13, %v2917_v54 }
 0x18d   : > { %2423 = vmatmul.bf16.gmra.mxu0 %v2888_v47 }
 0x18e   : > { %v1930_v40 = vpop.f32.mrf.mxu2 }
 0x18f   : > { %v1931_v38 = vadd.f32 %v1930_v40, %v1842_v42  ;;  %v2019_v48 = vpop.f32.mrf.mxu3  ;;  %v3685_v40 = vld [vmem:[%s4062_s9 + $0x134] sm:$0xf] }
 0x190   : > { %v1843_v49 = vpop.f32.mrf.mxu1 }
 0x191   : > { %v2020_v52 = vadd.f32 %v2019_v48, %v1931_v38  ;;  %v1844_v3 = vadd.f32 %v1843_v49, %v4363_v31  ;;  %v2945_v38 = vld [vmem:[%s4062_s9 + $0x154] sm:$0xf0] }
 0x192   : > { %v2110_v62 = vpop.f32.mrf.mxu0  ;;  %v2951_v49 = vld [vmem:[%s4062_s9 + $0x138] sm:$0xf]  ;;  %v2948_v54 = vor.u32 %v3685_v40, %v2945_v38  ;;  %v2989_v38 = vld [vmem:[%s4062_s9 + $0x1a4] sm:$0xf0] }
 0x193   : > { %v4570_v30 = vadd.f32 %v2108_v35, %v2020_v52  ;;  %v3690_v52 = vld [vmem:[%s4062_s9 + $0x158] sm:$0xf0] }
 0x194   : > { %v2952_v9 = vor.u32 %v3690_v52, %v2951_v49  ;;  %v2995_v49 = vld [vmem:[%s4062_s9 + $0x188] sm:$0xf]  ;;  %v3700_v52 = vld [vmem:[%s4062_s9 + $0x1a8] sm:$0xf0] }
 0x196   : > { %v1932_v16 = vpop.f32.mrf.mxu2 }
 0x197   : > { %v1933_v12 = vadd.f32 %v1932_v16, %v1844_v3  ;;  %v2021_v14 = vpop.f32.mrf.mxu3 }
 0x198   : > { %v1846_v21 = vpop.f32.mrf.mxu1 }
 0x199   : > { %v2022_v24 = vadd.f32 %v2021_v14, %v1933_v12  ;;  %v1847_v26 = vadd.f32 %v1846_v21, %v4371_v44  ;;  %v2960_v12 = vor.u32 %v3691_v2, %v2959_v63 }
 0x19a   : > { %v2113_v19 = vpop.f32.mrf.mxu0 }
 0x19b   : > { %2161 = vmatmul.bf16.gmra.mxu1 %v2912_v15  ;;  %2250 = vmatmul.bf16.gmra.mxu2 %v2916_v20  ;;  %v4579_v31 = vadd.f32 %v2110_v62, %v2022_v24  ;;  %v3686_v62 = vld [vmem:[%s4062_s9 + $0x13c] sm:$0xf] }
 0x19c   : > { %2339 = vmatmul.bf16.gmra.mxu3 %v2920_v58  ;;  %v2956_v16 = vor.u32 %v3686_v62, %v2953_v10 }
 0x19d   : > { %2428 = vmatmul.bf16.gmra.mxu0 %v2924_v23 }
 0x19e   : > { %v1935_v27 = vpop.f32.mrf.mxu2 }
 0x19f   : > { %v1936_v36 = vadd.f32 %v1935_v27, %v1847_v26  ;;  %v2024_v47 = vpop.f32.mrf.mxu3  ;;  %v3694_v27 = vld [vmem:[%s4062_s9 + $0x17c] sm:$0xf] }
 0x1a0   : > { %v1848_v28 = vpop.f32.mrf.mxu1 }
 0x1a1   : > { %v2025_v35 = vadd.f32 %v2024_v47, %v1936_v36  ;;  %v1849_v55 = vadd.f32 %v1848_v28, %v4387_v0  ;;  %v2981_v36 = vld [vmem:[%s4062_s9 + $0x19c] sm:$0xf0] }
 0x1a2   : > { %v2115_v42 = vpop.f32.mrf.mxu0  ;;  %v2987_v28 = vld [vmem:[%s4062_s9 + $0x180] sm:$0xf]  ;;  %v2984_v10 = vor.u32 %v3694_v27, %v2981_v36  ;;  %v3025_v36 = vld [vmem:[%s4062_s9 + $0x1ec] sm:$0xf0] }
 0x1a3   : > { %v4584_v48 = vadd.f32 %v2113_v19, %v2025_v35  ;;  %v3699_v35 = vld [vmem:[%s4062_s9 + $0x1a0] sm:$0xf0] }
 0x1a4   : > { %v2988_v63 = vor.u32 %v3699_v35, %v2987_v28  ;;  %v3031_v28 = vld [vmem:[%s4062_s9 + $0x1d0] sm:$0xf]  ;;  %v3709_v35 = vld [vmem:[%s4062_s9 + $0x1f0] sm:$0xf0] }
 0x1a6   : > { %v1937_v44 = vpop.f32.mrf.mxu2 }
 0x1a7   : > { %v1938_v13 = vadd.f32 %v1937_v44, %v1849_v55  ;;  %v2026_v3 = vpop.f32.mrf.mxu3 }
 0x1a8   : > { %v1851_v11 = vpop.f32.mrf.mxu1 }
 0x1a9   : > { %v2027_v14 = vadd.f32 %v2026_v3, %v1938_v13  ;;  %v1852_v20 = vadd.f32 %v1851_v11, %v4283_v37  ;;  %v2996_v13 = vor.u32 %v3700_v52, %v2995_v49 }
 0x1aa   : > { %v2118_v15 = vpop.f32.mrf.mxu0 }
 0x1ab   : > { %2166 = vmatmul.bf16.gmra.mxu1 %v2948_v54  ;;  %2255 = vmatmul.bf16.gmra.mxu2 %v2952_v9  ;;  %v4593_v0 = vadd.f32 %v2115_v42, %v2027_v14  ;;  %v3695_v42 = vld [vmem:[%s4062_s9 + $0x184] sm:$0xf] }
 0x1ac   : > { %2344 = vmatmul.bf16.gmra.mxu3 %v2956_v16  ;;  %v2992_v44 = vor.u32 %v3695_v42, %v2989_v38 }
 0x1ad   : > { %2433 = vmatmul.bf16.gmra.mxu0 %v2960_v12 }
 0x1ae   : > { %v1940_v21 = vpop.f32.mrf.mxu2 }
 0x1af   : > { %v1941_v58 = vadd.f32 %v1940_v21, %v1852_v20  ;;  %v2029_v23 = vpop.f32.mrf.mxu3  ;;  %v3703_v21 = vld [vmem:[%s4062_s9 + $0x1c4] sm:$0xf] }
 0x1b0   : > { %v1853_v24 = vpop.f32.mrf.mxu1 }
 0x1b1   : > { %v2030_v19 = vadd.f32 %v2029_v23, %v1941_v58  ;;  %v1854_v40 = vadd.f32 %v1853_v24, %v4305_v51  ;;  %v3017_v58 = vld [vmem:[%s4062_s9 + $0x1e4] sm:$0xf0] }
 0x1b2   : > { %v2120_v26 = vpop.f32.mrf.mxu0  ;;  %v3023_v24 = vld [vmem:[%s4062_s9 + $0x1c8] sm:$0xf]  ;;  %v3020_v38 = vor.u32 %v3703_v21, %v3017_v58  ;;  %v3061_v58 = vld [vmem:[%s4062_s9 + $0x234] sm:$0xf0] }
 0x1b3   : > { %v4598_v47 = vadd.f32 %v2118_v15, %v2030_v19  ;;  %v3708_v19 = vld [vmem:[%s4062_s9 + $0x1e8] sm:$0xf0] }
 0x1b4   : > { %v3024_v49 = vor.u32 %v3708_v19, %v3023_v24  ;;  %v3067_v24 = vld [vmem:[%s4062_s9 + $0x218] sm:$0xf]  ;;  %v3718_v19 = vld [vmem:[%s4062_s9 + $0x238] sm:$0xf0] }
 0x1b6   : > { %v1942_v37 = vpop.f32.mrf.mxu2 }
 0x1b7   : > { %v1943_v62 = vadd.f32 %v1942_v37, %v1854_v40  ;;  %v2031_v55 = vpop.f32.mrf.mxu3 }
 0x1b8   : > { %v1856_v2 = vpop.f32.mrf.mxu1 }
 0x1b9   : > { %v2032_v3 = vadd.f32 %v2031_v55, %v1943_v62  ;;  %v1857_v9 = vadd.f32 %v1856_v2, %v4313_v59  ;;  %v3032_v62 = vor.u32 %v3709_v35, %v3031_v28 }
 0x1ba   : > { %v2123_v54 = vpop.f32.mrf.mxu0 }
 0x1bb   : > { %2171 = vmatmul.bf16.gmra.mxu1 %v2984_v10  ;;  %2260 = vmatmul.bf16.gmra.mxu2 %v2988_v63  ;;  %v4607_v51 = vadd.f32 %v2120_v26, %v2032_v3  ;;  %v3704_v26 = vld [vmem:[%s4062_s9 + $0x1cc] sm:$0xf] }
 0x1bc   : > { %2349 = vmatmul.bf16.gmra.mxu3 %v2992_v44  ;;  %v3028_v37 = vor.u32 %v3704_v26, %v3025_v36 }
 0x1bd   : > { %2438 = vmatmul.bf16.gmra.mxu0 %v2996_v13 }
 0x1be   : > { %v1945_v11 = vpop.f32.mrf.mxu2 }
 0x1bf   : > { %v1946_v16 = vadd.f32 %v1945_v11, %v1857_v9  ;;  %v2034_v12 = vpop.f32.mrf.mxu3  ;;  %v3712_v11 = vld [vmem:[%s4062_s9 + $0x20c] sm:$0xf] }
 0x1c0   : > { %v1858_v14 = vpop.f32.mrf.mxu1 }
 0x1c1   : > { %v2035_v15 = vadd.f32 %v2034_v12, %v1946_v16  ;;  %v1859_v27 = vadd.f32 %v1858_v14, %v4329_v7  ;;  %v3053_v16 = vld [vmem:[%s4062_s9 + $0x22c] sm:$0xf0] }
 0x1c2   : > { %v2125_v20 = vpop.f32.mrf.mxu0  ;;  %v3059_v14 = vld [vmem:[%s4062_s9 + $0x210] sm:$0xf]  ;;  %v3056_v36 = vor.u32 %v3712_v11, %v3053_v16  ;;  %v3097_v16 = vld [vmem:[%s4062_s9 + $0x27c] sm:$0xf0] }
 0x1c3   : > { %v4612_v23 = vadd.f32 %v2123_v54, %v2035_v15  ;;  %v3717_v15 = vld [vmem:[%s4062_s9 + $0x230] sm:$0xf0] }
 0x1c4   : > { %v3060_v28 = vor.u32 %v3717_v15, %v3059_v14  ;;  %v3103_v14 = vld [vmem:[%s4062_s9 + $0x260] sm:$0xf]  ;;  %v3727_v15 = vld [vmem:[%s4062_s9 + $0x280] sm:$0xf0] }
 0x1c6   : > { %v1947_v59 = vpop.f32.mrf.mxu2 }
 0x1c7   : > { %v1948_v42 = vadd.f32 %v1947_v59, %v1859_v27  ;;  %v2036_v40 = vpop.f32.mrf.mxu3 }
 0x1c8   : > { %v1861_v52 = vpop.f32.mrf.mxu1 }
 0x1c9   : > { %v2037_v55 = vadd.f32 %v2036_v40, %v1948_v42  ;;  %v1862_v63 = vadd.f32 %v1861_v52, %v4343_v17  ;;  %v3068_v42 = vor.u32 %v3718_v19, %v3067_v24 }
 0x1ca   : > { %v2128_v10 = vpop.f32.mrf.mxu0 }
 0x1cb   : > { %2176 = vmatmul.bf16.gmra.mxu1 %v3020_v38  ;;  %2265 = vmatmul.bf16.gmra.mxu2 %v3024_v49  ;;  %v4621_v7 = vadd.f32 %v2125_v20, %v2037_v55  ;;  %v3713_v20 = vld [vmem:[%s4062_s9 + $0x214] sm:$0xf] }
 0x1cc   : > { %2354 = vmatmul.bf16.gmra.mxu3 %v3028_v37  ;;  %v3064_v59 = vor.u32 %v3713_v20, %v3061_v58 }
 0x1cd   : > { %2443 = vmatmul.bf16.gmra.mxu0 %v3032_v62 }
 0x1ce   : > { %v1950_v2 = vpop.f32.mrf.mxu2 }
 0x1cf   : > { %v1951_v44 = vadd.f32 %v1950_v2, %v1862_v63  ;;  %v2039_v13 = vpop.f32.mrf.mxu3  ;;  %v3721_v2 = vld [vmem:[%s4062_s9 + $0x254] sm:$0xf] }
 0x1d0   : > { %v1863_v3 = vpop.f32.mrf.mxu1 }
 0x1d1   : > { %v2040_v54 = vadd.f32 %v2039_v13, %v1951_v44  ;;  %v1864_v21 = vadd.f32 %v1863_v3, %v4365_v32  ;;  %v3089_v44 = vld [vmem:[%s4062_s9 + $0x274] sm:$0xf0] }
 0x1d2   : > { %v2130_v9 = vpop.f32.mrf.mxu0  ;;  %v3095_v3 = vld [vmem:[%s4062_s9 + $0x258] sm:$0xf]  ;;  %v3092_v58 = vor.u32 %v3721_v2, %v3089_v44  ;;  %v3133_v2 = vld [vmem:[%s4062_s9 + $0x2c4] sm:$0xf0] }
 0x1d3   : > { %v4626_v12 = vadd.f32 %v2128_v10, %v2040_v54  ;;  %v3726_v54 = vld [vmem:[%s4062_s9 + $0x278] sm:$0xf0]  ;;  %v3139_v44 = vld [vmem:[%s4062_s9 + $0x2a8] sm:$0xf] }
 0x1d4   : > { %v3096_v24 = vor.u32 %v3726_v54, %v3095_v3  ;;  %v3736_v3 = vld [vmem:[%s4062_s9 + $0x2c8] sm:$0xf0] }
 0x1d6   : > { %v1952_v17 = vpop.f32.mrf.mxu2 }
 0x1d7   : > { %v1953_v26 = vadd.f32 %v1952_v17, %v1864_v21  ;;  %v2041_v27 = vpop.f32.mrf.mxu3 }
 0x1d8   : > { %v1866_v35 = vpop.f32.mrf.mxu1 }
 0x1d9   : > { %v2042_v40 = vadd.f32 %v2041_v27, %v1953_v26  ;;  %v1867_v49 = vadd.f32 %v1866_v35, %v4373_v45  ;;  %v3104_v26 = vor.u32 %v3727_v15, %v3103_v14 }
 0x1da   : > { %v2133_v38 = vpop.f32.mrf.mxu0 }
 0x1db   : > { %2181 = vmatmul.bf16.gmra.mxu1 %v3056_v36  ;;  %2270 = vmatmul.bf16.gmra.mxu2 %v3060_v28  ;;  %v4635_v32 = vadd.f32 %v2130_v9, %v2042_v40  ;;  %v3722_v9 = vld [vmem:[%s4062_s9 + $0x25c] sm:$0xf] }
 0x1dc   : > { %2359 = vmatmul.bf16.gmra.mxu3 %v3064_v59  ;;  %v3100_v17 = vor.u32 %v3722_v9, %v3097_v16 }
 0x1dd   : > { %2448 = vmatmul.bf16.gmra.mxu0 %v3068_v42 }
 0x1de   : > { %v1955_v52 = vpop.f32.mrf.mxu2 }
 0x1df   : > { %v1956_v37 = vadd.f32 %v1955_v52, %v1867_v49  ;;  %v2044_v62 = vpop.f32.mrf.mxu3  ;;  %v3730_v49 = vld [vmem:[%s4062_s9 + $0x29c] sm:$0xf]  ;;  %v3125_v52 = vld [vmem:[%s4062_s9 + $0x2bc] sm:$0xf0] }
 0x1e0   : > { %v1868_v55 = vpop.f32.mrf.mxu1 }
 0x1e1   : > { %v2045_v10 = vadd.f32 %v2044_v62, %v1956_v37  ;;  %v1869_v11 = vadd.f32 %v1868_v55, %v4389_v1  ;;  %v3131_v62 = vld [vmem:[%s4062_s9 + $0x2a0] sm:$0xf]  ;;  %v3735_v55 = vld [vmem:[%s4062_s9 + $0x2c0] sm:$0xf0] }
 0x1e2   : > { %v2135_v63 = vpop.f32.mrf.mxu0  ;;  %v3132_v16 = vor.u32 %v3735_v55, %v3131_v62  ;;  %v3167_v62 = vld [vmem:[%s4062_s9 + $0x2e8] sm:$0xf]  ;;  %v3744_v55 = vld [vmem:[%s4062_s9 + $0x308] sm:$0xf0] }
 0x1e3   : > { %v4640_v13 = vadd.f32 %v2133_v38, %v2045_v10  ;;  %v3731_v10 = vld [vmem:[%s4062_s9 + $0x2a4] sm:$0xf] }
 0x1e6   : > { %v1957_v45 = vpop.f32.mrf.mxu2 }
 0x1e7   : > { %v1958_v20 = vadd.f32 %v1957_v45, %v1869_v11  ;;  %v2046_v21 = vpop.f32.mrf.mxu3  ;;  %v3128_v11 = vor.u32 %v3730_v49, %v3125_v52  ;;  %v3136_v45 = vor.u32 %v3731_v10, %v3133_v2  ;;  %v3739_v52 = vld [vmem:[%s4062_s9 + $0x2e4] sm:$0xf]  ;;  %v3740_v10 = vld [vmem:[%s4062_s9 + $0x2ec] sm:$0xf] }
 0x1e8   : > { %v2147_v19 = vpop.f32.mrf.mxu1 }
 0x1e9   : > { %v2047_v27 = vadd.f32 %v2046_v21, %v1958_v20  ;;  %v2148_v28 = vadd.f32 %v2147_v19, %v4407_v29  ;;  %v3140_v20 = vor.u32 %v3736_v3, %v3139_v44  ;;  %v3169_v44 = vld [vmem:[%s4062_s9 + $0x30c] sm:$0xf0] }
 0x1ea   : > { %v2414_v36 = vpop.f32.mrf.mxu0  ;;  %v3175_v3 = vld [vmem:[%s4062_s9 + $0x2f0] sm:$0xf] }
 0x1eb   : > { %2186 = vmatmul.bf16.gmra.mxu1 %v3092_v58  ;;  %2275 = vmatmul.bf16.gmra.mxu2 %v3096_v24  ;;  %v4649_v1 = vadd.f32 %v2135_v63, %v2047_v27 }
 0x1ec   : > { %2364 = vmatmul.bf16.gmra.mxu3 %v3100_v17 }
 0x1ed   : > { %2453 = vmatmul.bf16.gmra.mxu0 %v3104_v26 }
 0x1ee   : > { %v2236_v35 = vpop.f32.mrf.mxu2 }
 0x1ef   : > { %v2325_v59 = vpop.f32.mrf.mxu3  ;;  %v2237_v42 = vadd.f32 %v2236_v35, %v2148_v28 }
 0x1f0   : > { %v2149_v40 = vpop.f32.mrf.mxu1 }
 0x1f1   : > { %v2326_v37 = vadd.f32 %v2325_v59, %v2237_v42  ;;  %v2150_v63 = vadd.f32 %v2149_v40, %v4416_v8 }
 0x1f2   : > { %v2416_v38 = vpop.f32.mrf.mxu0 }
 0x1f3   : > { %v2415_v14 = vadd.f32 %v2414_v36, %v2326_v37  ;;  %v3161_v37 = vld [vmem:[%s4062_s9 + $0x304] sm:$0xf0] }
 0x1f5   : > { %v2595_v19 = vmul.f32 %v2415_v14, %v2415_v14 }
 0x1f6   : > { %v2238_v54 = vpop.f32.mrf.mxu2 }
 0x1f7   : > { %v2239_v9 = vadd.f32 %v2238_v54, %v2150_v63  ;;  %v2327_v29 = vpop.f32.mrf.mxu3  ;;  %v3745_v54 = vld [vmem:[%s4062_s9 + $0x310] sm:$0xf0] }
 0x1f8   : > { %v2152_v15 = vpop.f32.mrf.mxu1 }
 0x1f9   : > { %v2328_v21 = vadd.f32 %v2327_v29, %v2239_v9  ;;  %v2153_v27 = vadd.f32 %v2152_v15, %v4421_v22  ;;  %v3168_v15 = vor.u32 %v3744_v55, %v3167_v62  ;;  %v3753_v62 = vld [vmem:[%s4062_s9 + $0x350] sm:$0xf0] }
 0x1fa   : > { %v2419_v58 = vpop.f32.mrf.mxu0  ;;  %v3749_v55 = vld [vmem:[%s4062_s9 + $0x334] sm:$0xf] }
 0x1fb   : > { %v2417_v24 = vadd.f32 %v2416_v38, %v2328_v21  ;;  %2191 = vmatmul.bf16.gmra.mxu1 %v3128_v11  ;;  %2280 = vmatmul.bf16.gmra.mxu2 %v3132_v16  ;;  %v3176_v21 = vor.u32 %v3745_v54, %v3175_v3 }
 0x1fc   : > { %2369 = vmatmul.bf16.gmra.mxu3 %v3136_v45 }
 0x1fd   : > { %2458 = vmatmul.bf16.gmra.mxu0 %v3140_v20  ;;  %v3866_v8 = vpack.c.bf16 %v2417_v24, %v2415_v14  ;;  %v2558_v17 = vadd.f32 %v2417_v24, %v2415_v14  ;;  %v2596_v26 = vmul.f32 %v2417_v24, %v2417_v24  ;;  %v3164_v14 = vor.u32 %v3739_v52, %v3161_v37  ;;  %v3748_v52 = vld [vmem:[%s4062_s9 + $0x32c] sm:$0xf]  ;;  %v3203_v37 = vld [vmem:[%s4062_s9 + $0x330] sm:$0xf] }
 0x1fe   : > { %v2241_v36 = vpop.f32.mrf.mxu2  ;;  %v3172_v20 = vor.u32 %v3740_v10, %v3169_v44  ;;  %v3754_v44 = vld [vmem:[%s4062_s9 + $0x358] sm:$0xf0] }
 0x1ff   : > { %3867 = vst [vmem:[%s4665_s11] sm:$0xff] %v3866_v8   ;;  %v2627_v28 = vadd.f32 %v2596_v26, %v2595_v19  ;;  %v2242_v35 = vadd.f32 %v2241_v36, %v2153_v27  ;;  %v2330_v59 = vpop.f32.mrf.mxu3 }
 0x200   : > { %v2154_v42 = vpop.f32.mrf.mxu1 }
 0x201   : > { %v2331_v40 = vadd.f32 %v2330_v59, %v2242_v35  ;;  %v2155_v22 = vadd.f32 %v2154_v42, %v4430_v56 }
 0x202   : > { %v2421_v38 = vpop.f32.mrf.mxu0 }
 0x203   : > { %v2420_v49 = vadd.f32 %v2419_v58, %v2331_v40 }
 0x205   : > { %v2559_v63 = vadd.f32 %v2558_v17, %v2420_v49  ;;  %v2597_v2 = vmul.f32 %v2420_v49, %v2420_v49 }
 0x206   : > { %v2243_v9 = vpop.f32.mrf.mxu2 }
 0x207   : > { %v2628_v29 = vadd.f32 %v2627_v28, %v2597_v2  ;;  %v2244_v11 = vadd.f32 %v2243_v9, %v2155_v22  ;;  %v2332_v16 = vpop.f32.mrf.mxu3  ;;  %v3205_v2 = vld [vmem:[%s4062_s9 + $0x354] sm:$0xf0] }
 0x208   : > { %v2157_v45 = vpop.f32.mrf.mxu1  ;;  %v3211_v22 = vld [vmem:[%s4062_s9 + $0x338] sm:$0xf] }
 0x209   : > { %v2333_v58 = vadd.f32 %v2332_v16, %v2244_v11  ;;  %v2158_v26 = vadd.f32 %v2157_v45, %v4447_v33  ;;  %v3204_v16 = vor.u32 %v3753_v62, %v3203_v37  ;;  %v3212_v45 = vor.u32 %v3754_v44, %v3211_v22 }
 0x20a   : > { %v2424_v24 = vpop.f32.mrf.mxu0 }
 0x20b   : > { %v2422_v19 = vadd.f32 %v2421_v38, %v2333_v58  ;;  %2196 = vmatmul.bf16.gmra.mxu1 %v3164_v14  ;;  %2285 = vmatmul.bf16.gmra.mxu2 %v3168_v15  ;;  %v3208_v15 = vor.u32 %v3749_v55, %v3205_v2  ;;  %v3241_v55 = vld [vmem:[%s4062_s9 + $0x39c] sm:$0xf0] }
 0x20c   : > { %2374 = vmatmul.bf16.gmra.mxu3 %v3172_v20 }
 0x20d   : > { %2463 = vmatmul.bf16.gmra.mxu0 %v3176_v21  ;;  %v3871_v56 = vpack.c.bf16 %v2422_v19, %v2420_v49  ;;  %v2560_v8 = vadd.f32 %v2559_v63, %v2422_v19  ;;  %v2598_v17 = vmul.f32 %v2422_v19, %v2422_v19  ;;  %v3197_v49 = vld [vmem:[%s4062_s9 + $0x34c] sm:$0xf0] }
 0x20e   : > { %v2246_v27 = vpop.f32.mrf.mxu2  ;;  %v3200_v11 = vor.u32 %v3748_v52, %v3197_v49  ;;  %v3762_v52 = vld [vmem:[%s4062_s9 + $0x398] sm:$0xf0] }
 0x20f   : > { %3943 = vst [vmem:[%s4665_s11 + $0x8] sm:$0xff] %v3871_v56   ;;  %v2629_v36 = vadd.f32 %v2628_v29, %v2598_v17  ;;  %v2247_v28 = vadd.f32 %v2246_v27, %v2158_v26  ;;  %v2335_v35 = vpop.f32.mrf.mxu3  ;;  %v3758_v49 = vld [vmem:[%s4062_s9 + $0x37c] sm:$0xf] }
 0x210   : > { %v2159_v59 = vpop.f32.mrf.mxu1 }
 0x211   : > { %v2336_v42 = vadd.f32 %v2335_v35, %v2247_v28  ;;  %v2160_v33 = vadd.f32 %v2159_v59, %v4456_v61 }
 0x212   : > { %v2426_v40 = vpop.f32.mrf.mxu0 }
 0x213   : > { %v2425_v38 = vadd.f32 %v2424_v24, %v2336_v42  ;;  %v3757_v42 = vld [vmem:[%s4062_s9 + $0x374] sm:$0xf] }
 0x215   : > { %v2561_v10 = vadd.f32 %v2560_v8, %v2425_v38  ;;  %v2599_v63 = vmul.f32 %v2425_v38, %v2425_v38 }
 0x216   : > { %v2248_v3 = vpop.f32.mrf.mxu2 }
 0x217   : > { %v2630_v54 = vadd.f32 %v2629_v36, %v2599_v63  ;;  %v2249_v9 = vadd.f32 %v2248_v3, %v2160_v33  ;;  %v2337_v29 = vpop.f32.mrf.mxu3  ;;  %v3763_v63 = vld [vmem:[%s4062_s9 + $0x3a0] sm:$0xf0] }
 0x218   : > { %v2162_v14 = vpop.f32.mrf.mxu1 }
 0x219   : > { %v2338_v20 = vadd.f32 %v2337_v29, %v2249_v9  ;;  %v2163_v56 = vadd.f32 %v2162_v14, %v4461_v5  ;;  %v3244_v29 = vor.u32 %v3758_v49, %v3241_v55  ;;  %v3772_v49 = vld [vmem:[%s4062_s9 + $0x3e8] sm:$0xf0] }
 0x21a   : > { %v2429_v21 = vpop.f32.mrf.mxu0 }
 0x21b   : > { %v2427_v58 = vadd.f32 %v2426_v40, %v2338_v20  ;;  %2201 = vmatmul.bf16.gmra.mxu1 %v3200_v11  ;;  %2290 = vmatmul.bf16.gmra.mxu2 %v3204_v16  ;;  %v3233_v40 = vld [vmem:[%s4062_s9 + $0x394] sm:$0xf0] }
 0x21c   : > { %2379 = vmatmul.bf16.gmra.mxu3 %v3208_v15  ;;  %v3236_v3 = vor.u32 %v3757_v42, %v3233_v40 }
 0x21d   : > { %2468 = vmatmul.bf16.gmra.mxu0 %v3212_v45  ;;  %v3876_v61 = vpack.c.bf16 %v2427_v58, %v2425_v38  ;;  %v2562_v24 = vadd.f32 %v2561_v10, %v2427_v58  ;;  %v2600_v19 = vmul.f32 %v2427_v58, %v2427_v58  ;;  %v3239_v38 = vld [vmem:[%s4062_s9 + $0x378] sm:$0xf]  ;;  %v3247_v10 = vld [vmem:[%s4062_s9 + $0x380] sm:$0xf] }
 0x21e   : > { %v2251_v8 = vpop.f32.mrf.mxu2  ;;  %v3248_v11 = vor.u32 %v3763_v63, %v3247_v10 }
 0x21f   : > { %3944 = vst [vmem:[%s4665_s11 + $0x10] sm:$0xff] %v3876_v61   ;;  %v2631_v17 = vadd.f32 %v2630_v54, %v2600_v19  ;;  %v2252_v26 = vadd.f32 %v2251_v8, %v2163_v56  ;;  %v2340_v27 = vpop.f32.mrf.mxu3  ;;  %v3240_v54 = vor.u32 %v3762_v52, %v3239_v38  ;;  %v3277_v38 = vld [vmem:[%s4062_s9 + $0x3e4] sm:$0xf0] }
 0x220   : > { %v2164_v36 = vpop.f32.mrf.mxu1  ;;  %v3283_v52 = vld [vmem:[%s4062_s9 + $0x3c8] sm:$0xf] }
 0x221   : > { %v2341_v28 = vadd.f32 %v2340_v27, %v2252_v26  ;;  %v2165_v5 = vadd.f32 %v2164_v36, %v4469_v34  ;;  %v3766_v27 = vld [vmem:[%s4062_s9 + $0x3bc] sm:$0xf]  ;;  %v3269_v36 = vld [vmem:[%s4062_s9 + $0x3dc] sm:$0xf0] }
 0x222   : > { %v2431_v35 = vpop.f32.mrf.mxu0  ;;  %v3272_v10 = vor.u32 %v3766_v27, %v3269_v36  ;;  %v3313_v27 = vld [vmem:[%s4062_s9 + $0x42c] sm:$0xf0] }
 0x223   : > { %v2430_v59 = vadd.f32 %v2429_v21, %v2341_v28  ;;  %v3275_v28 = vld [vmem:[%s4062_s9 + $0x3c0] sm:$0xf]  ;;  %v3319_v36 = vld [vmem:[%s4062_s9 + $0x410] sm:$0xf] }
 0x225   : > { %v2563_v37 = vadd.f32 %v2562_v24, %v2430_v59  ;;  %v2601_v62 = vmul.f32 %v2430_v59, %v2430_v59 }
 0x226   : > { %v2253_v33 = vpop.f32.mrf.mxu2 }
 0x227   : > { %v2632_v2 = vadd.f32 %v2631_v17, %v2601_v62  ;;  %v2254_v22 = vadd.f32 %v2253_v33, %v2165_v5  ;;  %v2342_v44 = vpop.f32.mrf.mxu3 }
 0x228   : > { %v2167_v9 = vpop.f32.mrf.mxu1 }
 0x229   : > { %v2343_v16 = vadd.f32 %v2342_v44, %v2254_v22  ;;  %v2168_v21 = vadd.f32 %v2167_v9, %v4486_v43  ;;  %v3284_v22 = vor.u32 %v3772_v49, %v3283_v52 }
 0x22a   : > { %v2434_v14 = vpop.f32.mrf.mxu0 }
 0x22b   : > { %v2432_v15 = vadd.f32 %v2431_v35, %v2343_v16  ;;  %2206 = vmatmul.bf16.gmra.mxu1 %v3236_v3  ;;  %2295 = vmatmul.bf16.gmra.mxu2 %v3240_v54  ;;  %v3771_v35 = vld [vmem:[%s4062_s9 + $0x3e0] sm:$0xf0] }
 0x22c   : > { %2384 = vmatmul.bf16.gmra.mxu3 %v3244_v29  ;;  %v3276_v63 = vor.u32 %v3771_v35, %v3275_v28  ;;  %v3781_v28 = vld [vmem:[%s4062_s9 + $0x430] sm:$0xf0] }
 0x22d   : > { %2473 = vmatmul.bf16.gmra.mxu0 %v3248_v11  ;;  %v3881_v34 = vpack.c.bf16 %v2432_v15, %v2430_v59  ;;  %v2564_v45 = vadd.f32 %v2563_v37, %v2432_v15  ;;  %v2602_v20 = vmul.f32 %v2432_v15, %v2432_v15  ;;  %v3767_v59 = vld [vmem:[%s4062_s9 + $0x3c4] sm:$0xf] }
 0x22e   : > { %v2256_v58 = vpop.f32.mrf.mxu2 }
 0x22f   : > { %3945 = vst [vmem:[%s4665_s11 + $0x18] sm:$0xff] %v3881_v34   ;;  %v2633_v61 = vadd.f32 %v2632_v2, %v2602_v20  ;;  %v2257_v24 = vadd.f32 %v2256_v58, %v2168_v21  ;;  %v2345_v19 = vpop.f32.mrf.mxu3  ;;  %v3280_v2 = vor.u32 %v3767_v59, %v3277_v38 }
 0x230   : > { %v2169_v56 = vpop.f32.mrf.mxu1 }
 0x231   : > { %v2346_v8 = vadd.f32 %v2345_v19, %v2257_v24  ;;  %v2170_v43 = vadd.f32 %v2169_v56, %v4495_v39  ;;  %v3305_v24 = vld [vmem:[%s4062_s9 + $0x424] sm:$0xf0]  ;;  %v3780_v56 = vld [vmem:[%s4062_s9 + $0x428] sm:$0xf0] }
 0x232   : > { %v2436_v17 = vpop.f32.mrf.mxu0  ;;  %v3311_v19 = vld [vmem:[%s4062_s9 + $0x408] sm:$0xf] }
 0x233   : > { %v2435_v26 = vadd.f32 %v2434_v14, %v2346_v8  ;;  %v3776_v8 = vld [vmem:[%s4062_s9 + $0x40c] sm:$0xf]  ;;  %v3312_v38 = vor.u32 %v3780_v56, %v3311_v19 }
 0x234   : > { %v3316_v49 = vor.u32 %v3776_v8, %v3313_v27 }
 0x235   : > { %v2565_v42 = vadd.f32 %v2564_v45, %v2435_v26  ;;  %v2603_v40 = vmul.f32 %v2435_v26, %v2435_v26 }
 0x236   : > { %v2258_v37 = vpop.f32.mrf.mxu2 }
 0x237   : > { %v2634_v62 = vadd.f32 %v2633_v61, %v2603_v40  ;;  %v2259_v5 = vadd.f32 %v2258_v37, %v2170_v43  ;;  %v2347_v55 = vpop.f32.mrf.mxu3  ;;  %v3775_v61 = vld [vmem:[%s4062_s9 + $0x404] sm:$0xf]  ;;  %v3320_v37 = vor.u32 %v3781_v28, %v3319_v36 }
 0x238   : > { %v2172_v33 = vpop.f32.mrf.mxu1  ;;  %v3308_v43 = vor.u32 %v3775_v61, %v3305_v24  ;;  %v3790_v61 = vld [vmem:[%s4062_s9 + $0x478] sm:$0xf0] }
 0x239   : > { %v2348_v44 = vadd.f32 %v2347_v55, %v2259_v5  ;;  %v2173_v11 = vadd.f32 %v2172_v33, %v4500_v53 }
 0x23a   : > { %v2439_v3 = vpop.f32.mrf.mxu0 }
 0x23b   : > { %v2437_v54 = vadd.f32 %v2436_v17, %v2348_v44  ;;  %2211 = vmatmul.bf16.gmra.mxu1 %v3272_v10  ;;  %2300 = vmatmul.bf16.gmra.mxu2 %v3276_v63 }
 0x23c   : > { %2389 = vmatmul.bf16.gmra.mxu3 %v3280_v2 }
 0x23d   : > { %2478 = vmatmul.bf16.gmra.mxu0 %v3284_v22  ;;  %v3886_v39 = vpack.c.bf16 %v2437_v54, %v2435_v26  ;;  %v2566_v9 = vadd.f32 %v2565_v42, %v2437_v54  ;;  %v2604_v29 = vmul.f32 %v2437_v54, %v2437_v54 }
 0x23e   : > { %v2261_v16 = vpop.f32.mrf.mxu2 }
 0x23f   : > { %3946 = vst [vmem:[%s4665_s11 + $0x20] sm:$0xff] %v3886_v39   ;;  %v2635_v14 = vadd.f32 %v2634_v62, %v2604_v29  ;;  %v2262_v15 = vadd.f32 %v2261_v16, %v2173_v11  ;;  %v2350_v34 = vpop.f32.mrf.mxu3  ;;  %v3784_v11 = vld [vmem:[%s4062_s9 + $0x44c] sm:$0xf]  ;;  %v3341_v16 = vld [vmem:[%s4062_s9 + $0x46c] sm:$0xf0] }
 0x240   : > { %v2174_v45 = vpop.f32.mrf.mxu1 }
 0x241   : > { %v2351_v20 = vadd.f32 %v2350_v34, %v2262_v15  ;;  %v2175_v53 = vadd.f32 %v2174_v45, %v4509_v60  ;;  %v3789_v15 = vld [vmem:[%s4062_s9 + $0x470] sm:$0xf0] }
 0x242   : > { %v2441_v21 = vpop.f32.mrf.mxu0  ;;  %v3785_v34 = vld [vmem:[%s4062_s9 + $0x454] sm:$0xf] }
 0x243   : > { %v2440_v58 = vadd.f32 %v2439_v3, %v2351_v20 }
 0x245   : > { %v2567_v17 = vadd.f32 %v2566_v9, %v2440_v58  ;;  %v2605_v26 = vmul.f32 %v2440_v58, %v2440_v58 }
 0x246   : > { %v2263_v35 = vpop.f32.mrf.mxu2 }
 0x247   : > { %v2636_v59 = vadd.f32 %v2635_v14, %v2605_v26  ;;  %v2264_v42 = vadd.f32 %v2263_v35, %v2175_v53  ;;  %v2352_v40 = vpop.f32.mrf.mxu3  ;;  %v3347_v14 = vld [vmem:[%s4062_s9 + $0x450] sm:$0xf] }
 0x248   : > { %v2177_v52 = vpop.f32.mrf.mxu1  ;;  %v3348_v26 = vor.u32 %v3789_v15, %v3347_v14 }
 0x249   : > { %v2353_v62 = vadd.f32 %v2352_v40, %v2264_v42  ;;  %v2178_v33 = vadd.f32 %v2177_v52, %v4514_v41 }
 0x24a   : > { %v2444_v5 = vpop.f32.mrf.mxu0 }
 0x24b   : > { %v2442_v55 = vadd.f32 %v2441_v21, %v2353_v62  ;;  %2216 = vmatmul.bf16.gmra.mxu1 %v3308_v43  ;;  %2305 = vmatmul.bf16.gmra.mxu2 %v3312_v38  ;;  %v3349_v21 = vld [vmem:[%s4062_s9 + $0x474] sm:$0xf0] }
 0x24c   : > { %2394 = vmatmul.bf16.gmra.mxu3 %v3316_v49  ;;  %v3352_v27 = vor.u32 %v3785_v34, %v3349_v21 }
 0x24d   : > { %2483 = vmatmul.bf16.gmra.mxu0 %v3320_v37  ;;  %v3891_v60 = vpack.c.bf16 %v2442_v55, %v2440_v58  ;;  %v2568_v10 = vadd.f32 %v2567_v17, %v2442_v55  ;;  %v2606_v63 = vmul.f32 %v2442_v55, %v2442_v55  ;;  %v3355_v58 = vld [vmem:[%s4062_s9 + $0x458] sm:$0xf]  ;;  %v3344_v17 = vor.u32 %v3784_v11, %v3341_v16 }
 0x24e   : > { %v2266_v2 = vpop.f32.mrf.mxu2  ;;  %v3356_v36 = vor.u32 %v3790_v61, %v3355_v58 }
 0x24f   : > { %3947 = vst [vmem:[%s4665_s11 + $0x28] sm:$0xff] %v3891_v60   ;;  %v2637_v22 = vadd.f32 %v2636_v59, %v2606_v63  ;;  %v2267_v44 = vadd.f32 %v2266_v2, %v2178_v33  ;;  %v2355_v3 = vpop.f32.mrf.mxu3 }
 0x250   : > { %v2179_v54 = vpop.f32.mrf.mxu1 }
 0x251   : > { %v2356_v39 = vadd.f32 %v2355_v3, %v2267_v44  ;;  %v2180_v41 = vadd.f32 %v2179_v54, %v4523_v18 }
 0x252   : > { %v2446_v9 = vpop.f32.mrf.mxu0 }
 0x253   : > { %v2445_v29 = vadd.f32 %v2444_v5, %v2356_v39 }
 0x255   : > { %v2569_v45 = vadd.f32 %v2568_v10, %v2445_v29  ;;  %v2607_v20 = vmul.f32 %v2445_v29, %v2445_v29 }
 0x256   : > { %v2268_v24 = vpop.f32.mrf.mxu2 }
 0x257   : > { %v2638_v19 = vadd.f32 %v2637_v22, %v2607_v20  ;;  %v2269_v56 = vadd.f32 %v2268_v24, %v2180_v41  ;;  %v2357_v8 = vpop.f32.mrf.mxu3 }
 0x258   : > { %v2182_v53 = vpop.f32.mrf.mxu1 }
 0x259   : > { %v2358_v28 = vadd.f32 %v2357_v8, %v2269_v56  ;;  %v2183_v43 = vadd.f32 %v2182_v53, %v4528_v25 }
 0x25a   : > { %v2449_v35 = vpop.f32.mrf.mxu0 }
 0x25b   : > { %v2447_v59 = vadd.f32 %v2446_v9, %v2358_v28  ;;  %2221 = vmatmul.bf16.gmra.mxu1 %v3344_v17  ;;  %2310 = vmatmul.bf16.gmra.mxu2 %v3348_v26 }
 0x25c   : > { %2399 = vmatmul.bf16.gmra.mxu3 %v3352_v27 }
 0x25d   : > { %2488 = vmatmul.bf16.gmra.mxu0 %v3356_v36  ;;  %v3896_v18 = vpack.c.bf16 %v2447_v59, %v2445_v29  ;;  %v2570_v42 = vadd.f32 %v2569_v45, %v2447_v59  ;;  %v2608_v40 = vmul.f32 %v2447_v59, %v2447_v59 }
 0x25e   : > { %v2271_v38 = vpop.f32.mrf.mxu2 }
 0x25f   : > { %3948 = vst [vmem:[%s4665_s11 + $0x30] sm:$0xff] %v3896_v18   ;;  %v2639_v52 = vadd.f32 %v2638_v19, %v2608_v40  ;;  %v2272_v49 = vadd.f32 %v2271_v38, %v2183_v43  ;;  %v2360_v37 = vpop.f32.mrf.mxu3 }
 0x260   : > { %v2184_v62 = vpop.f32.mrf.mxu1 }
 0x261   : > { %v2361_v5 = vadd.f32 %v2360_v37, %v2272_v49  ;;  %v2185_v33 = vadd.f32 %v2184_v62, %v4537_v46 }
 0x262   : > { %v2451_v55 = vpop.f32.mrf.mxu0 }
 0x263   : > { %v2450_v60 = vadd.f32 %v2449_v35, %v2361_v5 }
 0x265   : > { %v2571_v10 = vadd.f32 %v2570_v42, %v2450_v60  ;;  %v2609_v63 = vmul.f32 %v2450_v60, %v2450_v60 }
 0x266   : > { %v2273_v2 = vpop.f32.mrf.mxu2 }
 0x267   : > { %v2640_v22 = vadd.f32 %v2639_v52, %v2609_v63  ;;  %v2274_v44 = vadd.f32 %v2273_v2, %v2185_v33  ;;  %v2362_v3 = vpop.f32.mrf.mxu3 }
 0x268   : > { %v2187_v54 = vpop.f32.mrf.mxu1 }
 0x269   : > { %v2363_v25 = vadd.f32 %v2362_v3, %v2274_v44  ;;  %v2188_v14 = vadd.f32 %v2187_v54, %v4542_v57 }
 0x26a   : > { %v2454_v39 = vpop.f32.mrf.mxu0 }
 0x26b   : > { %v2452_v9 = vadd.f32 %v2451_v55, %v2363_v25 }
 0x26d   : > { %v3901_v29 = vpack.c.bf16 %v2452_v9, %v2450_v60  ;;  %v2572_v11 = vadd.f32 %v2571_v10, %v2452_v9  ;;  %v2610_v16 = vmul.f32 %v2452_v9, %v2452_v9 }
 0x26e   : > { %v2276_v15 = vpop.f32.mrf.mxu2 }
 0x26f   : > { %3949 = vst [vmem:[%s4665_s11 + $0x38] sm:$0xff] %v3901_v29   ;;  %v2641_v34 = vadd.f32 %v2640_v22, %v2610_v16  ;;  %v2277_v45 = vadd.f32 %v2276_v15, %v2188_v14  ;;  %v2365_v20 = vpop.f32.mrf.mxu3 }
 0x270   : > { %v2189_v41 = vpop.f32.mrf.mxu1 }
 0x271   : > { %v2366_v46 = vadd.f32 %v2365_v20, %v2277_v45  ;;  %v2190_v19 = vadd.f32 %v2189_v41, %v4551_v50 }
 0x272   : > { %v2456_v21 = vpop.f32.mrf.mxu0 }
 0x273   : > { %v2455_v58 = vadd.f32 %v2454_v39, %v2366_v46 }
 0x275   : > { %v2573_v61 = vadd.f32 %v2572_v11, %v2455_v58  ;;  %v2611_v24 = vmul.f32 %v2455_v58, %v2455_v58 }
 0x276   : > { %v2278_v56 = vpop.f32.mrf.mxu2 }
 0x277   : > { %v2642_v8 = vadd.f32 %v2641_v34, %v2611_v24  ;;  %v2279_v17 = vadd.f32 %v2278_v56, %v2190_v19  ;;  %v2367_v26 = vpop.f32.mrf.mxu3 }
 0x278   : > { %v2192_v53 = vpop.f32.mrf.mxu1 }
 0x279   : > { %v2368_v57 = vadd.f32 %v2367_v26, %v2279_v17  ;;  %v2193_v18 = vadd.f32 %v2192_v53, %v4556_v4 }
 0x27a   : > { %v2459_v27 = vpop.f32.mrf.mxu0 }
 0x27b   : > { %v2457_v36 = vadd.f32 %v2456_v21, %v2368_v57 }
 0x27d   : > { %v3906_v28 = vpack.c.bf16 %v2457_v36, %v2455_v58  ;;  %v2574_v35 = vadd.f32 %v2573_v61, %v2457_v36  ;;  %v2612_v59 = vmul.f32 %v2457_v36, %v2457_v36 }
 0x27e   : > { %v2281_v42 = vpop.f32.mrf.mxu2 }
 0x27f   : > { %3950 = vst [vmem:[%s4665_s11 + $0x40] sm:$0xff] %v3906_v28   ;;  %v2643_v40 = vadd.f32 %v2642_v8, %v2612_v59  ;;  %v2282_v43 = vadd.f32 %v2281_v42, %v2193_v18  ;;  %v2370_v38 = vpop.f32.mrf.mxu3 }
 0x280   : > { %v2194_v52 = vpop.f32.mrf.mxu1 }
 0x281   : > { %v2371_v50 = vadd.f32 %v2370_v38, %v2282_v43  ;;  %v2195_v55 = vadd.f32 %v2194_v52, %v4565_v6 }
 0x282   : > { %v2461_v49 = vpop.f32.mrf.mxu0 }
 0x283   : > { %v2460_v37 = vadd.f32 %v2459_v27, %v2371_v50 }
 0x285   : > { %v2575_v62 = vadd.f32 %v2574_v35, %v2460_v37  ;;  %v2613_v5 = vmul.f32 %v2460_v37, %v2460_v37 }
 0x286   : > { %v2283_v60 = vpop.f32.mrf.mxu2 }
 0x287   : > { %v2644_v10 = vadd.f32 %v2643_v40, %v2613_v5  ;;  %v2284_v63 = vadd.f32 %v2283_v60, %v2195_v55  ;;  %v2372_v33 = vpop.f32.mrf.mxu3 }
 0x288   : > { %v2197_v2 = vpop.f32.mrf.mxu1 }
 0x289   : > { %v2373_v4 = vadd.f32 %v2372_v33, %v2284_v63  ;;  %v2198_v39 = vadd.f32 %v2197_v2, %v4570_v30 }
 0x28a   : > { %v2464_v22 = vpop.f32.mrf.mxu0 }
 0x28b   : > { %v2462_v44 = vadd.f32 %v2461_v49, %v2373_v4 }
 0x28d   : > { %v3911_v3 = vpack.c.bf16 %v2462_v44, %v2460_v37  ;;  %v2576_v54 = vadd.f32 %v2575_v62, %v2462_v44  ;;  %v2614_v25 = vmul.f32 %v2462_v44, %v2462_v44 }
 0x28e   : > { %v2286_v9 = vpop.f32.mrf.mxu2 }
 0x28f   : > { %3951 = vst [vmem:[%s4665_s11 + $0x48] sm:$0xff] %v3911_v3   ;;  %v2645_v29 = vadd.f32 %v2644_v10, %v2614_v25  ;;  %v2287_v11 = vadd.f32 %v2286_v9, %v2198_v39  ;;  %v2375_v16 = vpop.f32.mrf.mxu3 }
 0x290   : > { %v2199_v14 = vpop.f32.mrf.mxu1 }
 0x291   : > { %v2376_v6 = vadd.f32 %v2375_v16, %v2287_v11  ;;  %v2200_v41 = vadd.f32 %v2199_v14, %v4579_v31 }
 0x292   : > { %v2466_v15 = vpop.f32.mrf.mxu0 }
 0x293   : > { %v2465_v34 = vadd.f32 %v2464_v22, %v2376_v6 }
 0x295   : > { %v2577_v45 = vadd.f32 %v2576_v54, %v2465_v34  ;;  %v2615_v20 = vmul.f32 %v2465_v34, %v2465_v34 }
 0x296   : > { %v2288_v46 = vpop.f32.mrf.mxu2 }
 0x297   : > { %v2646_v21 = vadd.f32 %v2645_v29, %v2615_v20  ;;  %v2289_v58 = vadd.f32 %v2288_v46, %v2200_v41  ;;  %v2377_v61 = vpop.f32.mrf.mxu3 }
 0x298   : > { %v2202_v24 = vpop.f32.mrf.mxu1 }
 0x299   : > { %v2378_v30 = vadd.f32 %v2377_v61, %v2289_v58  ;;  %v2203_v53 = vadd.f32 %v2202_v24, %v4584_v48 }
 0x29a   : > { %v2469_v19 = vpop.f32.mrf.mxu0 }
 0x29b   : > { %v2467_v56 = vadd.f32 %v2466_v15, %v2378_v30 }
 0x29d   : > { %v3916_v8 = vpack.c.bf16 %v2467_v56, %v2465_v34  ;;  %v2578_v17 = vadd.f32 %v2577_v45, %v2467_v56  ;;  %v2616_v26 = vmul.f32 %v2467_v56, %v2467_v56 }
 0x29e   : > { %v2291_v57 = vpop.f32.mrf.mxu2 }
 0x29f   : > { %3952 = vst [vmem:[%s4665_s11 + $0x50] sm:$0xff] %v3916_v8   ;;  %v2647_v27 = vadd.f32 %v2646_v21, %v2616_v26  ;;  %v2292_v36 = vadd.f32 %v2291_v57, %v2203_v53  ;;  %v2380_v28 = vpop.f32.mrf.mxu3 }
 0x2a0   : > { %v2204_v35 = vpop.f32.mrf.mxu1 }
 0x2a1   : > { %v2381_v31 = vadd.f32 %v2380_v28, %v2292_v36  ;;  %v2205_v43 = vadd.f32 %v2204_v35, %v4593_v0 }
 0x2a2   : > { %v2471_v59 = vpop.f32.mrf.mxu0 }
 0x2a3   : > { %v2470_v18 = vadd.f32 %v2469_v19, %v2381_v31 }
 0x2a5   : > { %v2579_v42 = vadd.f32 %v2578_v17, %v2470_v18  ;;  %v2617_v40 = vmul.f32 %v2470_v18, %v2470_v18 }
 0x2a6   : > { %v2293_v38 = vpop.f32.mrf.mxu2 }
 0x2a7   : > { %v2648_v52 = vadd.f32 %v2647_v27, %v2617_v40  ;;  %v2294_v50 = vadd.f32 %v2293_v38, %v2205_v43  ;;  %v2382_v49 = vpop.f32.mrf.mxu3 }
 0x2a8   : > { %v2207_v37 = vpop.f32.mrf.mxu1 }
 0x2a9   : > { %v2383_v48 = vadd.f32 %v2382_v49, %v2294_v50  ;;  %v2208_v63 = vadd.f32 %v2207_v37, %v4598_v47 }
 0x2aa   : > { %v2474_v62 = vpop.f32.mrf.mxu0 }
 0x2ab   : > { %v2472_v5 = vadd.f32 %v2471_v59, %v2383_v48 }
 0x2ad   : > { %v3921_v55 = vpack.c.bf16 %v2472_v5, %v2470_v18  ;;  %v2580_v60 = vadd.f32 %v2579_v42, %v2472_v5  ;;  %v2618_v10 = vmul.f32 %v2472_v5, %v2472_v5 }
 0x2ae   : > { %v2296_v33 = vpop.f32.mrf.mxu2 }
 0x2af   : > { %3953 = vst [vmem:[%s4665_s11 + $0x58] sm:$0xff] %v3921_v55   ;;  %v2649_v2 = vadd.f32 %v2648_v52, %v2618_v10  ;;  %v2297_v4 = vadd.f32 %v2296_v33, %v2208_v63  ;;  %v2385_v22 = vpop.f32.mrf.mxu3 }
 0x2b0   : > { %v2209_v44 = vpop.f32.mrf.mxu1 }
 0x2b1   : > { %v2386_v0 = vadd.f32 %v2385_v22, %v2297_v4  ;;  %v2210_v9 = vadd.f32 %v2209_v44, %v4607_v51 }
 0x2b2   : > { %v2476_v3 = vpop.f32.mrf.mxu0 }
 0x2b3   : > { %v2475_v54 = vadd.f32 %v2474_v62, %v2386_v0 }
 0x2b5   : > { %v2581_v25 = vadd.f32 %v2580_v60, %v2475_v54  ;;  %v2619_v39 = vmul.f32 %v2475_v54, %v2475_v54 }
 0x2b6   : > { %v2298_v29 = vpop.f32.mrf.mxu2 }
 0x2b7   : > { %v2650_v11 = vadd.f32 %v2649_v2, %v2619_v39  ;;  %v2299_v16 = vadd.f32 %v2298_v29, %v2210_v9  ;;  %v2387_v14 = vpop.f32.mrf.mxu3 }
 0x2b8   : > { %v2212_v6 = vpop.f32.mrf.mxu1 }
 0x2b9   : > { %v2388_v47 = vadd.f32 %v2387_v14, %v2299_v16  ;;  %v2213_v46 = vadd.f32 %v2212_v6, %v4612_v23 }
 0x2ba   : > { %v2479_v15 = vpop.f32.mrf.mxu0 }
 0x2bb   : > { %v2477_v34 = vadd.f32 %v2476_v3, %v2388_v47 }
 0x2bd   : > { %v3926_v45 = vpack.c.bf16 %v2477_v34, %v2475_v54  ;;  %v2582_v20 = vadd.f32 %v2581_v25, %v2477_v34  ;;  %v2620_v41 = vmul.f32 %v2477_v34, %v2477_v34 }
 0x2be   : > { %v2301_v21 = vpop.f32.mrf.mxu2 }
 0x2bf   : > { %3954 = vst [vmem:[%s4665_s11 + $0x60] sm:$0xff] %v3926_v45   ;;  %v2651_v58 = vadd.f32 %v2650_v11, %v2620_v41  ;;  %v2302_v61 = vadd.f32 %v2301_v21, %v2213_v46  ;;  %v2390_v24 = vpop.f32.mrf.mxu3 }
 0x2c0   : > { %v2214_v30 = vpop.f32.mrf.mxu1 }
 0x2c1   : > { %v2391_v51 = vadd.f32 %v2390_v24, %v2302_v61  ;;  %v2215_v26 = vadd.f32 %v2214_v30, %v4621_v7 }
 0x2c2   : > { %v2481_v19 = vpop.f32.mrf.mxu0 }
 0x2c3   : > { %v2480_v56 = vadd.f32 %v2479_v15, %v2391_v51 }
 0x2c5   : > { %v2583_v8 = vadd.f32 %v2582_v20, %v2480_v56  ;;  %v2621_v17 = vmul.f32 %v2480_v56, %v2480_v56 }
 0x2c6   : > { %v2303_v53 = vpop.f32.mrf.mxu2 }
 0x2c7   : > { %v2652_v57 = vadd.f32 %v2651_v58, %v2621_v17  ;;  %v2304_v27 = vadd.f32 %v2303_v53, %v2215_v26  ;;  %v2392_v36 = vpop.f32.mrf.mxu3 }
 0x2c8   : > { %v2217_v28 = vpop.f32.mrf.mxu1 }
 0x2c9   : > { %v2393_v23 = vadd.f32 %v2392_v36, %v2304_v27  ;;  %v2218_v40 = vadd.f32 %v2217_v28, %v4626_v12 }
 0x2ca   : > { %v2484_v31 = vpop.f32.mrf.mxu0 }
 0x2cb   : > { %v2482_v35 = vadd.f32 %v2481_v19, %v2393_v23 }
 0x2cd   : > { %v3931_v59 = vpack.c.bf16 %v2482_v35, %v2480_v56  ;;  %v2584_v18 = vadd.f32 %v2583_v8, %v2482_v35  ;;  %v2622_v42 = vmul.f32 %v2482_v35, %v2482_v35 }
 0x2ce   : > { %v2306_v43 = vpop.f32.mrf.mxu2 }
 0x2cf   : > { %3955 = vst [vmem:[%s4665_s11 + $0x68] sm:$0xff] %v3931_v59   ;;  %v2653_v38 = vadd.f32 %v2652_v57, %v2622_v42  ;;  %v2307_v52 = vadd.f32 %v2306_v43, %v2218_v40  ;;  %v2395_v50 = vpop.f32.mrf.mxu3 }
 0x2d0   : > { %v2219_v49 = vpop.f32.mrf.mxu1 }
 0x2d1   : > { %v2396_v7 = vadd.f32 %v2395_v50, %v2307_v52  ;;  %v2220_v5 = vadd.f32 %v2219_v49, %v4635_v32 }
 0x2d2   : > { %v2486_v55 = vpop.f32.mrf.mxu0 }
 0x2d3   : > { %v2485_v37 = vadd.f32 %v2484_v31, %v2396_v7 }
 0x2d5   : > { %v2585_v48 = vadd.f32 %v2584_v18, %v2485_v37  ;;  %v2623_v62 = vmul.f32 %v2485_v37, %v2485_v37 }
 0x2d6   : > { %v2308_v60 = vpop.f32.mrf.mxu2 }
 0x2d7   : > { %v2654_v10 = vadd.f32 %v2653_v38, %v2623_v62  ;;  %v2309_v63 = vadd.f32 %v2308_v60, %v2220_v5  ;;  %v2397_v33 = vpop.f32.mrf.mxu3 }
 0x2d8   : > { %v2222_v2 = vpop.f32.mrf.mxu1 }
 0x2d9   : > { %v2398_v12 = vadd.f32 %v2397_v33, %v2309_v63  ;;  %v2223_v3 = vadd.f32 %v2222_v2, %v4640_v13 }
 0x2da   : > { %v2489_v29 = vpop.f32.mrf.mxu0 }
 0x2db   : > { %v2487_v4 = vadd.f32 %v2486_v55, %v2398_v12 }
 0x2dd   : > { %v3936_v22 = vpack.c.bf16 %v2487_v4, %v2485_v37  ;;  %v2586_v44 = vadd.f32 %v2585_v48, %v2487_v4  ;;  %v2624_v0 = vmul.f32 %v2487_v4, %v2487_v4 }
 0x2de   : > { %v2311_v54 = vpop.f32.mrf.mxu2 }
 0x2df   : > { %3956 = vst [vmem:[%s4665_s11 + $0x70] sm:$0xff] %v3936_v22   ;;  %v2655_v25 = vadd.f32 %v2654_v10, %v2624_v0  ;;  %v2312_v39 = vadd.f32 %v2311_v54, %v2223_v3  ;;  %v2400_v9 = vpop.f32.mrf.mxu3 }
 0x2e0   : > { %v2224_v11 = vpop.f32.mrf.mxu1 }
 0x2e1   : > { %v2401_v32 = vadd.f32 %v2400_v9, %v2312_v39  ;;  %v2225_v47 = vadd.f32 %v2224_v11, %v4649_v1 }
 0x2e2   : > { %v2491_v41 = vpop.f32.mrf.mxu0 }
 0x2e3   : > { %v2490_v16 = vadd.f32 %v2489_v29, %v2401_v32 }
 0x2e5   : > { %v2587_v14 = vadd.f32 %v2586_v44, %v2490_v16  ;;  %v2625_v6 = vmul.f32 %v2490_v16, %v2490_v16 }
 0x2e6   : > { %v2313_v15 = vpop.f32.mrf.mxu2 }
 0x2e7   : > { %v2656_v34 = vadd.f32 %v2655_v25, %v2625_v6  ;;  %v2314_v45 = vadd.f32 %v2313_v15, %v2225_v47  ;;  %v2402_v13 = vpop.f32.mrf.mxu3 }
 0x2e9   : > { %v2403_v20 = vadd.f32 %v2402_v13, %v2314_v45 }
 0x2eb   : > { %v2492_v46 = vadd.f32 %v2491_v41, %v2403_v20 }
 0x2ed   : > { %v3941_v21 = vpack.c.bf16 %v2492_v46, %v2490_v16  ;;  %v2588_v58 = vadd.f32 %v2587_v14, %v2492_v46  ;;  %v2626_v61 = vmul.f32 %v2492_v46, %v2492_v46 }
 0x2ef   : > { %3957 = vst [vmem:[%s4665_s11 + $0x78] sm:$0xff] %v3941_v21   ;;  %v2589_v24 = vrot.slane %v2588_v58, 4  ;;  %v2657_v30 = vadd.f32 %v2656_v34, %v2626_v61 }
 0x2f1   : > { %v2590_v51 = vadd.f32 %v2589_v24, %v2588_v58  ;;  %v2658_v19 = vrot.slane %v2657_v30, 4 }
 0x2f3   : > { %v2591_v56 = vrot.slane %v2590_v51, 2  ;;  %v2659_v8 = vadd.f32 %v2658_v19, %v2657_v30 }
 0x2f5   : > { %v2592_v1 = vadd.f32 %v2591_v56, %v2590_v51  ;;  %v2660_v17 = vrot.slane %v2659_v8, 2 }
 0x2f7   : > { %v2593_v26 = vrot.slane %v2592_v1, 1  ;;  %v2661_v53 = vadd.f32 %v2660_v17, %v2659_v8 }
 0x2f9   : > { %v2594_v57 = vadd.f32 %v2593_v26, %v2592_v1  ;;  %v2662_v27 = vrot.slane %v2661_v53, 1 }
 0x2fb   : > { %v2663_v36 = vadd.f32 %v2662_v27, %v2661_v53  ;;  %2664 = vst [vmem:[%s217_s12] sm:$0x1] %v2594_v57 }
 0x2fd   : > { %2665 = vst [vmem:[%s220_s17] sm:$0x1] %v2663_v36 }
 0x2fe PF: > { %s15_s15 = sadd.s32 1, %s3997_s15  }
 0x2ff   : > { %p12_p5 = scmp.ge.s32.totalorder %s15_s15, 4  }
 0x301   :  { %14 = sbr.rel (!%p12_p5) target bundleno = 1 (0x1), region = 82 }

</bundles_post_ra>
